<compile_context>
chip_gen: v7x
topology: tpu7x:2x2x1
jax: 0.10.0
libtpu: 0.0.40
codegen_flags: <defaults>
</compile_context>

<pallas_src>
import jax
import jax.numpy as jnp
from jax.experimental import pallas as pl
from jax.experimental.pallas import tpu as pltpu

NEG_BIG = -1e30   # "minus infinity" for padded logit columns (finite: no inf/nan risk)


def round_up(x, m):
    return ((x + m - 1) // m) * m


def layer_dims(window, n):
    """Feature widths of WeirdNetwork: input + 10 hidden widths + 3-way output."""
    w = window * n
    return [w, 48 * w, 48 * w, 96 * w, 48 * w, 16 * w, 8 * w, 4 * w,
            2 * w, w, w // 2, 3]


def padded_dims(dims):
    """Pad every activation width to a multiple of 128.  All layers except the
    final logits need one extra slot for the constant 'ones' (bias) column."""
    pads = [round_up(d + 1, 128) for d in dims[:-1]]
    pads.append(round_up(dims[-1], 128))
    return pads


def init_packed_weights(key, window, n):
    """Synthetic PyTorch-Linear-style init, packed into lane-dense bf16 slabs.

    Packed layout of layer l (din -> dout), shape (din_pad, dout_pad):
        [:din, :dout] = W^T     (real weights, transposed to (in, out))
        [din,  :dout] = bias    (picked up via the activations' ones column)
        [din,  dout]  = 1.0     (propagates the ones column)    [hidden layers]
        [din,  dout:] = -1e30   (kills padded logits in softmax) [output layer]
        everything else = 0;  ReLU(0)=0 keeps the padding inert.
    """
    dims = layer_dims(window, n)
    pads = padded_dims(dims)
    n_layers = len(dims) - 1
    packed = []
    for l in range(n_layers):
        din, dout = dims[l], dims[l + 1]
        dip, dop = pads[l], pads[l + 1]
        key, kw, kb = jax.random.split(key, 3)
        bound = 1.0 / (din ** 0.5)
        w_t = jax.random.uniform(kw, (din, dout), jnp.float32, -bound, bound)
        b = jax.random.uniform(kb, (dout,), jnp.float32, -bound, bound)
        wp = jnp.zeros((dip, dop), jnp.float32)
        wp = wp.at[:din, :dout].set(w_t)
        wp = wp.at[din, :dout].set(b)
        if l < n_layers - 1:
            wp = wp.at[din, dout].set(1.0)
        else:
            wp = wp.at[din, dout:].set(NEG_BIG)
        packed.append(wp.astype(jnp.bfloat16))
    return packed, dims, pads


def mlp_kernel(x_ref, *refs):
    """Fused 11-layer MLP + log-softmax on one (TB, 128k)-aligned batch tile."""
    w_refs, o_ref = refs[:-1], refs[-1]
    n_layers = len(w_refs)
    h = x_ref[...]                                       # bf16 (TB, d0_pad)
    logits = None
    for l, w_ref in enumerate(w_refs):
        acc = jnp.dot(h, w_ref[...], preferred_element_type=jnp.float32)
        if l < n_layers - 1:
            # ReLU in f32 on the VPU; cast back to bf16 for the next MXU pass.
            h = jnp.maximum(acc, 0.0).astype(jnp.bfloat16)
        else:
            logits = acc                                 # f32 (TB, 128)
    # Stable log-softmax in f32; padded columns hold ~-1e30 -> exp() == 0, so the
    # 128-wide normalization equals the real 3-wide one.  exp/log run on the EUP
    # and max/sum on the XLU -- off the MXU critical path.
    m = jnp.max(logits, axis=-1, keepdims=True)
    z = logits - m
    lse = jnp.log(jnp.sum(jnp.exp(z), axis=-1, keepdims=True))
    o_ref[...] = (z - lse).astype(o_ref.dtype)


def _device_kind():
    try:
        return jax.devices()[0].device_kind.lower()
    except Exception:
        return ""


def _physical_vmem_bytes():
    try:
        return int(pltpu.get_tpu_info().vmem_capacity_bytes)
    except Exception:
        return 64 << 20            # conservative: v7x per-TC VMEM


def _build_mlp_call(packed_weights, tb, b_pad, d0_pad, out_pad,
                    vmem_limit_bytes, cost, single_buffer_weights):
    x_spec = pl.BlockSpec((tb, d0_pad), lambda i: (i, 0))
    # Constant block index => each weight is fetched once and stays VMEM-resident.
    # Buffered(1): no point double-buffering a block that is never re-fetched.
    w_kwargs = {"pipeline_mode": pl.Buffered(1)} if single_buffer_weights else {}
    w_specs = [pl.BlockSpec(w.shape, lambda i: (0, 0), **w_kwargs)
               for w in packed_weights]
    out_spec = pl.BlockSpec((tb, out_pad), lambda i: (i, 0))
    return pl.pallas_call(
        mlp_kernel,
        out_shape=jax.ShapeDtypeStruct((b_pad, out_pad), jnp.float32),
        grid_spec=pltpu.PrefetchScalarGridSpec(
            num_scalar_prefetch=0,
            grid=(b_pad // tb,),
            in_specs=[x_spec] + w_specs,
            out_specs=out_spec,
        ),
        compiler_params=pltpu.CompilerParams(
            dimension_semantics=("parallel",),   # v7x: batch axis over both TCs
            vmem_limit_bytes=vmem_limit_bytes,
        ),
        cost_estimate=cost,
    )


def network_forward(x, packed_weights, dims, pads, batch_tile=None):
    """x: (B, window*n) f32 -> (B, 3) f32 log-probabilities."""
    B = x.shape[0]
    d_in, d0_pad, out_pad = dims[0], pads[0], pads[-1]

    kind = _device_kind()
    if batch_tile is None:
        # v5e MXU is 4x128^2 (M=128 already streams full width); v6e/v7x are
        # 2x256^2 so 256-row tiles keep the result stream full.
        batch_tile = 128 if "v5" in kind else 256
    tb = min(batch_tile, round_up(B, 16))
    if "v7" in kind and B > 16:
        # v7x: guarantee at least two grid steps so both TensorCores get work.
        tb = min(tb, round_up(-(-B // 2), 16))
    tb = max(16, round_up(tb, 16))          # bf16 tiles: multiples of 16, never 8
    b_pad = round_up(B, tb)

    # Padded bf16 input built directly (no f32 intermediate), with the constant
    # 1.0 "bias pickup" column in the padding region.
    xp = jnp.zeros((b_pad, d0_pad), jnp.bfloat16)
    xp = xp.at[:B, :d_in].set(x.astype(jnp.bfloat16))
    xp = xp.at[:, d_in].set(jnp.bfloat16(1.0))

    # Explicit VMEM budget: resident weights (x2 if double-buffered) + streamed
    # x/out tiles (double-buffered) + f32 accumulator / bf16 activation scratch.
    weight_bytes = sum(int(w.size) * 2 for w in packed_weights)
    max_pad = max(pads)
    need = (2 * weight_bytes
            + 2 * tb * d0_pad * 2
            + 2 * tb * out_pad * 4
            + 2 * tb * max_pad * 4)
    vmem_limit = int(min(max(2 * need + (8 << 20), 32 << 20),
                         int(0.9 * _physical_vmem_bytes())))
    # TODO(synk): if weight_bytes nears the per-TC VMEM budget (v7x: 64 MiB),
    # stream the two big middle layers (48w->96w, 96w->48w) over a K-tiled
    # 'arbitrary' grid axis / pltpu.emit_pipeline instead of keeping every layer
    # resident (and optionally fp8-quantize them on v7x).

    flops = 2 * b_pad * sum(pads[l] * pads[l + 1] for l in range(len(pads) - 1))
    cost = pl.CostEstimate(
        flops=int(flops),
        transcendentals=int(b_pad * (out_pad + 1)),   # exp per logit col + log per row
        bytes_accessed=int(weight_bytes + int(xp.size) * 2 + b_pad * out_pad * 4),
    )

    try:
        call = _build_mlp_call(packed_weights, tb, b_pad, d0_pad, out_pad,
                               vmem_limit, cost, single_buffer_weights=True)
        out = call(xp, *packed_weights)
    except Exception:
        # Fallback if this JAX build rejects pipeline_mode=pl.Buffered(1) on the
        # auto-pipelined path; correctness is identical, VMEM use doubles.
        call = _build_mlp_call(packed_weights, tb, b_pad, d0_pad, out_pad,
                               vmem_limit, cost, single_buffer_weights=False)
        out = call(xp, *packed_weights)
    return out[:B, :3]


def reference_forward(x, packed_weights, dims, pads):
    """Same padded bf16/f32 math in plain XLA, for correctness checking."""
    B = x.shape[0]
    d_in, d0_pad = dims[0], pads[0]
    xp = jnp.zeros((B, d0_pad), jnp.bfloat16)
    xp = xp.at[:, :d_in].set(x.astype(jnp.bfloat16))
    xp = xp.at[:, d_in].set(jnp.bfloat16(1.0))
    h = xp
    logits = None
    for l, w in enumerate(packed_weights):
        acc = jnp.dot(h, w, preferred_element_type=jnp.float32)
        if l < len(packed_weights) - 1:
            h = jnp.maximum(acc, 0.0).astype(jnp.bfloat16)
        else:
            logits = acc
    return jax.nn.log_softmax(logits, axis=-1)[:, :3]


if __name__ == "__main__":
    window, n = 2, 2              # input width = window * n = 4
    batch = 32                    # multiple of 16: exercises a full bf16 tile

    key = jax.random.PRNGKey(0)
    kparams, kx = jax.random.split(key)
    packed, dims, pads = init_packed_weights(kparams, window, n)
    x = jax.random.normal(kx, (batch, dims[0]), jnp.float32)

    out = network_forward(x, packed, dims, pads)
    out = jax.block_until_ready(out)

    assert out.shape == (batch, 3)
    # log-softmax rows must exponentiate-sum to 1
    row_sums = jnp.sum(jnp.exp(out), axis=-1)
    assert jnp.allclose(row_sums, 1.0, atol=1e-4), row_sums
    # match the plain-XLA reference of the same padded bf16-weight network
    ref = reference_forward(x, packed, dims, pads)
    assert jnp.allclose(out, ref, atol=2e-2, rtol=2e-2), float(jnp.max(jnp.abs(out - ref)))

    print("KERNEL_OK")
</pallas_src>

<mosaic_0001>
module attributes {stable_mosaic.version = 11 : i64} {
  func.func @mlp_kernel(%arg0: i32, %arg1: memref<32x128xbf16, #tpu.memory_space<vmem>>, %arg2: memref<128x256xbf16, #tpu.memory_space<vmem>>, %arg3: memref<256x256xbf16, #tpu.memory_space<vmem>>, %arg4: memref<256x512xbf16, #tpu.memory_space<vmem>>, %arg5: memref<512x256xbf16, #tpu.memory_space<vmem>>, %arg6: memref<256x128xbf16, #tpu.memory_space<vmem>>, %arg7: memref<128x128xbf16, #tpu.memory_space<vmem>>, %arg8: memref<128x128xbf16, #tpu.memory_space<vmem>>, %arg9: memref<128x128xbf16, #tpu.memory_space<vmem>>, %arg10: memref<128x128xbf16, #tpu.memory_space<vmem>>, %arg11: memref<128x128xbf16, #tpu.memory_space<vmem>>, %arg12: memref<128x128xbf16, #tpu.memory_space<vmem>>, %arg13: memref<32x128xf32, #tpu.memory_space<vmem>>) attributes {dimension_semantics = [#tpu.dimension_semantics<parallel>], iteration_bounds = array<i64: 1>, scalar_prefetch = 0 : i64, scratch_operands = 0 : i64, tpu.core_type = #tpu.core_type<tc>, window_params = [{transform_indices = @transform_0, window_bounds = array<i64: 32, 128>}, {pipeline_mode = #tpu.pipeline_mode<synchronous>, transform_indices = @transform_1, window_bounds = array<i64: 128, 256>}, {pipeline_mode = #tpu.pipeline_mode<synchronous>, transform_indices = @transform_2, window_bounds = array<i64: 256, 256>}, {pipeline_mode = #tpu.pipeline_mode<synchronous>, transform_indices = @transform_3, window_bounds = array<i64: 256, 512>}, {pipeline_mode = #tpu.pipeline_mode<synchronous>, transform_indices = @transform_4, window_bounds = array<i64: 512, 256>}, {pipeline_mode = #tpu.pipeline_mode<synchronous>, transform_indices = @transform_5, window_bounds = array<i64: 256, 128>}, {pipeline_mode = #tpu.pipeline_mode<synchronous>, transform_indices = @transform_6, window_bounds = array<i64: 128, 128>}, {pipeline_mode = #tpu.pipeline_mode<synchronous>, transform_indices = @transform_7, window_bounds = array<i64: 128, 128>}, {pipeline_mode = #tpu.pipeline_mode<synchronous>, transform_indices = @transform_8, window_bounds = array<i64: 128, 128>}, {pipeline_mode = #tpu.pipeline_mode<synchronous>, transform_indices = @transform_9, window_bounds = array<i64: 128, 128>}, {pipeline_mode = #tpu.pipeline_mode<synchronous>, transform_indices = @transform_10, window_bounds = array<i64: 128, 128>}, {pipeline_mode = #tpu.pipeline_mode<synchronous>, transform_indices = @transform_11, window_bounds = array<i64: 128, 128>}, {transform_indices = @transform_12, window_bounds = array<i64: 32, 128>}]} {
    %c0 = arith.constant 0 : index
    %c0_0 = arith.constant 0 : index
    %0 = vector.load %arg1[%c0, %c0_0] : memref<32x128xbf16, #tpu.memory_space<vmem>>, vector<32x128xbf16>
    %c0_1 = arith.constant 0 : index
    %c0_2 = arith.constant 0 : index
    %1 = vector.load %arg2[%c0_1, %c0_2] : memref<128x256xbf16, #tpu.memory_space<vmem>>, vector<128x256xbf16>
    %cst = arith.constant dense<0.000000e+00> : vector<32x256xf32>
    %2 = tpu.matmul %0, %1, %cst {dimension_numbers = #tpu.dot_dimension_numbers<[1], [0], [0], [1], [0, 0, 1, 1], [], []>} : vector<32x128xbf16>, vector<128x256xbf16>, vector<32x256xf32> -> vector<32x256xf32>
    %cst_3 = arith.constant 0.000000e+00 : f32
    %3 = vector.broadcast %cst_3 : f32 to vector<32x256xf32>
    %4 = arith.maximumf %2, %3 : vector<32x256xf32>
    %5 = arith.truncf %4 : vector<32x256xf32> to vector<32x256xbf16>
    %c0_4 = arith.constant 0 : index
    %c0_5 = arith.constant 0 : index
    %6 = vector.load %arg3[%c0_4, %c0_5] : memref<256x256xbf16, #tpu.memory_space<vmem>>, vector<256x256xbf16>
    %cst_6 = arith.constant dense<0.000000e+00> : vector<32x256xf32>
    %7 = tpu.matmul %5, %6, %cst_6 {dimension_numbers = #tpu.dot_dimension_numbers<[1], [0], [0], [1], [0, 0, 1, 1], [], []>} : vector<32x256xbf16>, vector<256x256xbf16>, vector<32x256xf32> -> vector<32x256xf32>
    %cst_7 = arith.constant 0.000000e+00 : f32
    %8 = vector.broadcast %cst_7 : f32 to vector<32x256xf32>
    %9 = arith.maximumf %7, %8 : vector<32x256xf32>
    %10 = arith.truncf %9 : vector<32x256xf32> to vector<32x256xbf16>
    %c0_8 = arith.constant 0 : index
    %c0_9 = arith.constant 0 : index
    %11 = vector.load %arg4[%c0_8, %c0_9] : memref<256x512xbf16, #tpu.memory_space<vmem>>, vector<256x512xbf16>
    %cst_10 = arith.constant dense<0.000000e+00> : vector<32x512xf32>
    %12 = tpu.matmul %10, %11, %cst_10 {dimension_numbers = #tpu.dot_dimension_numbers<[1], [0], [0], [1], [0, 0, 1, 1], [], []>} : vector<32x256xbf16>, vector<256x512xbf16>, vector<32x512xf32> -> vector<32x512xf32>
    %cst_11 = arith.constant 0.000000e+00 : f32
    %13 = vector.broadcast %cst_11 : f32 to vector<32x512xf32>
    %14 = arith.maximumf %12, %13 : vector<32x512xf32>
    %15 = arith.truncf %14 : vector<32x512xf32> to vector<32x512xbf16>
    %c0_12 = arith.constant 0 : index
    %c0_13 = arith.constant 0 : index
    %16 = vector.load %arg5[%c0_12, %c0_13] : memref<512x256xbf16, #tpu.memory_space<vmem>>, vector<512x256xbf16>
    %cst_14 = arith.constant dense<0.000000e+00> : vector<32x256xf32>
    %17 = tpu.matmul %15, %16, %cst_14 {dimension_numbers = #tpu.dot_dimension_numbers<[1], [0], [0], [1], [0, 0, 1, 1], [], []>} : vector<32x512xbf16>, vector<512x256xbf16>, vector<32x256xf32> -> vector<32x256xf32>
    %cst_15 = arith.constant 0.000000e+00 : f32
    %18 = vector.broadcast %cst_15 : f32 to vector<32x256xf32>
    %19 = arith.maximumf %17, %18 : vector<32x256xf32>
    %20 = arith.truncf %19 : vector<32x256xf32> to vector<32x256xbf16>
    %c0_16 = arith.constant 0 : index
    %c0_17 = arith.constant 0 : index
    %21 = vector.load %arg6[%c0_16, %c0_17] : memref<256x128xbf16, #tpu.memory_space<vmem>>, vector<256x128xbf16>
    %cst_18 = arith.constant dense<0.000000e+00> : vector<32x128xf32>
    %22 = tpu.matmul %20, %21, %cst_18 {dimension_numbers = #tpu.dot_dimension_numbers<[1], [0], [0], [1], [0, 0, 1, 1], [], []>} : vector<32x256xbf16>, vector<256x128xbf16>, vector<32x128xf32> -> vector<32x128xf32>
    %cst_19 = arith.constant 0.000000e+00 : f32
    %23 = vector.broadcast %cst_19 : f32 to vector<32x128xf32>
    %24 = arith.maximumf %22, %23 : vector<32x128xf32>
    %25 = arith.truncf %24 : vector<32x128xf32> to vector<32x128xbf16>
    %c0_20 = arith.constant 0 : index
    %c0_21 = arith.constant 0 : index
    %26 = vector.load %arg7[%c0_20, %c0_21] : memref<128x128xbf16, #tpu.memory_space<vmem>>, vector<128x128xbf16>
    %cst_22 = arith.constant dense<0.000000e+00> : vector<32x128xf32>
    %27 = tpu.matmul %25, %26, %cst_22 {dimension_numbers = #tpu.dot_dimension_numbers<[1], [0], [0], [1], [0, 0, 1, 1], [], []>} : vector<32x128xbf16>, vector<128x128xbf16>, vector<32x128xf32> -> vector<32x128xf32>
    %cst_23 = arith.constant 0.000000e+00 : f32
    %28 = vector.broadcast %cst_23 : f32 to vector<32x128xf32>
    %29 = arith.maximumf %27, %28 : vector<32x128xf32>
    %30 = arith.truncf %29 : vector<32x128xf32> to vector<32x128xbf16>
    %c0_24 = arith.constant 0 : index
    %c0_25 = arith.constant 0 : index
    %31 = vector.load %arg8[%c0_24, %c0_25] : memref<128x128xbf16, #tpu.memory_space<vmem>>, vector<128x128xbf16>
    %cst_26 = arith.constant dense<0.000000e+00> : vector<32x128xf32>
    %32 = tpu.matmul %30, %31, %cst_26 {dimension_numbers = #tpu.dot_dimension_numbers<[1], [0], [0], [1], [0, 0, 1, 1], [], []>} : vector<32x128xbf16>, vector<128x128xbf16>, vector<32x128xf32> -> vector<32x128xf32>
    %cst_27 = arith.constant 0.000000e+00 : f32
    %33 = vector.broadcast %cst_27 : f32 to vector<32x128xf32>
    %34 = arith.maximumf %32, %33 : vector<32x128xf32>
    %35 = arith.truncf %34 : vector<32x128xf32> to vector<32x128xbf16>
    %c0_28 = arith.constant 0 : index
    %c0_29 = arith.constant 0 : index
    %36 = vector.load %arg9[%c0_28, %c0_29] : memref<128x128xbf16, #tpu.memory_space<vmem>>, vector<128x128xbf16>
    %cst_30 = arith.constant dense<0.000000e+00> : vector<32x128xf32>
    %37 = tpu.matmul %35, %36, %cst_30 {dimension_numbers = #tpu.dot_dimension_numbers<[1], [0], [0], [1], [0, 0, 1, 1], [], []>} : vector<32x128xbf16>, vector<128x128xbf16>, vector<32x128xf32> -> vector<32x128xf32>
    %cst_31 = arith.constant 0.000000e+00 : f32
    %38 = vector.broadcast %cst_31 : f32 to vector<32x128xf32>
    %39 = arith.maximumf %37, %38 : vector<32x128xf32>
    %40 = arith.truncf %39 : vector<32x128xf32> to vector<32x128xbf16>
    %c0_32 = arith.constant 0 : index
    %c0_33 = arith.constant 0 : index
    %41 = vector.load %arg10[%c0_32, %c0_33] : memref<128x128xbf16, #tpu.memory_space<vmem>>, vector<128x128xbf16>
    %cst_34 = arith.constant dense<0.000000e+00> : vector<32x128xf32>
    %42 = tpu.matmul %40, %41, %cst_34 {dimension_numbers = #tpu.dot_dimension_numbers<[1], [0], [0], [1], [0, 0, 1, 1], [], []>} : vector<32x128xbf16>, vector<128x128xbf16>, vector<32x128xf32> -> vector<32x128xf32>
    %cst_35 = arith.constant 0.000000e+00 : f32
    %43 = vector.broadcast %cst_35 : f32 to vector<32x128xf32>
    %44 = arith.maximumf %42, %43 : vector<32x128xf32>
    %45 = arith.truncf %44 : vector<32x128xf32> to vector<32x128xbf16>
    %c0_36 = arith.constant 0 : index
    %c0_37 = arith.constant 0 : index
    %46 = vector.load %arg11[%c0_36, %c0_37] : memref<128x128xbf16, #tpu.memory_space<vmem>>, vector<128x128xbf16>
    %cst_38 = arith.constant dense<0.000000e+00> : vector<32x128xf32>
    %47 = tpu.matmul %45, %46, %cst_38 {dimension_numbers = #tpu.dot_dimension_numbers<[1], [0], [0], [1], [0, 0, 1, 1], [], []>} : vector<32x128xbf16>, vector<128x128xbf16>, vector<32x128xf32> -> vector<32x128xf32>
    %cst_39 = arith.constant 0.000000e+00 : f32
    %48 = vector.broadcast %cst_39 : f32 to vector<32x128xf32>
    %49 = arith.maximumf %47, %48 : vector<32x128xf32>
    %50 = arith.truncf %49 : vector<32x128xf32> to vector<32x128xbf16>
    %c0_40 = arith.constant 0 : index
    %c0_41 = arith.constant 0 : index
    %51 = vector.load %arg12[%c0_40, %c0_41] : memref<128x128xbf16, #tpu.memory_space<vmem>>, vector<128x128xbf16>
    %cst_42 = arith.constant dense<0.000000e+00> : vector<32x128xf32>
    %52 = tpu.matmul %50, %51, %cst_42 {dimension_numbers = #tpu.dot_dimension_numbers<[1], [0], [0], [1], [0, 0, 1, 1], [], []>} : vector<32x128xbf16>, vector<128x128xbf16>, vector<32x128xf32> -> vector<32x128xf32>
    %cst_43 = arith.constant dense<0xFF800000> : vector<32xf32>
    %53 = vector.multi_reduction <maximumf>, %52, %cst_43 [1] : vector<32x128xf32> to vector<32xf32>
    %54 = vector.shape_cast %53 : vector<32xf32> to vector<32x1xf32>
    %55 = vector.broadcast %54 : vector<32x1xf32> to vector<32x128xf32>
    %56 = arith.subf %52, %55 : vector<32x128xf32>
    %57 = math.exp %56 : vector<32x128xf32>
    %cst_44 = arith.constant dense<0.000000e+00> : vector<32xf32>
    %58 = vector.multi_reduction <add>, %57, %cst_44 [1] : vector<32x128xf32> to vector<32xf32>
    %59 = vector.shape_cast %58 : vector<32xf32> to vector<32x1xf32>
    %60 = math.log %59 : vector<32x1xf32>
    %61 = vector.broadcast %60 : vector<32x1xf32> to vector<32x128xf32>
    %62 = arith.subf %56, %61 : vector<32x128xf32>
    %c0_45 = arith.constant 0 : index
    %c0_46 = arith.constant 0 : index
    %63 = vector.load %arg13[%c0_45, %c0_46] : memref<32x128xf32, #tpu.memory_space<vmem>>, vector<32x128xf32>
    tpu.vector_store %arg13[%c0_45, %c0_46], %62 {strides = array<i32>} : memref<32x128xf32, #tpu.memory_space<vmem>>, vector<32x128xf32>,
    return
  }
  func.func @transform_0(%arg0: i32) -> (i32, i32) {
    %c0_i32 = arith.constant 0 : i32
    %c0_i32_0 = arith.constant 0 : i32
    return %arg0, %c0_i32 : i32, i32
  }
  func.func @transform_1(%arg0: i32) -> (i32, i32) {
    %c0_i32 = arith.constant 0 : i32
    %c0_i32_0 = arith.constant 0 : i32
    %c0_i32_1 = arith.constant 0 : i32
    return %c0_i32, %c0_i32_0 : i32, i32
  }
  func.func @transform_2(%arg0: i32) -> (i32, i32) {
    %c0_i32 = arith.constant 0 : i32
    %c0_i32_0 = arith.constant 0 : i32
    %c0_i32_1 = arith.constant 0 : i32
    return %c0_i32, %c0_i32_0 : i32, i32
  }
  func.func @transform_3(%arg0: i32) -> (i32, i32) {
    %c0_i32 = arith.constant 0 : i32
    %c0_i32_0 = arith.constant 0 : i32
    %c0_i32_1 = arith.constant 0 : i32
    return %c0_i32, %c0_i32_0 : i32, i32
  }
  func.func @transform_4(%arg0: i32) -> (i32, i32) {
    %c0_i32 = arith.constant 0 : i32
    %c0_i32_0 = arith.constant 0 : i32
    %c0_i32_1 = arith.constant 0 : i32
    return %c0_i32, %c0_i32_0 : i32, i32
  }
  func.func @transform_5(%arg0: i32) -> (i32, i32) {
    %c0_i32 = arith.constant 0 : i32
    %c0_i32_0 = arith.constant 0 : i32
    %c0_i32_1 = arith.constant 0 : i32
    return %c0_i32, %c0_i32_0 : i32, i32
  }
  func.func @transform_6(%arg0: i32) -> (i32, i32) {
    %c0_i32 = arith.constant 0 : i32
    %c0_i32_0 = arith.constant 0 : i32
    %c0_i32_1 = arith.constant 0 : i32
    return %c0_i32, %c0_i32_0 : i32, i32
  }
  func.func @transform_7(%arg0: i32) -> (i32, i32) {
    %c0_i32 = arith.constant 0 : i32
    %c0_i32_0 = arith.constant 0 : i32
    %c0_i32_1 = arith.constant 0 : i32
    return %c0_i32, %c0_i32_0 : i32, i32
  }
  func.func @transform_8(%arg0: i32) -> (i32, i32) {
    %c0_i32 = arith.constant 0 : i32
    %c0_i32_0 = arith.constant 0 : i32
    %c0_i32_1 = arith.constant 0 : i32
    return %c0_i32, %c0_i32_0 : i32, i32
  }
  func.func @transform_9(%arg0: i32) -> (i32, i32) {
    %c0_i32 = arith.constant 0 : i32
    %c0_i32_0 = arith.constant 0 : i32
    %c0_i32_1 = arith.constant 0 : i32
    return %c0_i32, %c0_i32_0 : i32, i32
  }
  func.func @transform_10(%arg0: i32) -> (i32, i32) {
    %c0_i32 = arith.constant 0 : i32
    %c0_i32_0 = arith.constant 0 : i32
    %c0_i32_1 = arith.constant 0 : i32
    return %c0_i32, %c0_i32_0 : i32, i32
  }
  func.func @transform_11(%arg0: i32) -> (i32, i32) {
    %c0_i32 = arith.constant 0 : i32
    %c0_i32_0 = arith.constant 0 : i32
    %c0_i32_1 = arith.constant 0 : i32
    return %c0_i32, %c0_i32_0 : i32, i32
  }
  func.func @transform_12(%arg0: i32) -> (i32, i32) {
    %c0_i32 = arith.constant 0 : i32
    %c0_i32_0 = arith.constant 0 : i32
    return %arg0, %c0_i32 : i32, i32
  }
}

module attributes {stable_mosaic.version = 11 : i64} {
  func.func @mlp_kernel(%arg0: i32, %arg1: memref<32x128xbf16, #tpu.memory_space<vmem>>, %arg2: memref<128x256xbf16, #tpu.memory_space<vmem>>, %arg3: memref<256x256xbf16, #tpu.memory_space<vmem>>, %arg4: memref<256x512xbf16, #tpu.memory_space<vmem>>, %arg5: memref<512x256xbf16, #tpu.memory_space<vmem>>, %arg6: memref<256x128xbf16, #tpu.memory_space<vmem>>, %arg7: memref<128x128xbf16, #tpu.memory_space<vmem>>, %arg8: memref<128x128xbf16, #tpu.memory_space<vmem>>, %arg9: memref<128x128xbf16, #tpu.memory_space<vmem>>, %arg10: memref<128x128xbf16, #tpu.memory_space<vmem>>, %arg11: memref<128x128xbf16, #tpu.memory_space<vmem>>, %arg12: memref<128x128xbf16, #tpu.memory_space<vmem>>, %arg13: memref<32x128xf32, #tpu.memory_space<vmem>>) attributes {dimension_semantics = [#tpu.dimension_semantics<parallel>], iteration_bounds = array<i64: 1>, scalar_prefetch = 0 : i64, scratch_operands = 0 : i64, tpu.core_type = #tpu.core_type<tc>, window_params = [{transform_indices = @transform_0, window_bounds = array<i64: 32, 128>}, {pipeline_mode = #tpu.pipeline_mode<synchronous>, transform_indices = @transform_1, window_bounds = array<i64: 128, 256>}, {pipeline_mode = #tpu.pipeline_mode<synchronous>, transform_indices = @transform_2, window_bounds = array<i64: 256, 256>}, {pipeline_mode = #tpu.pipeline_mode<synchronous>, transform_indices = @transform_3, window_bounds = array<i64: 256, 512>}, {pipeline_mode = #tpu.pipeline_mode<synchronous>, transform_indices = @transform_4, window_bounds = array<i64: 512, 256>}, {pipeline_mode = #tpu.pipeline_mode<synchronous>, transform_indices = @transform_5, window_bounds = array<i64: 256, 128>}, {pipeline_mode = #tpu.pipeline_mode<synchronous>, transform_indices = @transform_6, window_bounds = array<i64: 128, 128>}, {pipeline_mode = #tpu.pipeline_mode<synchronous>, transform_indices = @transform_7, window_bounds = array<i64: 128, 128>}, {pipeline_mode = #tpu.pipeline_mode<synchronous>, transform_indices = @transform_8, window_bounds = array<i64: 128, 128>}, {pipeline_mode = #tpu.pipeline_mode<synchronous>, transform_indices = @transform_9, window_bounds = array<i64: 128, 128>}, {pipeline_mode = #tpu.pipeline_mode<synchronous>, transform_indices = @transform_10, window_bounds = array<i64: 128, 128>}, {pipeline_mode = #tpu.pipeline_mode<synchronous>, transform_indices = @transform_11, window_bounds = array<i64: 128, 128>}, {transform_indices = @transform_12, window_bounds = array<i64: 32, 128>}]} {
    %c0 = arith.constant 0 : index
    %c0_0 = arith.constant 0 : index
    %0 = vector.load %arg1[%c0, %c0_0] : memref<32x128xbf16, #tpu.memory_space<vmem>>, vector<32x128xbf16>
    %c0_1 = arith.constant 0 : index
    %c0_2 = arith.constant 0 : index
    %1 = vector.load %arg2[%c0_1, %c0_2] : memref<128x256xbf16, #tpu.memory_space<vmem>>, vector<128x256xbf16>
    %cst = arith.constant dense<0.000000e+00> : vector<32x256xf32>
    %2 = tpu.matmul %0, %1, %cst {dimension_numbers = #tpu.dot_dimension_numbers<[1], [0], [0], [1], [0, 0, 1, 1], [], []>} : vector<32x128xbf16>, vector<128x256xbf16>, vector<32x256xf32> -> vector<32x256xf32>
    %cst_3 = arith.constant 0.000000e+00 : f32
    %3 = vector.broadcast %cst_3 : f32 to vector<32x256xf32>
    %4 = arith.maximumf %2, %3 : vector<32x256xf32>
    %5 = arith.truncf %4 : vector<32x256xf32> to vector<32x256xbf16>
    %c0_4 = arith.constant 0 : index
    %c0_5 = arith.constant 0 : index
    %6 = vector.load %arg3[%c0_4, %c0_5] : memref<256x256xbf16, #tpu.memory_space<vmem>>, vector<256x256xbf16>
    %cst_6 = arith.constant dense<0.000000e+00> : vector<32x256xf32>
    %7 = tpu.matmul %5, %6, %cst_6 {dimension_numbers = #tpu.dot_dimension_numbers<[1], [0], [0], [1], [0, 0, 1, 1], [], []>} : vector<32x256xbf16>, vector<256x256xbf16>, vector<32x256xf32> -> vector<32x256xf32>
    %cst_7 = arith.constant 0.000000e+00 : f32
    %8 = vector.broadcast %cst_7 : f32 to vector<32x256xf32>
    %9 = arith.maximumf %7, %8 : vector<32x256xf32>
    %10 = arith.truncf %9 : vector<32x256xf32> to vector<32x256xbf16>
    %c0_8 = arith.constant 0 : index
    %c0_9 = arith.constant 0 : index
    %11 = vector.load %arg4[%c0_8, %c0_9] : memref<256x512xbf16, #tpu.memory_space<vmem>>, vector<256x512xbf16>
    %cst_10 = arith.constant dense<0.000000e+00> : vector<32x512xf32>
    %12 = tpu.matmul %10, %11, %cst_10 {dimension_numbers = #tpu.dot_dimension_numbers<[1], [0], [0], [1], [0, 0, 1, 1], [], []>} : vector<32x256xbf16>, vector<256x512xbf16>, vector<32x512xf32> -> vector<32x512xf32>
    %cst_11 = arith.constant 0.000000e+00 : f32
    %13 = vector.broadcast %cst_11 : f32 to vector<32x512xf32>
    %14 = arith.maximumf %12, %13 : vector<32x512xf32>
    %15 = arith.truncf %14 : vector<32x512xf32> to vector<32x512xbf16>
    %c0_12 = arith.constant 0 : index
    %c0_13 = arith.constant 0 : index
    %16 = vector.load %arg5[%c0_12, %c0_13] : memref<512x256xbf16, #tpu.memory_space<vmem>>, vector<512x256xbf16>
    %cst_14 = arith.constant dense<0.000000e+00> : vector<32x256xf32>
    %17 = tpu.matmul %15, %16, %cst_14 {dimension_numbers = #tpu.dot_dimension_numbers<[1], [0], [0], [1], [0, 0, 1, 1], [], []>} : vector<32x512xbf16>, vector<512x256xbf16>, vector<32x256xf32> -> vector<32x256xf32>
    %cst_15 = arith.constant 0.000000e+00 : f32
    %18 = vector.broadcast %cst_15 : f32 to vector<32x256xf32>
    %19 = arith.maximumf %17, %18 : vector<32x256xf32>
    %20 = arith.truncf %19 : vector<32x256xf32> to vector<32x256xbf16>
    %c0_16 = arith.constant 0 : index
    %c0_17 = arith.constant 0 : index
    %21 = vector.load %arg6[%c0_16, %c0_17] : memref<256x128xbf16, #tpu.memory_space<vmem>>, vector<256x128xbf16>
    %cst_18 = arith.constant dense<0.000000e+00> : vector<32x128xf32>
    %22 = tpu.matmul %20, %21, %cst_18 {dimension_numbers = #tpu.dot_dimension_numbers<[1], [0], [0], [1], [0, 0, 1, 1], [], []>} : vector<32x256xbf16>, vector<256x128xbf16>, vector<32x128xf32> -> vector<32x128xf32>
    %cst_19 = arith.constant 0.000000e+00 : f32
    %23 = vector.broadcast %cst_19 : f32 to vector<32x128xf32>
    %24 = arith.maximumf %22, %23 : vector<32x128xf32>
    %25 = arith.truncf %24 : vector<32x128xf32> to vector<32x128xbf16>
    %c0_20 = arith.constant 0 : index
    %c0_21 = arith.constant 0 : index
    %26 = vector.load %arg7[%c0_20, %c0_21] : memref<128x128xbf16, #tpu.memory_space<vmem>>, vector<128x128xbf16>
    %cst_22 = arith.constant dense<0.000000e+00> : vector<32x128xf32>
    %27 = tpu.matmul %25, %26, %cst_22 {dimension_numbers = #tpu.dot_dimension_numbers<[1], [0], [0], [1], [0, 0, 1, 1], [], []>} : vector<32x128xbf16>, vector<128x128xbf16>, vector<32x128xf32> -> vector<32x128xf32>
    %cst_23 = arith.constant 0.000000e+00 : f32
    %28 = vector.broadcast %cst_23 : f32 to vector<32x128xf32>
    %29 = arith.maximumf %27, %28 : vector<32x128xf32>
    %30 = arith.truncf %29 : vector<32x128xf32> to vector<32x128xbf16>
    %c0_24 = arith.constant 0 : index
    %c0_25 = arith.constant 0 : index
    %31 = vector.load %arg8[%c0_24, %c0_25] : memref<128x128xbf16, #tpu.memory_space<vmem>>, vector<128x128xbf16>
    %cst_26 = arith.constant dense<0.000000e+00> : vector<32x128xf32>
    %32 = tpu.matmul %30, %31, %cst_26 {dimension_numbers = #tpu.dot_dimension_numbers<[1], [0], [0], [1], [0, 0, 1, 1], [], []>} : vector<32x128xbf16>, vector<128x128xbf16>, vector<32x128xf32> -> vector<32x128xf32>
    %cst_27 = arith.constant 0.000000e+00 : f32
    %33 = vector.broadcast %cst_27 : f32 to vector<32x128xf32>
    %34 = arith.maximumf %32, %33 : vector<32x128xf32>
    %35 = arith.truncf %34 : vector<32x128xf32> to vector<32x128xbf16>
    %c0_28 = arith.constant 0 : index
    %c0_29 = arith.constant 0 : index
    %36 = vector.load %arg9[%c0_28, %c0_29] : memref<128x128xbf16, #tpu.memory_space<vmem>>, vector<128x128xbf16>
    %cst_30 = arith.constant dense<0.000000e+00> : vector<32x128xf32>
    %37 = tpu.matmul %35, %36, %cst_30 {dimension_numbers = #tpu.dot_dimension_numbers<[1], [0], [0], [1], [0, 0, 1, 1], [], []>} : vector<32x128xbf16>, vector<128x128xbf16>, vector<32x128xf32> -> vector<32x128xf32>
    %cst_31 = arith.constant 0.000000e+00 : f32
    %38 = vector.broadcast %cst_31 : f32 to vector<32x128xf32>
    %39 = arith.maximumf %37, %38 : vector<32x128xf32>
    %40 = arith.truncf %39 : vector<32x128xf32> to vector<32x128xbf16>
    %c0_32 = arith.constant 0 : index
    %c0_33 = arith.constant 0 : index
    %41 = vector.load %arg10[%c0_32, %c0_33] : memref<128x128xbf16, #tpu.memory_space<vmem>>, vector<128x128xbf16>
    %cst_34 = arith.constant dense<0.000000e+00> : vector<32x128xf32>
    %42 = tpu.matmul %40, %41, %cst_34 {dimension_numbers = #tpu.dot_dimension_numbers<[1], [0], [0], [1], [0, 0, 1, 1], [], []>} : vector<32x128xbf16>, vector<128x128xbf16>, vector<32x128xf32> -> vector<32x128xf32>
    %cst_35 = arith.constant 0.000000e+00 : f32
    %43 = vector.broadcast %cst_35 : f32 to vector<32x128xf32>
    %44 = arith.maximumf %42, %43 : vector<32x128xf32>
    %45 = arith.truncf %44 : vector<32x128xf32> to vector<32x128xbf16>
    %c0_36 = arith.constant 0 : index
    %c0_37 = arith.constant 0 : index
    %46 = vector.load %arg11[%c0_36, %c0_37] : memref<128x128xbf16, #tpu.memory_space<vmem>>, vector<128x128xbf16>
    %cst_38 = arith.constant dense<0.000000e+00> : vector<32x128xf32>
    %47 = tpu.matmul %45, %46, %cst_38 {dimension_numbers = #tpu.dot_dimension_numbers<[1], [0], [0], [1], [0, 0, 1, 1], [], []>} : vector<32x128xbf16>, vector<128x128xbf16>, vector<32x128xf32> -> vector<32x128xf32>
    %cst_39 = arith.constant 0.000000e+00 : f32
    %48 = vector.broadcast %cst_39 : f32 to vector<32x128xf32>
    %49 = arith.maximumf %47, %48 : vector<32x128xf32>
    %50 = arith.truncf %49 : vector<32x128xf32> to vector<32x128xbf16>
    %c0_40 = arith.constant 0 : index
    %c0_41 = arith.constant 0 : index
    %51 = vector.load %arg12[%c0_40, %c0_41] : memref<128x128xbf16, #tpu.memory_space<vmem>>, vector<128x128xbf16>
    %cst_42 = arith.constant dense<0.000000e+00> : vector<32x128xf32>
    %52 = tpu.matmul %50, %51, %cst_42 {dimension_numbers = #tpu.dot_dimension_numbers<[1], [0], [0], [1], [0, 0, 1, 1], [], []>} : vector<32x128xbf16>, vector<128x128xbf16>, vector<32x128xf32> -> vector<32x128xf32>
    %cst_43 = arith.constant dense<0xFF800000> : vector<32xf32>
    %53 = vector.multi_reduction <maximumf>, %52, %cst_43 [1] : vector<32x128xf32> to vector<32xf32>
    %54 = vector.shape_cast %53 : vector<32xf32> to vector<32x1xf32>
    %55 = vector.broadcast %54 : vector<32x1xf32> to vector<32x128xf32>
    %56 = arith.subf %52, %55 : vector<32x128xf32>
    %57 = math.exp %56 : vector<32x128xf32>
    %cst_44 = arith.constant dense<0.000000e+00> : vector<32xf32>
    %58 = vector.multi_reduction <add>, %57, %cst_44 [1] : vector<32x128xf32> to vector<32xf32>
    %59 = vector.shape_cast %58 : vector<32xf32> to vector<32x1xf32>
    %60 = math.log %59 : vector<32x1xf32>
    %61 = vector.broadcast %60 : vector<32x1xf32> to vector<32x128xf32>
    %62 = arith.subf %56, %61 : vector<32x128xf32>
    %c0_45 = arith.constant 0 : index
    %c0_46 = arith.constant 0 : index
    %63 = vector.load %arg13[%c0_45, %c0_46] : memref<32x128xf32, #tpu.memory_space<vmem>>, vector<32x128xf32>
    tpu.vector_store %arg13[%c0_45, %c0_46], %62 {strides = array<i32>} : memref<32x128xf32, #tpu.memory_space<vmem>>, vector<32x128xf32>,
    return
  }
  func.func @transform_0(%arg0: i32) -> (i32, i32) {
    %c0_i32 = arith.constant 0 : i32
    %c0_i32_0 = arith.constant 0 : i32
    return %arg0, %c0_i32 : i32, i32
  }
  func.func @transform_1(%arg0: i32) -> (i32, i32) {
    %c0_i32 = arith.constant 0 : i32
    %c0_i32_0 = arith.constant 0 : i32
    %c0_i32_1 = arith.constant 0 : i32
    return %c0_i32, %c0_i32_0 : i32, i32
  }
  func.func @transform_2(%arg0: i32) -> (i32, i32) {
    %c0_i32 = arith.constant 0 : i32
    %c0_i32_0 = arith.constant 0 : i32
    %c0_i32_1 = arith.constant 0 : i32
    return %c0_i32, %c0_i32_0 : i32, i32
  }
  func.func @transform_3(%arg0: i32) -> (i32, i32) {
    %c0_i32 = arith.constant 0 : i32
    %c0_i32_0 = arith.constant 0 : i32
    %c0_i32_1 = arith.constant 0 : i32
    return %c0_i32, %c0_i32_0 : i32, i32
  }
  func.func @transform_4(%arg0: i32) -> (i32, i32) {
    %c0_i32 = arith.constant 0 : i32
    %c0_i32_0 = arith.constant 0 : i32
    %c0_i32_1 = arith.constant 0 : i32
    return %c0_i32, %c0_i32_0 : i32, i32
  }
  func.func @transform_5(%arg0: i32) -> (i32, i32) {
    %c0_i32 = arith.constant 0 : i32
    %c0_i32_0 = arith.constant 0 : i32
    %c0_i32_1 = arith.constant 0 : i32
    return %c0_i32, %c0_i32_0 : i32, i32
  }
  func.func @transform_6(%arg0: i32) -> (i32, i32) {
    %c0_i32 = arith.constant 0 : i32
    %c0_i32_0 = arith.constant 0 : i32
    %c0_i32_1 = arith.constant 0 : i32
    return %c0_i32, %c0_i32_0 : i32, i32
  }
  func.func @transform_7(%arg0: i32) -> (i32, i32) {
    %c0_i32 = arith.constant 0 : i32
    %c0_i32_0 = arith.constant 0 : i32
    %c0_i32_1 = arith.constant 0 : i32
    return %c0_i32, %c0_i32_0 : i32, i32
  }
  func.func @transform_8(%arg0: i32) -> (i32, i32) {
    %c0_i32 = arith.constant 0 : i32
    %c0_i32_0 = arith.constant 0 : i32
    %c0_i32_1 = arith.constant 0 : i32
    return %c0_i32, %c0_i32_0 : i32, i32
  }
  func.func @transform_9(%arg0: i32) -> (i32, i32) {
    %c0_i32 = arith.constant 0 : i32
    %c0_i32_0 = arith.constant 0 : i32
    %c0_i32_1 = arith.constant 0 : i32
    return %c0_i32, %c0_i32_0 : i32, i32
  }
  func.func @transform_10(%arg0: i32) -> (i32, i32) {
    %c0_i32 = arith.constant 0 : i32
    %c0_i32_0 = arith.constant 0 : i32
    %c0_i32_1 = arith.constant 0 : i32
    return %c0_i32, %c0_i32_0 : i32, i32
  }
  func.func @transform_11(%arg0: i32) -> (i32, i32) {
    %c0_i32 = arith.constant 0 : i32
    %c0_i32_0 = arith.constant 0 : i32
    %c0_i32_1 = arith.constant 0 : i32
    return %c0_i32, %c0_i32_0 : i32, i32
  }
  func.func @transform_12(%arg0: i32) -> (i32, i32) {
    %c0_i32 = arith.constant 0 : i32
    %c0_i32_0 = arith.constant 0 : i32
    return %arg0, %c0_i32 : i32, i32
  }
}

</mosaic_0001>

<bundles_post_ra>
// kernel: tpu_custom_call.1
= control target key start
LH: loop header
LB: loop body
LE: loop exit
PB: predicated region body
PF: predicated region fallthrough
CT: control target
= control target key end

     0   :  { %17 = vsyncpa [#allocation3], 0  ;;  %s4058_s0 = inlined_call_operand.hbm [shape: bf16[32,128], index: 0, kind: input, shape index: {}]   ;;  %s4059_s1 = inlined_call_operand.hbm [shape: bf16[128,256], index: 1, kind: input, shape index: {}]   ;;  %s4060_s2 = inlined_call_operand.hbm [shape: bf16[256,256], index: 2, kind: input, shape index: {}]   ;;  %s4061_s3 = inlined_call_operand.hbm [shape: bf16[256,512], index: 3, kind: input, shape index: {}]   ;;  %s4062_s4 = inlined_call_operand.hbm [shape: bf16[512,256], index: 4, kind: input, shape index: {}]   ;;  %s4063_s5 = inlined_call_operand.hbm [shape: bf16[256,128], index: 5, kind: input, shape index: {}]   ;;  %s4064_s6 = inlined_call_operand.hbm [shape: bf16[128,128], index: 6, kind: input, shape index: {}]   ;;  %s4065_s7 = inlined_call_operand.hbm [shape: bf16[128,128], index: 7, kind: input, shape index: {}]   ;;  %s4066_s8 = inlined_call_operand.hbm [shape: bf16[128,128], index: 8, kind: input, shape index: {}]   ;;  %s4067_s9 = inlined_call_operand.hbm [shape: bf16[128,128], index: 9, kind: input, shape index: {}]   ;;  %s4068_s10 = inlined_call_operand.hbm [shape: bf16[128,128], index: 10, kind: input, shape index: {}]   ;;  %s4069_s11 = inlined_call_operand.hbm [shape: bf16[128,128], index: 11, kind: input, shape index: {}]   ;;  %s4070_s12 = inlined_call_operand.hbm [shape: f32[32,128], index: 12, kind: output, shape index: {}]  }
   0x1   :  { %18 = vsyncpa [#allocation6], 0 }
   0x2   :  { %19 = vsyncpa [#allocation9], 0 }
   0x3   :  { %20 = vsyncpa [#allocation12], 0 }
   0x4   :  { %21 = vsyncpa [#allocation15], 0 }
   0x5   :  { %22 = vsyncpa [#allocation18], 0 }
   0x6   :  { %23 = vsyncpa [#allocation21], 0 }
   0x7   :  { %24 = vsyncpa [#allocation4], 0  ;;  %s3740_s21 = smov [#allocation5]   ;;  %s3438_s25 = scalar_lea.hbm %s4059_s1, 2048 }
   0x8   :  { %s42_s22 = sshll.u32 %s3740_s21, 4  ;;  %p3439_p0 = scmp.ne.s32.totalorder %s4059_s1, %s3438_s25  ;;  %s43_s22 = int_to_ptr.vmem [resolvable:$true] %s42_s22 }
   0x9   :  { %p3442_p1 = scmp.lt.u32.totalorder %s3438_s25, %s4059_s1 }
   0xb   :  { %p3444_p2 = pnand %p3442_p1, %p3439_p0 }
   0xd   :  { %3447 = shalt.err (!%p3444_p2)
}
   0xe   :  { %s3448_s30 = scalar_lea.vmem %s43_s22, 2048  ;;  %p3453_p4 = scmp.lt.s32.totalorder %s43_s22, %s43_s22 }
   0xf   :  { %p3449_p3 = scmp.ne.s32.totalorder %s43_s22, %s3448_s30  ;;  %p3454_p5 = scmp.lt.s32.totalorder %s3448_s30, %s3448_s30 }
  0x11   :  { %p3455_p6 = por %p3454_p5, %p3453_p4 }
  0x13   :  { %p3456_p7 = pnand %p3455_p6, %p3449_p3 }
  0x15   :  { %3459 = shalt.err (!%p3456_p7)
}
  0x16   :  { %s3741_s13 = smov 128   ;;  %s3742_s14 = smov 8  }
  0x17   :  { %48 = dma.hbm_to_vmem [thread:$0]  %s4059_s1, 2048, %s43_s22, [#allocation6], %s3741_s13, %s3741_s13, %s3742_s14  }
  0x18   :  { %s3743_s17 = smov [#allocation8]   ;;  %s3460_s21 = scalar_lea.hbm %s4061_s3, 8192 }
  0x19   :  { %s66_s18 = sshll.u32 %s3743_s17, 4  ;;  %p3461_p8 = scmp.ne.s32.totalorder %s4061_s3, %s3460_s21  ;;  %s67_s18 = int_to_ptr.vmem [resolvable:$true] %s66_s18 }
  0x1a   :  { %p3464_p9 = scmp.lt.u32.totalorder %s3460_s21, %s4061_s3 }
  0x1c   :  { %p3466_p10 = pnand %p3464_p9, %p3461_p8 }
  0x1e   :  { %3469 = shalt.err (!%p3466_p10)
}
  0x1f   :  { %s3470_s27 = scalar_lea.vmem %s67_s18, 8192  ;;  %p3475_p12 = scmp.lt.s32.totalorder %s67_s18, %s67_s18 }
  0x20   :  { %p3471_p11 = scmp.ne.s32.totalorder %s67_s18, %s3470_s27  ;;  %p3476_p13 = scmp.lt.s32.totalorder %s3470_s27, %s3470_s27 }
  0x22   :  { %p3477_p0 = por %p3476_p13, %p3475_p12 }
  0x24   :  { %p3478_p1 = pnand %p3477_p0, %p3471_p11 }
  0x26   :  { %3481 = shalt.err (!%p3478_p1)
}
  0x27   :  { %s3744_s1 = smov 256   ;;  %s3745_s22 = smov 16  }
  0x28   :  { %72 = dma.hbm_to_vmem [thread:$0]  %s4061_s3, 8192, %s67_s18, [#allocation9], %s3744_s1, %s3744_s1, %s3745_s22  }
  0x29   :  { %s3746_s30 = smov [#allocation11]   ;;  %s3747_s16 = smov [#allocation14]  }
  0x2a   :  { %s90_s15 = sshll.u32 %s3746_s30, 4  ;;  %s114_s17 = sshll.u32 %s3747_s16, 4  ;;  %s91_s15 = int_to_ptr.vmem [resolvable:$true] %s90_s15  ;;  %s3852_s17 = int_to_ptr.vmem [resolvable:$true] %s114_s17 }
  0x2b   :  { %s3482_s21 = scalar_lea.hbm %s4063_s5, 2048 }
  0x2c   :  { %p3483_p2 = scmp.ne.s32.totalorder %s4063_s5, %s3482_s21  ;;  %p3486_p3 = scmp.lt.u32.totalorder %s3482_s21, %s4063_s5 }
  0x2e   :  { %p3488_p4 = pnand %p3486_p3, %p3483_p2 }
  0x30   :  { %3491 = shalt.err (!%p3488_p4)
}
  0x31   :  { %s3492_s3 = scalar_lea.vmem %s91_s15, 2048  ;;  %p3497_p6 = scmp.lt.s32.totalorder %s91_s15, %s91_s15 }
  0x32   :  { %p3493_p5 = scmp.ne.s32.totalorder %s91_s15, %s3492_s3  ;;  %p3498_p7 = scmp.lt.s32.totalorder %s3492_s3, %s3492_s3 }
  0x34   :  { %p3499_p8 = por %p3498_p7, %p3497_p6 }
  0x36   :  { %p3500_p9 = pnand %p3499_p8, %p3493_p5 }
  0x38   :  { %3503 = shalt.err (!%p3500_p9)
}
  0x39   :  { %s3748_s18 = smov 64   ;;  %s3749_s27 = smov 4  }
  0x3a   :  { %96 = dma.hbm_to_vmem [thread:$0]  %s4063_s5, 2048, %s91_s15, [#allocation12], %s3748_s18, %s3748_s18, %s3749_s27  }
  0x3b   :  { %s3504_s30 = scalar_lea.hbm %s4065_s7, 1024 }
  0x3c   :  { %p3505_p10 = scmp.ne.s32.totalorder %s4065_s7, %s3504_s30  ;;  %p3508_p11 = scmp.lt.u32.totalorder %s3504_s30, %s4065_s7 }
  0x3e   :  { %p3510_p12 = pnand %p3508_p11, %p3505_p10 }
  0x40   :  { %3513 = shalt.err (!%p3510_p12)
}
  0x41   :  { %s3514_s23 = scalar_lea.vmem %s3852_s17, 1024  ;;  %p3519_p0 = scmp.lt.s32.totalorder %s3852_s17, %s3852_s17 }
  0x42   :  { %p3515_p13 = scmp.ne.s32.totalorder %s3852_s17, %s3514_s23  ;;  %p3520_p1 = scmp.lt.s32.totalorder %s3514_s23, %s3514_s23 }
  0x44   :  { %p3521_p2 = por %p3520_p1, %p3519_p0 }
  0x46   :  { %p3522_p3 = pnand %p3521_p2, %p3515_p13 }
  0x48   :  { %3525 = shalt.err (!%p3522_p3)
}
  0x49   :  { %120 = dma.hbm_to_vmem [thread:$0]  %s4065_s7, 1024, %s3852_s17, [#allocation15], %s3748_s18, %s3748_s18, %s3749_s27  }
  0x4a   :  { %s3750_s24 = smov [#allocation17]   ;;  %s3751_s26 = smov [#allocation2]  }
  0x4b   :  { %s138_s25 = sshll.u32 %s3750_s24, 4  ;;  %s30_s3 = sshll.u32 %s3751_s26, 4  ;;  %s139_s25 = int_to_ptr.vmem [resolvable:$true] %s138_s25  ;;  %s3889_s3 = int_to_ptr.vmem [resolvable:$true] %s30_s3 }
  0x4c   :  { %s3526_s28 = scalar_lea.hbm %s4067_s9, 1024 }
  0x4d   :  { %p3527_p4 = scmp.ne.s32.totalorder %s4067_s9, %s3526_s28  ;;  %p3530_p5 = scmp.lt.u32.totalorder %s3526_s28, %s4067_s9 }
  0x4f   :  { %p3532_p6 = pnand %p3530_p5, %p3527_p4 }
  0x51   :  { %3535 = shalt.err (!%p3532_p6)
}
  0x52   :  { %s3536_s7 = scalar_lea.vmem %s139_s25, 1024  ;;  %p3541_p8 = scmp.lt.s32.totalorder %s139_s25, %s139_s25 }
  0x53   :  { %p3537_p7 = scmp.ne.s32.totalorder %s139_s25, %s3536_s7  ;;  %p3542_p9 = scmp.lt.s32.totalorder %s3536_s7, %s3536_s7 }
  0x55   :  { %p3543_p10 = por %p3542_p9, %p3541_p8 }
  0x57   :  { %p3544_p11 = pnand %p3543_p10, %p3537_p7 }
  0x59   :  { %3547 = shalt.err (!%p3544_p11)
}
  0x5a   :  { %144 = dma.hbm_to_vmem [thread:$0]  %s4067_s9, 1024, %s139_s25, [#allocation18], %s3748_s18, %s3748_s18, %s3749_s27  }
  0x5b   :  { %s3548_s5 = scalar_lea.hbm %s4058_s0, 256 }
  0x5c   :  { %p3549_p12 = scmp.ne.s32.totalorder %s4058_s0, %s3548_s5  ;;  %p3552_p13 = scmp.lt.u32.totalorder %s3548_s5, %s4058_s0 }
  0x5e   :  { %p3554_p0 = pnand %p3552_p13, %p3549_p12 }
  0x60   :  { %3557 = shalt.err (!%p3554_p0)
}
  0x61   :  { %s3558_s22 = scalar_lea.vmem %s3889_s3, 256  ;;  %p3563_p2 = scmp.lt.s32.totalorder %s3889_s3, %s3889_s3 }
  0x62   :  { %p3559_p1 = scmp.ne.s32.totalorder %s3889_s3, %s3558_s22  ;;  %p3564_p3 = scmp.lt.s32.totalorder %s3558_s22, %s3558_s22 }
  0x64   :  { %p3565_p4 = por %p3564_p3, %p3563_p2 }
  0x66   :  { %p3566_p5 = pnand %p3565_p4, %p3559_p1 }
  0x68   :  { %3569 = shalt.err (!%p3566_p5)
}
  0x69   :  { %36 = dma.hbm_to_vmem [thread:$0]  %s4058_s0, 256, %s3889_s3, [#allocation3], %s3748_s18, %s3748_s18, %s3749_s27  }
  0x6a   :  { %s3752_s28 = smov [#allocation7]   ;;  %s3753_s30 = smov [#allocation10]  }
  0x6b   :  { %s54_s29 = sshll.u32 %s3752_s28, 4  ;;  %s78_s16 = sshll.u32 %s3753_s30, 4  ;;  %s55_s29 = int_to_ptr.vmem [resolvable:$true] %s54_s29  ;;  %s3926_s16 = int_to_ptr.vmem [resolvable:$true] %s78_s16 }
  0x6c   :  { %s3570_s17 = scalar_lea.hbm %s4060_s2, 4096 }
  0x6d   :  { %p3571_p6 = scmp.ne.s32.totalorder %s4060_s2, %s3570_s17  ;;  %p3574_p7 = scmp.lt.u32.totalorder %s3570_s17, %s4060_s2 }
  0x6f   :  { %p3576_p8 = pnand %p3574_p7, %p3571_p6 }
  0x71   :  { %3579 = shalt.err (!%p3576_p8)
}
  0x72   :  { %s3580_s0 = scalar_lea.vmem %s55_s29, 4096  ;;  %p3585_p10 = scmp.lt.s32.totalorder %s55_s29, %s55_s29 }
  0x73   :  { %p3581_p9 = scmp.ne.s32.totalorder %s55_s29, %s3580_s0  ;;  %p3586_p11 = scmp.lt.s32.totalorder %s3580_s0, %s3580_s0 }
  0x75   :  { %p3587_p12 = por %p3586_p11, %p3585_p10 }
  0x77   :  { %p3588_p13 = pnand %p3587_p12, %p3581_p9 }
  0x79   :  { %3591 = shalt.err (!%p3588_p13)
}
  0x7a   :  { %60 = dma.hbm_to_vmem [thread:$0]  %s4060_s2, 4096, %s55_s29, [#allocation6], %s3741_s13, %s3741_s13, %s3742_s14  }
  0x7b   :  { %s3592_s1 = scalar_lea.hbm %s4062_s4, 8192 }
  0x7c   :  { %p3593_p0 = scmp.ne.s32.totalorder %s4062_s4, %s3592_s1  ;;  %p3596_p1 = scmp.lt.u32.totalorder %s3592_s1, %s4062_s4 }
  0x7e   :  { %p3598_p2 = pnand %p3596_p1, %p3593_p0 }
  0x80   :  { %3601 = shalt.err (!%p3598_p2)
}
  0x81   :  { %s3602_s30 = scalar_lea.vmem %s3926_s16, 8192  ;;  %p3607_p4 = scmp.lt.s32.totalorder %s3926_s16, %s3926_s16 }
  0x82   :  { %p3603_p3 = scmp.ne.s32.totalorder %s3926_s16, %s3602_s30  ;;  %p3608_p5 = scmp.lt.s32.totalorder %s3602_s30, %s3602_s30 }
  0x84   :  { %p3609_p6 = por %p3608_p5, %p3607_p4 }
  0x86   :  { %p3610_p7 = pnand %p3609_p6, %p3603_p3 }
  0x88   :  { %3613 = shalt.err (!%p3610_p7)
}
  0x89   :  { %84 = dma.hbm_to_vmem [thread:$0]  %s4062_s4, 8192, %s3926_s16, [#allocation9], %s3741_s13, %s3741_s13, %s3742_s14  }
  0x8a   :  { %s3754_s19 = smov [#allocation13]   ;;  %s3755_s17 = smov [#allocation16]  }
  0x8b   :  { %s102_s7 = sshll.u32 %s3754_s19, 4  ;;  %s126_s20 = sshll.u32 %s3755_s17, 4  ;;  %s103_s7 = int_to_ptr.vmem [resolvable:$true] %s102_s7  ;;  %s3963_s20 = int_to_ptr.vmem [resolvable:$true] %s126_s20 }
  0x8c   :  { %s3614_s5 = scalar_lea.hbm %s4064_s6, 1024 }
  0x8d   :  { %p3615_p8 = scmp.ne.s32.totalorder %s4064_s6, %s3614_s5  ;;  %p3618_p9 = scmp.lt.u32.totalorder %s3614_s5, %s4064_s6 }
  0x8f   :  { %p3620_p10 = pnand %p3618_p9, %p3615_p8 }
  0x91   :  { %3623 = shalt.err (!%p3620_p10)
}
  0x92   :  { %s3624_s4 = scalar_lea.vmem %s103_s7, 1024  ;;  %p3629_p12 = scmp.lt.s32.totalorder %s103_s7, %s103_s7 }
  0x93   :  { %p3625_p11 = scmp.ne.s32.totalorder %s103_s7, %s3624_s4  ;;  %p3630_p13 = scmp.lt.s32.totalorder %s3624_s4, %s3624_s4 }
  0x95   :  { %p3631_p0 = por %p3630_p13, %p3629_p12 }
  0x97   :  { %p3632_p1 = pnand %p3631_p0, %p3625_p11 }
  0x99   :  { %3635 = shalt.err (!%p3632_p1)
}
  0x9a   :  { %108 = dma.hbm_to_vmem [thread:$0]  %s4064_s6, 1024, %s103_s7, [#allocation12], %s3748_s18, %s3748_s18, %s3749_s27  }
  0x9b   :  { %s3636_s9 = scalar_lea.hbm %s4066_s8, 1024 }
  0x9c   :  { %p3637_p2 = scmp.ne.s32.totalorder %s4066_s8, %s3636_s9  ;;  %p3640_p3 = scmp.lt.u32.totalorder %s3636_s9, %s4066_s8 }
  0x9e   :  { %p3642_p4 = pnand %p3640_p3, %p3637_p2 }
  0xa0   :  { %3645 = shalt.err (!%p3642_p4)
}
  0xa1   :  { %s3646_s29 = scalar_lea.vmem %s3963_s20, 1024  ;;  %p3651_p6 = scmp.lt.s32.totalorder %s3963_s20, %s3963_s20 }
  0xa2   :  { %p3647_p5 = scmp.ne.s32.totalorder %s3963_s20, %s3646_s29  ;;  %p3652_p7 = scmp.lt.s32.totalorder %s3646_s29, %s3646_s29 }
  0xa4   :  { %p3653_p8 = por %p3652_p7, %p3651_p6 }
  0xa6   :  { %p3654_p9 = pnand %p3653_p8, %p3647_p5 }
  0xa8   :  { %3657 = shalt.err (!%p3654_p9)
}
  0xa9   :  { %132 = dma.hbm_to_vmem [thread:$0]  %s4066_s8, 1024, %s3963_s20, [#allocation15], %s3748_s18, %s3748_s18, %s3749_s27  }
  0xaa   :  { %s3756_s7 = smov [#allocation19]   ;;  %s3757_s21 = smov [#allocation20]  }
  0xab   :  { %s150_s17 = sshll.u32 %s3756_s7, 4  ;;  %s162_s23 = sshll.u32 %s3757_s21, 4  ;;  %s151_s17 = int_to_ptr.vmem [resolvable:$true] %s150_s17  ;;  %s4000_s23 = int_to_ptr.vmem [resolvable:$true] %s162_s23 }
  0xac   :  { %s3658_s3 = scalar_lea.hbm %s4068_s10, 1024 }
  0xad   :  { %p3659_p10 = scmp.ne.s32.totalorder %s4068_s10, %s3658_s3  ;;  %p3662_p11 = scmp.lt.u32.totalorder %s3658_s3, %s4068_s10 }
  0xaf   :  { %p3664_p12 = pnand %p3662_p11, %p3659_p10 }
  0xb1   :  { %3667 = shalt.err (!%p3664_p12)
}
  0xb2   :  { %s3668_s8 = scalar_lea.vmem %s151_s17, 1024  ;;  %p3673_p0 = scmp.lt.s32.totalorder %s151_s17, %s151_s17 }
  0xb3   :  { %p3669_p13 = scmp.ne.s32.totalorder %s151_s17, %s3668_s8  ;;  %p3674_p1 = scmp.lt.s32.totalorder %s3668_s8, %s3668_s8 }
  0xb5   :  { %p3675_p2 = por %p3674_p1, %p3673_p0 }
  0xb7   :  { %p3676_p3 = pnand %p3675_p2, %p3669_p13 }
  0xb9   :  { %3679 = shalt.err (!%p3676_p3)
}
  0xba   :  { %156 = dma.hbm_to_vmem [thread:$0]  %s4068_s10, 1024, %s151_s17, [#allocation18], %s3748_s18, %s3748_s18, %s3749_s27  }
  0xbb   :  { %s3680_s9 = scalar_lea.hbm %s4069_s11, 1024 }
  0xbc   :  { %p3681_p4 = scmp.ne.s32.totalorder %s4069_s11, %s3680_s9  ;;  %p3684_p5 = scmp.lt.u32.totalorder %s3680_s9, %s4069_s11 }
  0xbe   :  { %p3686_p6 = pnand %p3684_p5, %p3681_p4 }
  0xc0   :  { %3689 = shalt.err (!%p3686_p6)
}
  0xc1   :  { %s3690_s29 = scalar_lea.vmem %s4000_s23, 1024  ;;  %p3695_p8 = scmp.lt.s32.totalorder %s4000_s23, %s4000_s23 }
  0xc2   :  { %p3691_p7 = scmp.ne.s32.totalorder %s4000_s23, %s3690_s29  ;;  %p3696_p9 = scmp.lt.s32.totalorder %s3690_s29, %s3690_s29 }
  0xc4   :  { %p3697_p10 = por %p3696_p9, %p3695_p8 }
  0xc6   :  { %p3698_p11 = pnand %p3697_p10, %p3691_p7 }
  0xc8   :  { %3701 = shalt.err (!%p3698_p11)
}
  0xc9   :  { %168 = dma.hbm_to_vmem [thread:$0]  %s4069_s11, 1024, %s4000_s23, [#allocation21], %s3748_s18, %s3748_s18, %s3749_s27  }
  0xca   :  { %3724 = dma.done.wait [#allocation3], 256  }
  0xcb   :  { %3725 = vsyncadd [#allocation3], 4294967040 }
  0xcc   :  { %3726 = dma.done.wait [#allocation6], 6144  }
  0xcd   :  { %3727 = vsyncadd [#allocation6], 4294961152 }
  0xce   :  { %3728 = dma.done.wait [#allocation9], 16384  }
  0xcf   :  { %3729 = vsyncadd [#allocation9], 4294950912 }
  0xd0   :  { %3730 = dma.done.wait [#allocation12], 3072  }
  0xd1   :  { %3731 = vsyncadd [#allocation12], 4294964224 }
  0xd2   :  { %3732 = dma.done.wait [#allocation15], 2048  }
  0xd3   :  { %3733 = vsyncadd [#allocation15], 4294965248 }
  0xd4   :  { %3734 = dma.done.wait [#allocation18], 2048  }
  0xd5   :  { %3735 = vsyncadd [#allocation18], 4294965248 }
  0xd6   :  { %3736 = dma.done.wait [#allocation21], 1024  }
  0xd7   :  { %3737 = vsyncadd [#allocation21], 4294966272  ;;  %v3758_v0 = vmov 0   ;;  %v3092_v1 = vld [vmem:[#allocation5 + $0x4] ss:$8 sps:$4 sm:$0xff]   ;;  %v3116_v27 = vld [vmem:[#allocation2] sm:$0xff]  }
  0xd8   :  { %350 = vmatprep.mubr.bf16.mxu0 %v3758_v0  ;;  %v3094_v2 = vld [vmem:[#allocation5] ss:$8 sps:$4 sm:$0xff]   ;;  %318 = vmatprep.subr.bf16.mxu0 %v3092_v1  ;;  %v3095_v3 = vld [vmem:[#allocation5 + $0x14] ss:$8 sps:$4 sm:$0xff]   ;;  %v3097_v4 = vld [vmem:[#allocation5 + $0x10] ss:$8 sps:$4 sm:$0xff]  }
  0xd9   :  { %319 = vmatpush1.bf16.msra.mxu0 %v3094_v2  ;;  %v3098_v5 = vld [vmem:[#allocation5 + $0x24] ss:$8 sps:$4 sm:$0xff]   ;;  %v3100_v6 = vld [vmem:[#allocation5 + $0x20] ss:$8 sps:$4 sm:$0xff]   ;;  %v3101_v7 = vld [vmem:[#allocation5 + $0x34] ss:$8 sps:$4 sm:$0xff]  }
  0xda   :  { %320 = vmatprep.subr.bf16.mxu0 %v3095_v3  ;;  %v3103_v8 = vld [vmem:[#allocation5 + $0x30] ss:$8 sps:$4 sm:$0xff]   ;;  %v3104_v9 = vld [vmem:[#allocation5 + $0x44] ss:$8 sps:$4 sm:$0xff]   ;;  %v3120_v11 = vld [vmem:[#allocation7] ss:$8 sps:$4 sm:$0xff]  }
  0xdb   :  { %v3118_v10 = vld [vmem:[#allocation7 + $0x4] ss:$8 sps:$4 sm:$0xff]   ;;  %v3121_v12 = vld [vmem:[#allocation7 + $0x14] ss:$8 sps:$4 sm:$0xff]   ;;  %v3106_v13 = vld [vmem:[#allocation5 + $0x40] ss:$8 sps:$4 sm:$0xff]  }
  0xdc   :  { %575 = vmatprep.subr.bf16.mxu1 %v3118_v10  ;;  %v3107_v14 = vld [vmem:[#allocation5 + $0x54] ss:$8 sps:$4 sm:$0xff]   ;;  %v3123_v15 = vld [vmem:[#allocation7 + $0x10] ss:$8 sps:$4 sm:$0xff]   ;;  %v3124_v16 = vld [vmem:[#allocation7 + $0x24] ss:$8 sps:$4 sm:$0xff]  }
  0xdd   :  { %321 = vmatpush1.bf16.msra.mxu0 %v3097_v4  ;;  %576 = vmatpush1.bf16.msra.mxu1 %v3120_v11  ;;  %v3109_v17 = vld [vmem:[#allocation5 + $0x50] ss:$8 sps:$4 sm:$0xff]   ;;  %v3110_v18 = vld [vmem:[#allocation5 + $0x64] ss:$8 sps:$4 sm:$0xff]   ;;  %v3126_v19 = vld [vmem:[#allocation7 + $0x20] ss:$8 sps:$4 sm:$0xff]  }
  0xde   :  { %322 = vmatprep.subr.bf16.mxu0 %v3098_v5  ;;  %577 = vmatprep.subr.bf16.mxu1 %v3121_v12  ;;  %v3127_v20 = vld [vmem:[#allocation7 + $0x34] ss:$8 sps:$4 sm:$0xff]   ;;  %v3112_v21 = vld [vmem:[#allocation5 + $0x60] ss:$8 sps:$4 sm:$0xff]   ;;  %v3129_v23 = vld [vmem:[#allocation7 + $0x30] ss:$8 sps:$4 sm:$0xff]  }
  0xdf   :  { %v3113_v22 = vld [vmem:[#allocation5 + $0x74] ss:$8 sps:$4 sm:$0xff]   ;;  %v3130_v24 = vld [vmem:[#allocation7 + $0x44] ss:$8 sps:$4 sm:$0xff]   ;;  %v3115_v25 = vld [vmem:[#allocation5 + $0x70] ss:$8 sps:$4 sm:$0xff]  }
  0xe0   :  { %v3132_v26 = vld [vmem:[#allocation7 + $0x40] ss:$8 sps:$4 sm:$0xff]   ;;  %v3133_v28 = vld [vmem:[#allocation7 + $0x54] ss:$8 sps:$4 sm:$0xff]   ;;  %v3135_v29 = vld [vmem:[#allocation7 + $0x50] ss:$8 sps:$4 sm:$0xff]  }
  0xe1   :  { %323 = vmatpush1.bf16.msra.mxu0 %v3100_v6  ;;  %578 = vmatpush1.bf16.msra.mxu1 %v3123_v15  ;;  %v3136_v30 = vld [vmem:[#allocation7 + $0x64] ss:$8 sps:$4 sm:$0xff]   ;;  %v3138_v31 = vld [vmem:[#allocation7 + $0x60] ss:$8 sps:$4 sm:$0xff]   ;;  %v3139_v32 = vld [vmem:[#allocation7 + $0x74] ss:$8 sps:$4 sm:$0xff]  }
  0xe2   :  { %324 = vmatprep.subr.bf16.mxu0 %v3101_v7  ;;  %579 = vmatprep.subr.bf16.mxu1 %v3124_v16  ;;  %v3117_v33 = vld [vmem:[#allocation2 + $0x8] sm:$0xff]   ;;  %v3142_v35 = vld [vmem:[#allocation7 + $0x84] ss:$8 sps:$4 sm:$0xff]   ;;  %v3144_v36 = vld [vmem:[#allocation7 + $0x80] ss:$8 sps:$4 sm:$0xff]   ;;  %s3759_s11 = smov [#allocation22]  }
  0xe3   :  { %v3141_v34 = vld [vmem:[#allocation7 + $0x70] ss:$8 sps:$4 sm:$0xff]   ;;  %v3145_v37 = vld [vmem:[#allocation7 + $0x94] ss:$8 sps:$4 sm:$0xff]   ;;  %v3148_v39 = vld [vmem:[#allocation7 + $0xa4] ss:$8 sps:$4 sm:$0xff]  }
  0xe4   :  { %v3147_v38 = vld [vmem:[#allocation7 + $0x90] ss:$8 sps:$4 sm:$0xff]   ;;  %v3150_v40 = vld [vmem:[#allocation7 + $0xa0] ss:$8 sps:$4 sm:$0xff]   ;;  %v3151_v41 = vld [vmem:[#allocation7 + $0xb4] ss:$8 sps:$4 sm:$0xff]  }
  0xe5   :  { %325 = vmatpush1.bf16.msra.mxu0 %v3103_v8  ;;  %580 = vmatpush1.bf16.msra.mxu1 %v3126_v19  ;;  %v3153_v42 = vld [vmem:[#allocation7 + $0xb0] ss:$8 sps:$4 sm:$0xff]   ;;  %v3154_v43 = vld [vmem:[#allocation7 + $0xc4] ss:$8 sps:$4 sm:$0xff]   ;;  %v3156_v44 = vld [vmem:[#allocation7 + $0xc0] ss:$8 sps:$4 sm:$0xff]  }
  0xe6   :  { %326 = vmatprep.subr.bf16.mxu0 %v3104_v9  ;;  %581 = vmatprep.subr.bf16.mxu1 %v3127_v20  ;;  %v3157_v45 = vld [vmem:[#allocation7 + $0xd4] ss:$8 sps:$4 sm:$0xff]   ;;  %v3159_v46 = vld [vmem:[#allocation7 + $0xd0] ss:$8 sps:$4 sm:$0xff]   ;;  %v3160_v47 = vld [vmem:[#allocation7 + $0xe4] ss:$8 sps:$4 sm:$0xff]  }
  0xe7   :  { %v3162_v48 = vld [vmem:[#allocation7 + $0xe0] ss:$8 sps:$4 sm:$0xff]   ;;  %v3163_v49 = vld [vmem:[#allocation7 + $0xf4] ss:$8 sps:$4 sm:$0xff]   ;;  %v3165_v50 = vld [vmem:[#allocation7 + $0xf0] ss:$8 sps:$4 sm:$0xff]  }
  0xe8   :  { %v3166_v51 = vld [vmem:[#allocation8] ss:$16 sps:$4 sm:$0xff]   ;;  %v3168_v52 = vld [vmem:[#allocation8 + $0x4] ss:$16 sps:$4 sm:$0xff]   ;;  %v3171_v53 = vld [vmem:[#allocation8 + $0xc] ss:$16 sps:$4 sm:$0xff]  }
  0xe9   :  { %327 = vmatpush1.bf16.msra.mxu0 %v3106_v13  ;;  %582 = vmatpush1.bf16.msra.mxu1 %v3129_v23  ;;  %v3174_v54 = vld [vmem:[#allocation8 + $0x24] ss:$16 sps:$4 sm:$0xff]   ;;  %v3172_v55 = vld [vmem:[#allocation8 + $0x20] ss:$16 sps:$4 sm:$0xff]   ;;  %s2596_s18 = sshll.u32 %s3759_s11, 4  ;;  %s2597_s18 = int_to_ptr.vmem [resolvable:$true] %s2596_s18 }
  0xea   :  { %328 = vmatprep.subr.bf16.mxu0 %v3107_v14  ;;  %583 = vmatprep.subr.bf16.mxu1 %v3130_v24  ;;  %v3180_v56 = vld [vmem:[#allocation8 + $0x44] ss:$16 sps:$4 sm:$0xff]   ;;  %v3178_v57 = vld [vmem:[#allocation8 + $0x40] ss:$16 sps:$4 sm:$0xff]   ;;  %s3702_s27 = scalar_lea.vmem %s2597_s18, 512  ;;  %p3707_p13 = scmp.lt.s32.totalorder %s2597_s18, %s2597_s18 }
  0xeb   :  { %v3186_v58 = vld [vmem:[#allocation8 + $0x64] ss:$16 sps:$4 sm:$0xff]   ;;  %v3184_v59 = vld [vmem:[#allocation8 + $0x60] ss:$16 sps:$4 sm:$0xff]   ;;  %p3703_p12 = scmp.ne.s32.totalorder %s2597_s18, %s3702_s27  ;;  %p3708_p0 = scmp.lt.s32.totalorder %s3702_s27, %s3702_s27 }
  0xec   :  { %v3192_v60 = vld [vmem:[#allocation8 + $0x84] ss:$16 sps:$4 sm:$0xff]   ;;  %v3190_v61 = vld [vmem:[#allocation8 + $0x80] ss:$16 sps:$4 sm:$0xff]  }
  0xed   :  { %329 = vmatpush1.bf16.msra.mxu0 %v3109_v17  ;;  %584 = vmatpush1.bf16.msra.mxu1 %v3132_v26  ;;  %v3198_v62 = vld [vmem:[#allocation8 + $0xa4] ss:$16 sps:$4 sm:$0xff]   ;;  %v3196_v63 = vld [vmem:[#allocation8 + $0xa0] ss:$16 sps:$4 sm:$0xff]   ;;  %v3169_v26 = vld [vmem:[#allocation8 + $0x8] ss:$16 sps:$4 sm:$0xff]   ;;  %p3709_p1 = por %p3708_p0, %p3707_p13 }
  0xee   :  { %330 = vmatprep.subr.bf16.mxu0 %v3110_v18  ;;  %585 = vmatprep.subr.bf16.mxu1 %v3133_v28  ;;  %v3202_v1 = vld [vmem:[#allocation8 + $0xc0] ss:$16 sps:$4 sm:$0xff]   ;;  %v3210_v2 = vld [vmem:[#allocation8 + $0xe4] ss:$16 sps:$4 sm:$0xff]  }
  0xef   :  { %v3208_v3 = vld [vmem:[#allocation8 + $0xe0] ss:$16 sps:$4 sm:$0xff]   ;;  %v3216_v4 = vld [vmem:[#allocation8 + $0x104] ss:$16 sps:$4 sm:$0xff]   ;;  %p3710_p2 = pnand %p3709_p1, %p3703_p12 }
  0xf0   :  { %v3214_v5 = vld [vmem:[#allocation8 + $0x100] ss:$16 sps:$4 sm:$0xff]   ;;  %v3222_v6 = vld [vmem:[#allocation8 + $0x124] ss:$16 sps:$4 sm:$0xff]  }
  0xf1   :  { %331 = vmatpush1.bf16.msra.mxu0 %v3112_v21  ;;  %586 = vmatpush1.bf16.msra.mxu1 %v3135_v29  ;;  %v3220_v7 = vld [vmem:[#allocation8 + $0x120] ss:$16 sps:$4 sm:$0xff]   ;;  %v3228_v8 = vld [vmem:[#allocation8 + $0x144] ss:$16 sps:$4 sm:$0xff]  }
  0xf2   :  { %332 = vmatprep.subr.bf16.mxu0 %v3113_v22  ;;  %587 = vmatprep.subr.bf16.mxu1 %v3136_v30  ;;  %v3226_v9 = vld [vmem:[#allocation8 + $0x140] ss:$16 sps:$4 sm:$0xff]   ;;  %v3234_v10 = vld [vmem:[#allocation8 + $0x164] ss:$16 sps:$4 sm:$0xff]  }
  0xf3   :  { %v3232_v11 = vld [vmem:[#allocation8 + $0x160] ss:$16 sps:$4 sm:$0xff]   ;;  %v3240_v12 = vld [vmem:[#allocation8 + $0x184] ss:$16 sps:$4 sm:$0xff]  }
  0xf4   :  { %v3238_v13 = vld [vmem:[#allocation8 + $0x180] ss:$16 sps:$4 sm:$0xff]   ;;  %v3246_v14 = vld [vmem:[#allocation8 + $0x1a4] ss:$16 sps:$4 sm:$0xff]  }
  0xf5   :  { %333 = vmatpush1.bf16.msra.mxu0 %v3115_v25  ;;  %588 = vmatpush1.bf16.msra.mxu1 %v3138_v31  ;;  %v3244_v15 = vld [vmem:[#allocation8 + $0x1a0] ss:$16 sps:$4 sm:$0xff]  }
  0xf6   :  { %589 = vmatprep.subr.bf16.mxu1 %v3139_v32  ;;  %1024 = vmatprep.subr.bf16.mxu0 %v3168_v52  ;;  %v3217_v52 = vld [vmem:[#allocation8 + $0x108] ss:$16 sps:$4 sm:$0xff]  }
  0xf8   :  { %351 = vmatmul.mubr.bf16.vlgmr.msra.gmra.mrb[0].mxu0 %v3116_v27  ;;  %v3177_v27 = vld [vmem:[#allocation8 + $0x2c] ss:$16 sps:$4 sm:$0xff]  }
  0xf9   :  { %360 = vmatprep.mubr.bf16.mxu0 %v3758_v0  ;;  %590 = vmatpush1.bf16.msra.mxu1 %v3141_v34  ;;  %v3204_v0 = vld [vmem:[#allocation8 + $0xc4] ss:$16 sps:$4 sm:$0xff]  }
  0xfa   :  { %591 = vmatprep.subr.bf16.mxu1 %v3142_v35  ;;  %1025 = vmatpush1.bf16.msra.mxu0 %v3166_v51  ;;  %v3219_v51 = vld [vmem:[#allocation8 + $0x10c] ss:$16 sps:$4 sm:$0xff]  }
  0xfb   :  { %1026 = vmatprep.subr.bf16.mxu0 %v3174_v54  ;;  %v3223_v54 = vld [vmem:[#allocation8 + $0x128] ss:$16 sps:$4 sm:$0xff]  }
  0xfd   :  { %592 = vmatpush1.bf16.msra.mxu1 %v3144_v36  ;;  %v3183_v36 = vld [vmem:[#allocation8 + $0x4c] ss:$16 sps:$4 sm:$0xff]  }
  0xfe   :  { %593 = vmatprep.subr.bf16.mxu1 %v3145_v37  ;;  %1027 = vmatpush1.bf16.msra.mxu0 %v3172_v55  ;;  %v3231_v55 = vld [vmem:[#allocation8 + $0x14c] ss:$16 sps:$4 sm:$0xff]  }
  0xff   :  { %1028 = vmatprep.subr.bf16.mxu0 %v3180_v56  ;;  %v3229_v56 = vld [vmem:[#allocation8 + $0x148] ss:$16 sps:$4 sm:$0xff]  }
 0x100   :  { %361 = vmatmul.mubr.bf16.gmra.mrb[4].mxu0 %v3117_v33  ;;  %v3175_v33 = vld [vmem:[#allocation8 + $0x28] ss:$16 sps:$4 sm:$0xff]  }
 0x101   :  { %594 = vmatpush1.bf16.msra.mxu1 %v3147_v38 }
 0x102   :  { %595 = vmatprep.subr.bf16.mxu1 %v3148_v39  ;;  %1029 = vmatpush1.bf16.msra.mxu0 %v3178_v57  ;;  %v3237_v57 = vld [vmem:[#allocation8 + $0x16c] ss:$16 sps:$4 sm:$0xff]  }
 0x103   :  { %1030 = vmatprep.subr.bf16.mxu0 %v3186_v58  ;;  %v3235_v58 = vld [vmem:[#allocation8 + $0x168] ss:$16 sps:$4 sm:$0xff]  }
 0x105   :  { %596 = vmatpush1.bf16.msra.mxu1 %v3150_v40  ;;  %v3181_v40 = vld [vmem:[#allocation8 + $0x48] ss:$16 sps:$4 sm:$0xff]  }
 0x106   :  { %597 = vmatprep.subr.bf16.mxu1 %v3151_v41  ;;  %1031 = vmatpush1.bf16.msra.mxu0 %v3184_v59  ;;  %v3189_v41 = vld [vmem:[#allocation8 + $0x6c] ss:$16 sps:$4 sm:$0xff]  }
 0x107   :  { %1032 = vmatprep.subr.bf16.mxu0 %v3192_v60  ;;  %v3243_v59 = vld [vmem:[#allocation8 + $0x18c] ss:$16 sps:$4 sm:$0xff]   ;;  %v3241_v60 = vld [vmem:[#allocation8 + $0x188] ss:$16 sps:$4 sm:$0xff]  }
 0x109   :  { %598 = vmatpush1.bf16.msra.mxu1 %v3153_v42  ;;  %v3187_v42 = vld [vmem:[#allocation8 + $0x68] ss:$16 sps:$4 sm:$0xff]  }
 0x10a   :  { %599 = vmatprep.subr.bf16.mxu1 %v3154_v43  ;;  %1033 = vmatpush1.bf16.msra.mxu0 %v3190_v61  ;;  %v3195_v43 = vld [vmem:[#allocation8 + $0x8c] ss:$16 sps:$4 sm:$0xff]  }
 0x10b   :  { %1034 = vmatprep.subr.bf16.mxu0 %v3198_v62  ;;  %v3249_v61 = vld [vmem:[#allocation8 + $0x1ac] ss:$16 sps:$4 sm:$0xff]   ;;  %v3247_v62 = vld [vmem:[#allocation8 + $0x1a8] ss:$16 sps:$4 sm:$0xff]  }
 0x10d   :  { %600 = vmatpush1.bf16.msra.mxu1 %v3156_v44  ;;  %v3193_v44 = vld [vmem:[#allocation8 + $0x88] ss:$16 sps:$4 sm:$0xff]  }
 0x10e   :  { %601 = vmatprep.subr.bf16.mxu1 %v3157_v45  ;;  %1035 = vmatpush1.bf16.msra.mxu0 %v3196_v63  ;;  %v3201_v45 = vld [vmem:[#allocation8 + $0xac] ss:$16 sps:$4 sm:$0xff]   ;;  %v3252_v63 = vld [vmem:[#allocation8 + $0x1c4] ss:$16 sps:$4 sm:$0xff]  }
 0x10f   :  { %1036 = vmatprep.subr.bf16.mxu0 %v3204_v0  ;;  %v3255_v0 = vld [vmem:[#allocation8 + $0x1cc] ss:$16 sps:$4 sm:$0xff]  }
 0x111   :  { %602 = vmatpush1.bf16.msra.mxu1 %v3159_v46  ;;  %v3199_v46 = vld [vmem:[#allocation8 + $0xa8] ss:$16 sps:$4 sm:$0xff]  }
 0x112   :  { %603 = vmatprep.subr.bf16.mxu1 %v3160_v47  ;;  %1037 = vmatpush1.bf16.msra.mxu0 %v3202_v1  ;;  %v3207_v47 = vld [vmem:[#allocation8 + $0xcc] ss:$16 sps:$4 sm:$0xff]   ;;  %v3250_v1 = vld [vmem:[#allocation8 + $0x1c0] ss:$16 sps:$4 sm:$0xff]  }
 0x113   :  { %1038 = vmatprep.subr.bf16.mxu0 %v3210_v2  ;;  %v3253_v2 = vld [vmem:[#allocation8 + $0x1c8] ss:$16 sps:$4 sm:$0xff]  }
 0x115   :  { %604 = vmatpush1.bf16.msra.mxu1 %v3162_v48  ;;  %v3205_v48 = vld [vmem:[#allocation8 + $0xc8] ss:$16 sps:$4 sm:$0xff]  }
 0x116   :  { %605 = vmatprep.subr.bf16.mxu1 %v3163_v49  ;;  %1039 = vmatpush1.bf16.msra.mxu0 %v3208_v3  ;;  %v3213_v49 = vld [vmem:[#allocation8 + $0xec] ss:$16 sps:$4 sm:$0xff]   ;;  %v3258_v3 = vld [vmem:[#allocation8 + $0x1e4] ss:$16 sps:$4 sm:$0xff]  }
 0x117   :  { %1040 = vmatprep.subr.bf16.mxu0 %v3216_v4  ;;  %v3261_v4 = vld [vmem:[#allocation8 + $0x1ec] ss:$16 sps:$4 sm:$0xff]  }
 0x119   :  { %606 = vmatpush1.bf16.msra.mxu1 %v3165_v50  ;;  %v3211_v50 = vld [vmem:[#allocation8 + $0xe8] ss:$16 sps:$4 sm:$0xff]  }
 0x11a   :  { %1077 = vmatprep.subr.bf16.mxu1 %v3171_v53  ;;  %1041 = vmatpush1.bf16.msra.mxu0 %v3214_v5  ;;  %v3225_v53 = vld [vmem:[#allocation8 + $0x12c] ss:$16 sps:$4 sm:$0xff]   ;;  %v3256_v5 = vld [vmem:[#allocation8 + $0x1e0] ss:$16 sps:$4 sm:$0xff]  }
 0x11b   :  { %1042 = vmatprep.subr.bf16.mxu0 %v3222_v6  ;;  %v3259_v6 = vld [vmem:[#allocation8 + $0x1e8] ss:$16 sps:$4 sm:$0xff]  }
 0x11e   :  { %1043 = vmatpush1.bf16.msra.mxu0 %v3220_v7  ;;  %v3264_v7 = vld [vmem:[#allocation10 + $0x4] ss:$8 sps:$4 sm:$0xff]  }
 0x11f   :  { %1044 = vmatprep.subr.bf16.mxu0 %v3228_v8 }
 0x122   :  { %1045 = vmatpush1.bf16.msra.mxu0 %v3226_v9 }
 0x123   :  { %1046 = vmatprep.subr.bf16.mxu0 %v3234_v10 }
 0x126   :  { %1047 = vmatpush1.bf16.msra.mxu0 %v3232_v11 }
 0x127   :  { %1048 = vmatprep.subr.bf16.mxu0 %v3240_v12 }
 0x12a   :  { %1049 = vmatpush1.bf16.msra.mxu0 %v3238_v13 }
 0x12b   :  { %1050 = vmatprep.subr.bf16.mxu0 %v3246_v14 }
 0x12e   :  { %1051 = vmatpush1.bf16.msra.mxu0 %v3244_v15 }
 0x12f   :  { %1052 = vmatprep.subr.bf16.mxu0 %v3252_v63  ;;  %v3361_v63 = vld [vmem:[#allocation11 + $0x8] sm:$0xff]  }
 0x132   :  { %1053 = vmatpush1.bf16.msra.mxu0 %v3250_v1  ;;  %v3363_v1 = vld [vmem:[#allocation11 + $0x10] sm:$0xff]  }
 0x133   :  { %1054 = vmatprep.subr.bf16.mxu0 %v3258_v3  ;;  %v3365_v3 = vld [vmem:[#allocation11 + $0x18] sm:$0xff]  }
 0x136   :  { %1055 = vmatpush1.bf16.msra.mxu0 %v3256_v5  ;;  %v3367_v5 = vld [vmem:[#allocation11 + $0x20] sm:$0xff]  }
 0x137   :  { %1538 = vmatprep.subr.bf16.mxu0 %v3264_v7  ;;  %v3369_v7 = vld [vmem:[#allocation11 + $0x28] sm:$0xff]  }
 0x1cb   :  { %v352_v16 = vpop.f32.mrb[0].mxu0 }
 0x1cc   :  { %v354_v17 = vpop.f32.mrb[1].mxu0  ;;  %v371_v19 = vmax.f32 %v352_v16, 0.0 }
 0x1cd   :  { %v356_v18 = vpop.f32.mrb[2].mxu0  ;;  %v372_v22 = vmax.f32 %v354_v17, 0.0 }
 0x1ce   :  { %v373_v20 = vmax.f32 %v356_v18, 0.0  ;;  %v358_v21 = vpop.f32.mrb[3].mxu0  ;;  %v3262_v18 = vld [vmem:[#allocation10] ss:$8 sps:$4 sm:$0xff]  }
 0x1cf   :  { %v374_v23 = vmax.f32 %v358_v21, 0.0 }
 0x1d0   :  { %v379_v24 = vpack.c.bf16 %v373_v20, %v371_v19  ;;  %v3267_v19 = vld [vmem:[#allocation10 + $0x14] ss:$8 sps:$4 sm:$0xff]  }
 0x1d1   :  { %v380_v25 = vpack.c.bf16 %v374_v23, %v372_v22 }
 0x1d3   :  { %v362_v28 = vpop.f32.mrb[4].mxu0  ;;  %607 = vmatprep.mubr.bf16.mxu1 %v380_v25  ;;  %v3265_v25 = vld [vmem:[#allocation10 + $0x10] ss:$8 sps:$4 sm:$0xff]  }
 0x1d4   :  { %v375_v29 = vmax.f32 %v362_v28, 0.0  ;;  %v364_v30 = vpop.f32.mrb[5].mxu0  ;;  %608 = vmatmul.mubr.bf16.vlgmr.msra.gmra.mrb[0].mxu1 %v379_v24  ;;  %v3270_v28 = vld [vmem:[#allocation10 + $0x24] ss:$8 sps:$4 sm:$0xff]  }
 0x1d5   :  { %v376_v31 = vmax.f32 %v364_v30, 0.0  ;;  %v366_v32 = vpop.f32.mrb[6].mxu0  ;;  %1078 = vmatpush1.bf16.msra.mxu1 %v3169_v26 }
 0x1d6   :  { %v377_v34 = vmax.f32 %v366_v32, 0.0  ;;  %v368_v35 = vpop.f32.mrb[7].mxu0  ;;  %1079 = vmatprep.subr.bf16.mxu1 %v3177_v27  ;;  %v3268_v32 = vld [vmem:[#allocation10 + $0x20] ss:$8 sps:$4 sm:$0xff]  }
 0x1d7   :  { %v378_v37 = vmax.f32 %v368_v35, 0.0  ;;  %v3276_v35 = vld [vmem:[#allocation10 + $0x44] ss:$8 sps:$4 sm:$0xff]  }
 0x1d8   :  { %v381_v38 = vpack.c.bf16 %v377_v34, %v375_v29  ;;  %v3271_v34 = vld [vmem:[#allocation10 + $0x30] ss:$8 sps:$4 sm:$0xff]  }
 0x1d9   :  { %v382_v39 = vpack.c.bf16 %v378_v37, %v376_v31  ;;  %1080 = vmatpush1.bf16.msra.mxu1 %v3175_v33  ;;  %v3273_v33 = vld [vmem:[#allocation10 + $0x34] ss:$8 sps:$4 sm:$0xff]  }
 0x1da   :  { %1081 = vmatprep.subr.bf16.mxu1 %v3183_v36  ;;  %v3274_v36 = vld [vmem:[#allocation10 + $0x40] ss:$8 sps:$4 sm:$0xff]   ;;  %v3279_v37 = vld [vmem:[#allocation10 + $0x54] ss:$8 sps:$4 sm:$0xff]  }
 0x1db   :  { %617 = vmatprep.mubr.bf16.mxu1 %v382_v39  ;;  %v3282_v39 = vld [vmem:[#allocation10 + $0x64] ss:$8 sps:$4 sm:$0xff]  }
 0x1dc   :  { %618 = vmatmul.mubr.bf16.gmra.mrb[4].mxu1 %v381_v38  ;;  %v3277_v38 = vld [vmem:[#allocation10 + $0x50] ss:$8 sps:$4 sm:$0xff]  }
 0x1dd   :  { %1082 = vmatpush1.bf16.msra.mxu1 %v3181_v40  ;;  %v3280_v40 = vld [vmem:[#allocation10 + $0x60] ss:$8 sps:$4 sm:$0xff]  }
 0x1de   :  { %1083 = vmatprep.subr.bf16.mxu1 %v3189_v41  ;;  %v3285_v41 = vld [vmem:[#allocation10 + $0x74] ss:$8 sps:$4 sm:$0xff]  }
 0x1e1   :  { %1084 = vmatpush1.bf16.msra.mxu1 %v3187_v42  ;;  %v3283_v42 = vld [vmem:[#allocation10 + $0x70] ss:$8 sps:$4 sm:$0xff]  }
 0x1e2   :  { %1085 = vmatprep.subr.bf16.mxu1 %v3195_v43  ;;  %v3288_v43 = vld [vmem:[#allocation10 + $0x84] ss:$8 sps:$4 sm:$0xff]  }
 0x1e5   :  { %1086 = vmatpush1.bf16.msra.mxu1 %v3193_v44  ;;  %v3286_v44 = vld [vmem:[#allocation10 + $0x80] ss:$8 sps:$4 sm:$0xff]  }
 0x1e6   :  { %1087 = vmatprep.subr.bf16.mxu1 %v3201_v45  ;;  %v3291_v45 = vld [vmem:[#allocation10 + $0x94] ss:$8 sps:$4 sm:$0xff]  }
 0x1e9   :  { %1088 = vmatpush1.bf16.msra.mxu1 %v3199_v46  ;;  %v3289_v46 = vld [vmem:[#allocation10 + $0x90] ss:$8 sps:$4 sm:$0xff]  }
 0x1ea   :  { %1089 = vmatprep.subr.bf16.mxu1 %v3207_v47  ;;  %v3294_v47 = vld [vmem:[#allocation10 + $0xa4] ss:$8 sps:$4 sm:$0xff]  }
 0x1ed   :  { %1090 = vmatpush1.bf16.msra.mxu1 %v3205_v48  ;;  %v3292_v48 = vld [vmem:[#allocation10 + $0xa0] ss:$8 sps:$4 sm:$0xff]  }
 0x1ee   :  { %1091 = vmatprep.subr.bf16.mxu1 %v3213_v49  ;;  %v3297_v49 = vld [vmem:[#allocation10 + $0xb4] ss:$8 sps:$4 sm:$0xff]  }
 0x1f1   :  { %1092 = vmatpush1.bf16.msra.mxu1 %v3211_v50  ;;  %v3295_v50 = vld [vmem:[#allocation10 + $0xb0] ss:$8 sps:$4 sm:$0xff]  }
 0x1f2   :  { %1093 = vmatprep.subr.bf16.mxu1 %v3219_v51  ;;  %v3300_v51 = vld [vmem:[#allocation10 + $0xc4] ss:$8 sps:$4 sm:$0xff]  }
 0x1f5   :  { %1094 = vmatpush1.bf16.msra.mxu1 %v3217_v52  ;;  %v3298_v52 = vld [vmem:[#allocation10 + $0xc0] ss:$8 sps:$4 sm:$0xff]  }
 0x1f6   :  { %1095 = vmatprep.subr.bf16.mxu1 %v3225_v53  ;;  %v3303_v53 = vld [vmem:[#allocation10 + $0xd4] ss:$8 sps:$4 sm:$0xff]  }
 0x1f9   :  { %1096 = vmatpush1.bf16.msra.mxu1 %v3223_v54  ;;  %v3301_v54 = vld [vmem:[#allocation10 + $0xd0] ss:$8 sps:$4 sm:$0xff]  }
 0x1fa   :  { %1097 = vmatprep.subr.bf16.mxu1 %v3231_v55  ;;  %v3306_v55 = vld [vmem:[#allocation10 + $0xe4] ss:$8 sps:$4 sm:$0xff]  }
 0x1fd   :  { %1098 = vmatpush1.bf16.msra.mxu1 %v3229_v56  ;;  %v3304_v56 = vld [vmem:[#allocation10 + $0xe0] ss:$8 sps:$4 sm:$0xff]  }
 0x1fe   :  { %1099 = vmatprep.subr.bf16.mxu1 %v3237_v57  ;;  %v3309_v57 = vld [vmem:[#allocation10 + $0xf4] ss:$8 sps:$4 sm:$0xff]  }
 0x201   :  { %1100 = vmatpush1.bf16.msra.mxu1 %v3235_v58  ;;  %v3307_v58 = vld [vmem:[#allocation10 + $0xf0] ss:$8 sps:$4 sm:$0xff]  }
 0x202   :  { %1101 = vmatprep.subr.bf16.mxu1 %v3243_v59  ;;  %v3312_v59 = vld [vmem:[#allocation10 + $0x104] ss:$8 sps:$4 sm:$0xff]  }
 0x205   :  { %1102 = vmatpush1.bf16.msra.mxu1 %v3241_v60  ;;  %v3358_v60 = vld [vmem:[#allocation11 + $0x40] sm:$0xff]  }
 0x206   :  { %1103 = vmatprep.subr.bf16.mxu1 %v3249_v61  ;;  %v3359_v61 = vld [vmem:[#allocation11] sm:$0xff]  }
 0x209   :  { %1104 = vmatpush1.bf16.msra.mxu1 %v3247_v62  ;;  %v3360_v62 = vld [vmem:[#allocation11 + $0x48] sm:$0xff]  }
 0x20a   :  { %1105 = vmatprep.subr.bf16.mxu1 %v3255_v0  ;;  %v3362_v0 = vld [vmem:[#allocation11 + $0x50] sm:$0xff]  }
 0x20d   :  { %1106 = vmatpush1.bf16.msra.mxu1 %v3253_v2  ;;  %v3364_v2 = vld [vmem:[#allocation11 + $0x58] sm:$0xff]  }
 0x20e   :  { %1107 = vmatprep.subr.bf16.mxu1 %v3261_v4  ;;  %v3366_v4 = vld [vmem:[#allocation11 + $0x60] sm:$0xff]  }
 0x211   :  { %1108 = vmatpush1.bf16.msra.mxu1 %v3259_v6  ;;  %v3368_v6 = vld [vmem:[#allocation11 + $0x68] sm:$0xff]  }
 0x212   :  { %2856 = vmatprep.subr.bf16.mxu1 %v3358_v60  ;;  %v3328_v60 = vld [vmem:[#allocation10 + $0x160] ss:$8 sps:$4 sm:$0xff]  }
 0x2a7   :  { %v609_v8 = vpop.f32.mrb[0].mxu1 }
 0x2a8   :  { %v611_v9 = vpop.f32.mrb[1].mxu1  ;;  %v628_v11 = vmax.f32 %v609_v8, 0.0 }
 0x2a9   :  { %v613_v10 = vpop.f32.mrb[2].mxu1  ;;  %v629_v14 = vmax.f32 %v611_v9, 0.0 }
 0x2aa   :  { %v630_v12 = vmax.f32 %v613_v10, 0.0  ;;  %v615_v13 = vpop.f32.mrb[3].mxu1 }
 0x2ab   :  { %v631_v15 = vmax.f32 %v615_v13, 0.0 }
 0x2ac   :  { %v636_v16 = vpack.c.bf16 %v630_v12, %v628_v11 }
 0x2ad   :  { %v637_v17 = vpack.c.bf16 %v631_v15, %v629_v14 }
 0x2af   :  { %v619_v20 = vpop.f32.mrb[4].mxu1  ;;  %1056 = vmatprep.mubr.bf16.mxu0 %v637_v17  ;;  %1109 = vmatprep.mubr.bf16.mxu1 %v637_v17 }
 0x2b0   :  { %v632_v21 = vmax.f32 %v619_v20, 0.0  ;;  %v621_v22 = vpop.f32.mrb[5].mxu1  ;;  %1057 = vmatmul.mubr.bf16.vlgmr.msra.gmra.mrb[8].mxu0 %v636_v16  ;;  %1110 = vmatmul.mubr.bf16.vlgmr.msra.gmra.mrb[8].mxu1 %v636_v16 }
 0x2b1   :  { %v633_v23 = vmax.f32 %v621_v22, 0.0  ;;  %v623_v24 = vpop.f32.mrb[6].mxu1  ;;  %1539 = vmatpush1.bf16.msra.mxu0 %v3262_v18  ;;  %2857 = vmatpush3.bf16.msra.mxu1 %v3359_v61  ;;  %v3333_v61 = vld [vmem:[#allocation10 + $0x174] ss:$8 sps:$4 sm:$0xff]  }
 0x2b2   :  { %v634_v26 = vmax.f32 %v623_v24, 0.0  ;;  %v625_v27 = vpop.f32.mrb[7].mxu1  ;;  %1540 = vmatprep.subr.bf16.mxu0 %v3267_v19  ;;  %2858 = vmatprep.subr.bf16.mxu1 %v3360_v62  ;;  %v3331_v62 = vld [vmem:[#allocation10 + $0x170] ss:$8 sps:$4 sm:$0xff]  }
 0x2b3   :  { %v635_v29 = vmax.f32 %v625_v27, 0.0 }
 0x2b4   :  { %v638_v30 = vpack.c.bf16 %v634_v26, %v632_v21 }
 0x2b5   :  { %v639_v31 = vpack.c.bf16 %v635_v29, %v633_v23  ;;  %1541 = vmatpush1.bf16.msra.mxu0 %v3265_v25  ;;  %2859 = vmatpush3.bf16.msra.mxu1 %v3361_v63  ;;  %v3315_v29 = vld [vmem:[#allocation10 + $0x114] ss:$8 sps:$4 sm:$0xff]   ;;  %v3336_v63 = vld [vmem:[#allocation10 + $0x184] ss:$8 sps:$4 sm:$0xff]  }
 0x2b6   :  { %1542 = vmatprep.subr.bf16.mxu0 %v3270_v28  ;;  %2860 = vmatprep.subr.bf16.mxu1 %v3362_v0  ;;  %v3310_v28 = vld [vmem:[#allocation10 + $0x100] ss:$8 sps:$4 sm:$0xff]  }
 0x2b7   :  { %1066 = vmatprep.mubr.bf16.mxu0 %v639_v31  ;;  %1119 = vmatprep.mubr.bf16.mxu1 %v639_v31  ;;  %v3334_v0 = vld [vmem:[#allocation10 + $0x180] ss:$8 sps:$4 sm:$0xff]  }
 0x2b8   :  { %1067 = vmatmul.mubr.bf16.gmra.mrb[12].mxu0 %v638_v30  ;;  %1120 = vmatmul.mubr.bf16.gmra.mrb[12].mxu1 %v638_v30 }
 0x2b9   :  { %1543 = vmatpush1.bf16.msra.mxu0 %v3268_v32  ;;  %2861 = vmatpush3.bf16.msra.mxu1 %v3363_v1  ;;  %v3339_v1 = vld [vmem:[#allocation10 + $0x194] ss:$8 sps:$4 sm:$0xff]  }
 0x2ba   :  { %1544 = vmatprep.subr.bf16.mxu0 %v3273_v33  ;;  %2862 = vmatprep.subr.bf16.mxu1 %v3364_v2  ;;  %v3337_v2 = vld [vmem:[#allocation10 + $0x190] ss:$8 sps:$4 sm:$0xff]  }
 0x2bd   :  { %1545 = vmatpush1.bf16.msra.mxu0 %v3271_v34  ;;  %2863 = vmatpush3.bf16.msra.mxu1 %v3365_v3  ;;  %v3342_v3 = vld [vmem:[#allocation10 + $0x1a4] ss:$8 sps:$4 sm:$0xff]  }
 0x2be   :  { %1546 = vmatprep.subr.bf16.mxu0 %v3276_v35  ;;  %2864 = vmatprep.subr.bf16.mxu1 %v3366_v4  ;;  %v3340_v4 = vld [vmem:[#allocation10 + $0x1a0] ss:$8 sps:$4 sm:$0xff]  }
 0x2c1   :  { %1547 = vmatpush1.bf16.msra.mxu0 %v3274_v36  ;;  %2865 = vmatpush3.bf16.msra.mxu1 %v3367_v5  ;;  %v3345_v5 = vld [vmem:[#allocation10 + $0x1b4] ss:$8 sps:$4 sm:$0xff]  }
 0x2c2   :  { %1548 = vmatprep.subr.bf16.mxu0 %v3279_v37  ;;  %2866 = vmatprep.subr.bf16.mxu1 %v3368_v6  ;;  %v3343_v6 = vld [vmem:[#allocation10 + $0x1b0] ss:$8 sps:$4 sm:$0xff]  }
 0x2c5   :  { %1549 = vmatpush1.bf16.msra.mxu0 %v3277_v38  ;;  %2867 = vmatpush3.bf16.msra.mxu1 %v3369_v7  ;;  %v3313_v38 = vld [vmem:[#allocation10 + $0x110] ss:$8 sps:$4 sm:$0xff]   ;;  %v3348_v7 = vld [vmem:[#allocation10 + $0x1c4] ss:$8 sps:$4 sm:$0xff]  }
 0x2c6   :  { %1550 = vmatprep.subr.bf16.mxu0 %v3282_v39 }
 0x2c9   :  { %1551 = vmatpush1.bf16.msra.mxu0 %v3280_v40 }
 0x2ca   :  { %1552 = vmatprep.subr.bf16.mxu0 %v3285_v41 }
 0x2cd   :  { %1553 = vmatpush1.bf16.msra.mxu0 %v3283_v42 }
 0x2ce   :  { %1554 = vmatprep.subr.bf16.mxu0 %v3288_v43  ;;  %v3318_v43 = vld [vmem:[#allocation10 + $0x124] ss:$8 sps:$4 sm:$0xff]  }
 0x2d1   :  { %1555 = vmatpush1.bf16.msra.mxu0 %v3286_v44 }
 0x2d2   :  { %1556 = vmatprep.subr.bf16.mxu0 %v3291_v45 }
 0x2d5   :  { %1557 = vmatpush1.bf16.msra.mxu0 %v3289_v46 }
 0x2d6   :  { %1558 = vmatprep.subr.bf16.mxu0 %v3294_v47 }
 0x2d9   :  { %1559 = vmatpush1.bf16.msra.mxu0 %v3292_v48 }
 0x2da   :  { %1560 = vmatprep.subr.bf16.mxu0 %v3297_v49 }
 0x2dd   :  { %1561 = vmatpush1.bf16.msra.mxu0 %v3295_v50 }
 0x2de   :  { %1562 = vmatprep.subr.bf16.mxu0 %v3300_v51  ;;  %v3316_v51 = vld [vmem:[#allocation10 + $0x120] ss:$8 sps:$4 sm:$0xff]  }
 0x2e1   :  { %1563 = vmatpush1.bf16.msra.mxu0 %v3298_v52 }
 0x2e2   :  { %1564 = vmatprep.subr.bf16.mxu0 %v3303_v53  ;;  %v3321_v53 = vld [vmem:[#allocation10 + $0x134] ss:$8 sps:$4 sm:$0xff]  }
 0x2e5   :  { %1565 = vmatpush1.bf16.msra.mxu0 %v3301_v54  ;;  %v3319_v54 = vld [vmem:[#allocation10 + $0x130] ss:$8 sps:$4 sm:$0xff]  }
 0x2e6   :  { %1566 = vmatprep.subr.bf16.mxu0 %v3306_v55  ;;  %v3324_v55 = vld [vmem:[#allocation10 + $0x144] ss:$8 sps:$4 sm:$0xff]  }
 0x2e9   :  { %1567 = vmatpush1.bf16.msra.mxu0 %v3304_v56  ;;  %v3322_v56 = vld [vmem:[#allocation10 + $0x140] ss:$8 sps:$4 sm:$0xff]  }
 0x2ea   :  { %1568 = vmatprep.subr.bf16.mxu0 %v3309_v57  ;;  %v3327_v57 = vld [vmem:[#allocation10 + $0x154] ss:$8 sps:$4 sm:$0xff]  }
 0x2ed   :  { %1569 = vmatpush1.bf16.msra.mxu0 %v3307_v58  ;;  %v3325_v58 = vld [vmem:[#allocation10 + $0x150] ss:$8 sps:$4 sm:$0xff]  }
 0x2ee   :  { %1591 = vmatprep.subr.bf16.mxu0 %v3312_v59  ;;  %v3330_v59 = vld [vmem:[#allocation10 + $0x164] ss:$8 sps:$4 sm:$0xff]  }
 0x383   :  { %v1058_v8 = vpop.f32.mrb[8].mxu0  ;;  %v1111_v9 = vpop.f32.mrb[8].mxu1 }
 0x384   :  { %v1060_v10 = vpop.f32.mrb[9].mxu0  ;;  %v1113_v11 = vpop.f32.mrb[9].mxu1  ;;  %v1130_v14 = vmax.f32 %v1058_v8, 0.0  ;;  %v1132_v15 = vmax.f32 %v1111_v9, 0.0  ;;  %v3346_v8 = vld [vmem:[#allocation10 + $0x1c0] ss:$8 sps:$4 sm:$0xff]  }
 0x385   :  { %v1062_v12 = vpop.f32.mrb[10].mxu0  ;;  %v1115_v13 = vpop.f32.mrb[10].mxu1  ;;  %v1131_v20 = vmax.f32 %v1060_v10, 0.0  ;;  %v1133_v21 = vmax.f32 %v1113_v11, 0.0  ;;  %v3351_v9 = vld [vmem:[#allocation10 + $0x1d4] ss:$8 sps:$4 sm:$0xff]  }
 0x386   :  { %v1134_v16 = vmax.f32 %v1062_v12, 0.0  ;;  %v1136_v17 = vmax.f32 %v1115_v13, 0.0  ;;  %v1064_v18 = vpop.f32.mrb[11].mxu0  ;;  %v1117_v19 = vpop.f32.mrb[11].mxu1  ;;  %v3349_v10 = vld [vmem:[#allocation10 + $0x1d0] ss:$8 sps:$4 sm:$0xff]  }
 0x387   :  { %v1135_v22 = vmax.f32 %v1064_v18, 0.0  ;;  %v1137_v23 = vmax.f32 %v1117_v19, 0.0  ;;  %v3354_v11 = vld [vmem:[#allocation10 + $0x1e4] ss:$8 sps:$4 sm:$0xff]   ;;  %v3352_v12 = vld [vmem:[#allocation10 + $0x1e0] ss:$8 sps:$4 sm:$0xff]  }
 0x388   :  { %v1146_v24 = vpack.c.bf16 %v1134_v16, %v1130_v14  ;;  %v4037_v25 = vpack.c.bf16 %v1136_v17, %v1132_v15  ;;  %v3357_v13 = vld [vmem:[#allocation10 + $0x1f4] ss:$8 sps:$4 sm:$0xff]   ;;  %v3355_v14 = vld [vmem:[#allocation10 + $0x1f0] ss:$8 sps:$4 sm:$0xff]   ;;  %v3374_v19 = vld [vmem:[#allocation13] sm:$0xff]  }
 0x389   :  { %v1147_v26 = vpack.c.bf16 %v1135_v22, %v1131_v20  ;;  %v1149_v27 = vpack.c.bf16 %v1137_v23, %v1133_v21  ;;  %v3370_v15 = vld [vmem:[#allocation11 + $0x70] sm:$0xff]   ;;  %v3372_v17 = vld [vmem:[#allocation11 + $0x78] sm:$0xff]  }
 0x38a   :  { %v3371_v16 = vld [vmem:[#allocation11 + $0x30] sm:$0xff]   ;;  %2868 = vmatprep.subr.bf16.mxu1 %v3370_v15  ;;  %v3373_v18 = vld [vmem:[#allocation11 + $0x38] sm:$0xff]  }
 0x38b   :  { %v1068_v30 = vpop.f32.mrb[12].mxu0  ;;  %1570 = vmatprep.mubr.bf16.mxu0 %v1147_v26  ;;  %v1121_v31 = vpop.f32.mrb[12].mxu1  ;;  %2869 = vmatpush3.bf16.msra.mxu1 %v3371_v16 }
 0x38c   :  { %v1138_v32 = vmax.f32 %v1068_v30, 0.0  ;;  %v1070_v33 = vpop.f32.mrb[13].mxu0  ;;  %1571 = vmatmul.mubr.bf16.vlgmr.msra.gmra.mrb[16].mxu0 %v1146_v24  ;;  %v1140_v34 = vmax.f32 %v1121_v31, 0.0  ;;  %v1123_v35 = vpop.f32.mrb[13].mxu1  ;;  %2870 = vmatprep.subr.bf16.mxu1 %v3372_v17  ;;  %v3375_v30 = vld [vmem:[#allocation13 + $0x8] sm:$0xff]  }
 0x38d   :  { %v1139_v36 = vmax.f32 %v1070_v33, 0.0  ;;  %1592 = vmatpush1.bf16.msra.mxu0 %v3310_v28  ;;  %v1072_v37 = vpop.f32.mrb[14].mxu0  ;;  %v1141_v39 = vmax.f32 %v1123_v35, 0.0  ;;  %v1125_v40 = vpop.f32.mrb[14].mxu1 }
 0x38e   :  { %v1142_v41 = vmax.f32 %v1072_v37, 0.0  ;;  %v1074_v42 = vpop.f32.mrb[15].mxu0  ;;  %1593 = vmatprep.subr.bf16.mxu0 %v3315_v29  ;;  %v1144_v44 = vmax.f32 %v1125_v40, 0.0  ;;  %v1127_v45 = vpop.f32.mrb[15].mxu1  ;;  %v3376_v37 = vld [vmem:[#allocation13 + $0x10] sm:$0xff]  }
 0x38f   :  { %v1143_v46 = vmax.f32 %v1074_v42, 0.0  ;;  %v1145_v47 = vmax.f32 %v1127_v45, 0.0  ;;  %2871 = vmatpush3.bf16.msra.mxu1 %v3373_v18  ;;  %v3377_v42 = vld [vmem:[#allocation13 + $0x18] sm:$0xff]   ;;  %v3380_v45 = vld [vmem:[#allocation13 + $0x30] sm:$0xff]  }
 0x390   :  { %v1150_v48 = vpack.c.bf16 %v1142_v41, %v1138_v32  ;;  %v4039_v49 = vpack.c.bf16 %v1144_v44, %v1140_v34  ;;  %2944 = vmatprep.subr.bf16.mxu1 %v3374_v19  ;;  %v3379_v44 = vld [vmem:[#allocation13 + $0x28] sm:$0xff]  }
 0x391   :  { %v1151_v50 = vpack.c.bf16 %v1143_v46, %v1139_v36  ;;  %1594 = vmatpush1.bf16.msra.mxu0 %v3313_v38  ;;  %v1153_v52 = vpack.c.bf16 %v1145_v47, %v1141_v39  ;;  %v3381_v46 = vld [vmem:[#allocation13 + $0x38] sm:$0xff]   ;;  %v3382_v47 = vld [vmem:[#allocation14] sm:$0xff]  }
 0x392   :  { %1595 = vmatprep.subr.bf16.mxu0 %v3318_v43  ;;  %v3378_v43 = vld [vmem:[#allocation13 + $0x20] sm:$0xff]  }
 0x393   :  { %1580 = vmatprep.mubr.bf16.mxu0 %v1151_v50 }
 0x394   :  { %1581 = vmatmul.mubr.bf16.gmra.mrb[20].mxu0 %v1150_v48 }
 0x395   :  { %1596 = vmatpush1.bf16.msra.mxu0 %v3316_v51  ;;  %1623 = vmatprep.mubr.bf16.mxu0 %v1149_v27 }
 0x396   :  { %1597 = vmatprep.subr.bf16.mxu0 %v3321_v53 }
 0x399   :  { %1598 = vmatpush1.bf16.msra.mxu0 %v3319_v54 }
 0x39a   :  { %1599 = vmatprep.subr.bf16.mxu0 %v3324_v55 }
 0x39d   :  { %1600 = vmatpush1.bf16.msra.mxu0 %v3322_v56 }
 0x39e   :  { %1601 = vmatprep.subr.bf16.mxu0 %v3327_v57 }
 0x3a1   :  { %1602 = vmatpush1.bf16.msra.mxu0 %v3325_v58 }
 0x3a2   :  { %1603 = vmatprep.subr.bf16.mxu0 %v3330_v59 }
 0x3a5   :  { %1604 = vmatpush1.bf16.msra.mxu0 %v3328_v60 }
 0x3a6   :  { %1605 = vmatprep.subr.bf16.mxu0 %v3333_v61 }
 0x3a9   :  { %1606 = vmatpush1.bf16.msra.mxu0 %v3331_v62 }
 0x3aa   :  { %1607 = vmatprep.subr.bf16.mxu0 %v3336_v63 }
 0x3ad   :  { %1608 = vmatpush1.bf16.msra.mxu0 %v3334_v0 }
 0x3ae   :  { %1609 = vmatprep.subr.bf16.mxu0 %v3339_v1 }
 0x3b1   :  { %1610 = vmatpush1.bf16.msra.mxu0 %v3337_v2  ;;  %v3383_v2 = vld [vmem:[#allocation14 + $0x8] sm:$0xff]  }
 0x3b2   :  { %1611 = vmatprep.subr.bf16.mxu0 %v3342_v3  ;;  %v3384_v3 = vld [vmem:[#allocation14 + $0x10] sm:$0xff]  }
 0x3b5   :  { %1612 = vmatpush1.bf16.msra.mxu0 %v3340_v4  ;;  %v3385_v4 = vld [vmem:[#allocation14 + $0x18] sm:$0xff]  }
 0x3b6   :  { %1613 = vmatprep.subr.bf16.mxu0 %v3345_v5  ;;  %v3386_v5 = vld [vmem:[#allocation14 + $0x20] sm:$0xff]  }
 0x3b9   :  { %1614 = vmatpush1.bf16.msra.mxu0 %v3343_v6  ;;  %v3387_v6 = vld [vmem:[#allocation14 + $0x28] sm:$0xff]  }
 0x3ba   :  { %1615 = vmatprep.subr.bf16.mxu0 %v3348_v7  ;;  %v3388_v7 = vld [vmem:[#allocation14 + $0x30] sm:$0xff]  }
 0x3bd   :  { %1616 = vmatpush1.bf16.msra.mxu0 %v3346_v8  ;;  %v3389_v8 = vld [vmem:[#allocation14 + $0x38] sm:$0xff]  }
 0x3be   :  { %1617 = vmatprep.subr.bf16.mxu0 %v3351_v9  ;;  %v3390_v9 = vld [vmem:[#allocation16] sm:$0xff]  }
 0x3c1   :  { %1618 = vmatpush1.bf16.msra.mxu0 %v3349_v10  ;;  %v3391_v10 = vld [vmem:[#allocation16 + $0x8] sm:$0xff]  }
 0x3c2   :  { %1619 = vmatprep.subr.bf16.mxu0 %v3354_v11  ;;  %v3392_v11 = vld [vmem:[#allocation16 + $0x10] sm:$0xff]  }
 0x3c5   :  { %1620 = vmatpush1.bf16.msra.mxu0 %v3352_v12  ;;  %v3393_v12 = vld [vmem:[#allocation16 + $0x18] sm:$0xff]  }
 0x3c6   :  { %1621 = vmatprep.subr.bf16.mxu0 %v3357_v13  ;;  %v3394_v13 = vld [vmem:[#allocation16 + $0x20] sm:$0xff]  }
 0x3c9   :  { %1622 = vmatpush1.bf16.msra.mxu0 %v3355_v14  ;;  %v3395_v14 = vld [vmem:[#allocation16 + $0x28] sm:$0xff]  }
 0x3ca   :  { %2984 = vmatprep.subr.bf16.mxu0 %v3390_v9 }
 0x3cc   :  { %1624 = vmatmul.mubr.bf16.vlgmr.msra.gmra.mrb[16].mxu0 %v4037_v25 }
 0x3cd   :  { %1633 = vmatprep.mubr.bf16.mxu0 %v1153_v52  ;;  %2985 = vmatpush3.bf16.msra.mxu0 %v3390_v9 }
 0x3ce   :  { %2986 = vmatprep.subr.bf16.mxu0 %v3391_v10 }
 0x3d1   :  { %2987 = vmatpush3.bf16.msra.mxu0 %v3391_v10 }
 0x3d2   :  { %2988 = vmatprep.subr.bf16.mxu0 %v3392_v11 }
 0x3d4   :  { %1634 = vmatmul.mubr.bf16.gmra.mrb[20].mxu0 %v4039_v49 }
 0x3d5   :  { %2989 = vmatpush3.bf16.msra.mxu0 %v3392_v11 }
 0x3d6   :  { %2990 = vmatprep.subr.bf16.mxu0 %v3393_v12 }
 0x3d9   :  { %2991 = vmatpush3.bf16.msra.mxu0 %v3393_v12 }
 0x3da   :  { %2992 = vmatprep.subr.bf16.mxu0 %v3394_v13 }
 0x3dd   :  { %2993 = vmatpush3.bf16.msra.mxu0 %v3394_v13 }
 0x3de   :  { %2994 = vmatprep.subr.bf16.mxu0 %v3395_v14 }
 0x3e1   :  { %2995 = vmatpush3.bf16.msra.mxu0 %v3395_v14 }
 0x49f   :  { %v1625_v20 = vpop.f32.mrb[16].mxu0 }
 0x4a0   :  { %v1627_v21 = vpop.f32.mrb[17].mxu0  ;;  %v1644_v23 = vmax.f32 %v1625_v20, 0.0 }
 0x4a1   :  { %v1629_v22 = vpop.f32.mrb[18].mxu0  ;;  %v1645_v25 = vmax.f32 %v1627_v21, 0.0 }
 0x4a2   :  { %v1646_v24 = vmax.f32 %v1629_v22, 0.0  ;;  %v1631_v26 = vpop.f32.mrb[19].mxu0 }
 0x4a3   :  { %v1647_v27 = vmax.f32 %v1631_v26, 0.0  ;;  %v3396_v26 = vld [vmem:[#allocation16 + $0x30] sm:$0xff]  }
 0x4a4   :  { %v1652_v28 = vpack.c.bf16 %v1646_v24, %v1644_v23  ;;  %2996 = vmatprep.subr.bf16.mxu0 %v3396_v26 }
 0x4a5   :  { %v1653_v29 = vpack.c.bf16 %v1647_v27, %v1645_v25  ;;  %2997 = vmatpush3.bf16.msra.mxu0 %v3396_v26  ;;  %v3397_v25 = vld [vmem:[#allocation16 + $0x38] sm:$0xff]   ;;  %v3398_v27 = vld [vmem:[#allocation17] sm:$0xff]  }
 0x4a6   :  { %2998 = vmatprep.subr.bf16.mxu0 %v3397_v25 }
 0x4a7   :  { %v1635_v31 = vpop.f32.mrb[20].mxu0  ;;  %1816 = vmatprep.mubr.bf16.mxu1 %v1653_v29  ;;  %v3400_v29 = vld [vmem:[#allocation17 + $0x10] sm:$0xff]  }
 0x4a8   :  { %v1637_v32 = vpop.f32.mrb[21].mxu0  ;;  %1817 = vmatmul.mubr.bf16.vlgmr.msra.gmra.mrb[16].mxu1 %v1652_v28  ;;  %v1648_v34 = vmax.f32 %v1635_v31, 0.0  ;;  %v3399_v28 = vld [vmem:[#allocation17 + $0x8] sm:$0xff]   ;;  %v3402_v31 = vld [vmem:[#allocation17 + $0x20] sm:$0xff]  }
 0x4a9   :  { %v1639_v33 = vpop.f32.mrb[22].mxu0  ;;  %2945 = vmatpush3.bf16.msra.mxu1 %v3374_v19  ;;  %v1649_v38 = vmax.f32 %v1637_v32, 0.0  ;;  %2999 = vmatpush3.bf16.msra.mxu0 %v3397_v25  ;;  %v3403_v32 = vld [vmem:[#allocation17 + $0x28] sm:$0xff]  }
 0x4aa   :  { %v1650_v35 = vmax.f32 %v1639_v33, 0.0  ;;  %v1641_v36 = vpop.f32.mrb[23].mxu0  ;;  %2946 = vmatprep.subr.bf16.mxu1 %v3375_v30 }
 0x4ab   :  { %v1651_v39 = vmax.f32 %v1641_v36, 0.0 }
 0x4ac   :  { %v1654_v40 = vpack.c.bf16 %v1650_v35, %v1648_v34 }
 0x4ad   :  { %v1655_v41 = vpack.c.bf16 %v1651_v39, %v1649_v38  ;;  %2947 = vmatpush3.bf16.msra.mxu1 %v3375_v30  ;;  %v3401_v30 = vld [vmem:[#allocation17 + $0x18] sm:$0xff]  }
 0x4ae   :  { %2948 = vmatprep.subr.bf16.mxu1 %v3376_v37 }
 0x4af   :  { %1824 = vmatprep.mubr.bf16.mxu1 %v1655_v41 }
 0x4b0   :  { %1825 = vmatmul.mubr.bf16.gmra.mrb[20].mxu1 %v1654_v40 }
 0x4b1   :  { %2949 = vmatpush3.bf16.msra.mxu1 %v3376_v37 }
 0x4b2   :  { %2950 = vmatprep.subr.bf16.mxu1 %v3377_v42 }
 0x4b5   :  { %2951 = vmatpush3.bf16.msra.mxu1 %v3377_v42 }
 0x4b6   :  { %2952 = vmatprep.subr.bf16.mxu1 %v3378_v43 }
 0x4b9   :  { %2953 = vmatpush3.bf16.msra.mxu1 %v3378_v43  ;;  %v3404_v43 = vld [vmem:[#allocation17 + $0x30] sm:$0xff]  }
 0x4ba   :  { %2954 = vmatprep.subr.bf16.mxu1 %v3379_v44 }
 0x4bd   :  { %2955 = vmatpush3.bf16.msra.mxu1 %v3379_v44  ;;  %v3405_v44 = vld [vmem:[#allocation17 + $0x38] sm:$0xff]  }
 0x4be   :  { %2956 = vmatprep.subr.bf16.mxu1 %v3380_v45 }
 0x4c1   :  { %2957 = vmatpush3.bf16.msra.mxu1 %v3380_v45  ;;  %v3406_v45 = vld [vmem:[#allocation19] sm:$0xff]  }
 0x4c2   :  { %2958 = vmatprep.subr.bf16.mxu1 %v3381_v46  ;;  %3024 = vmatprep.subr.bf16.mxu0 %v3406_v45 }
 0x4c5   :  { %2959 = vmatpush3.bf16.msra.mxu1 %v3381_v46  ;;  %v3407_v46 = vld [vmem:[#allocation19 + $0x8] sm:$0xff]  }
 0x4c6   :  { %2964 = vmatprep.subr.bf16.mxu1 %v3382_v47 }
 0x57b   :  { %v2872_v48 = vpop.f32.mrb[16].mxu1 }
 0x57c   :  { %v2873_v49 = vpop.f32.mrb[17].mxu1 }
 0x57d   :  { %v2874_v50 = vadd.f32 %v2873_v49, %v2872_v48  ;;  %v2875_v51 = vpop.f32.mrb[18].mxu1  ;;  %v3409_v48 = vld [vmem:[#allocation19 + $0x18] sm:$0xff]   ;;  %v3410_v49 = vld [vmem:[#allocation19 + $0x20] sm:$0xff]  }
 0x57e   :  { %v2876_v52 = vpop.f32.mrb[19].mxu1 }
 0x57f   :  { %v2877_v53 = vadd.f32 %v2876_v52, %v2875_v51  ;;  %v1833_v54 = vmax.f32 %v2874_v50, 0.0  ;;  %v3411_v50 = vld [vmem:[#allocation19 + $0x28] sm:$0xff]  }
 0x581   :  { %v1834_v55 = vmax.f32 %v2877_v53, 0.0 }
 0x583   :  { %v1837_v56 = vpack.c.bf16 %v1834_v55, %v1833_v54  ;;  %v2878_v57 = vpop.f32.mrb[20].mxu1 }
 0x584   :  { %v2879_v58 = vpop.f32.mrb[21].mxu1 }
 0x585   :  { %v2880_v59 = vadd.f32 %v2879_v58, %v2878_v57  ;;  %v2881_v60 = vpop.f32.mrb[22].mxu1  ;;  %2960 = vmatprep.mubr.bf16.mxu1 %v1837_v56 }
 0x586   :  { %v2882_v61 = vpop.f32.mrb[23].mxu1 }
 0x587   :  { %v2883_v62 = vadd.f32 %v2882_v61, %v2881_v60  ;;  %v1835_v63 = vmax.f32 %v2880_v59, 0.0  ;;  %v3412_v61 = vld [vmem:[#allocation19 + $0x30] sm:$0xff]  }
 0x589   :  { %v1836_v0 = vmax.f32 %v2883_v62, 0.0  ;;  %v3413_v62 = vld [vmem:[#allocation19 + $0x38] sm:$0xff]  }
 0x58b   :  { %v1838_v1 = vpack.c.bf16 %v1836_v0, %v1835_v63  ;;  %v3414_v63 = vld [vmem:[#allocation20] sm:$0xff]   ;;  %v3415_v0 = vld [vmem:[#allocation20 + $0x8] sm:$0xff]  }
 0x58d   :  { %2961 = vmatmul.mubr.bf16.vlgmr.msra.gmra.mrb[24].mxu1 %v1838_v1  ;;  %v3416_v1 = vld [vmem:[#allocation20 + $0x10] sm:$0xff]  }
 0x58e   :  { %2965 = vmatpush3.bf16.msra.mxu1 %v3382_v47  ;;  %v3408_v47 = vld [vmem:[#allocation19 + $0x10] sm:$0xff]  }
 0x58f   :  { %2966 = vmatprep.subr.bf16.mxu1 %v3383_v2 }
 0x592   :  { %2967 = vmatpush3.bf16.msra.mxu1 %v3383_v2  ;;  %v3417_v2 = vld [vmem:[#allocation20 + $0x18] sm:$0xff]  }
 0x593   :  { %2968 = vmatprep.subr.bf16.mxu1 %v3384_v3 }
 0x596   :  { %2969 = vmatpush3.bf16.msra.mxu1 %v3384_v3  ;;  %v3418_v3 = vld [vmem:[#allocation20 + $0x20] sm:$0xff]  }
 0x597   :  { %2970 = vmatprep.subr.bf16.mxu1 %v3385_v4 }
 0x59a   :  { %2971 = vmatpush3.bf16.msra.mxu1 %v3385_v4  ;;  %v3419_v4 = vld [vmem:[#allocation20 + $0x28] sm:$0xff]  }
 0x59b   :  { %2972 = vmatprep.subr.bf16.mxu1 %v3386_v5 }
 0x59e   :  { %2973 = vmatpush3.bf16.msra.mxu1 %v3386_v5 }
 0x59f   :  { %2974 = vmatprep.subr.bf16.mxu1 %v3387_v6 }
 0x5a2   :  { %2975 = vmatpush3.bf16.msra.mxu1 %v3387_v6 }
 0x5a3   :  { %2976 = vmatprep.subr.bf16.mxu1 %v3388_v7 }
 0x5a6   :  { %2977 = vmatpush3.bf16.msra.mxu1 %v3388_v7 }
 0x5a7   :  { %2978 = vmatprep.subr.bf16.mxu1 %v3389_v8 }
 0x5aa   :  { %2979 = vmatpush3.bf16.msra.mxu1 %v3389_v8 }
 0x5ab   :  { %3004 = vmatprep.subr.bf16.mxu1 %v3398_v27 }
 0x660   :  { %v2962_v15 = vpop.f32.mrb[24].mxu1 }
 0x661   :  { %v1937_v16 = vpop.f32.mrb[25].mxu1  ;;  %v1954_v18 = vmax.f32 %v2962_v15, 0.0  ;;  %v3420_v15 = vld [vmem:[#allocation20 + $0x30] sm:$0xff]  }
 0x662   :  { %v2963_v17 = vpop.f32.mrb[26].mxu1  ;;  %v1952_v21 = vmax.f32 %v1937_v16, 0.0  ;;  %v3421_v16 = vld [vmem:[#allocation20 + $0x38] sm:$0xff]  }
 0x663   :  { %v1955_v19 = vmax.f32 %v2963_v17, 0.0  ;;  %v1940_v20 = vpop.f32.mrb[27].mxu1 }
 0x664   :  { %v1953_v22 = vmax.f32 %v1940_v20, 0.0 }
 0x665   :  { %v1957_v23 = vpack.c.bf16 %v1955_v19, %v1954_v18 }
 0x666   :  { %v1956_v24 = vpack.c.bf16 %v1953_v22, %v1952_v21 }
 0x668   :  { %2980 = vmatprep.mubr.bf16.mxu1 %v1956_v24 }
 0x669   :  { %2981 = vmatmul.mubr.bf16.vlgmr.msra.gmra.mrb[28].mxu1 %v1957_v23 }
 0x66a   :  { %3005 = vmatpush3.bf16.msra.mxu1 %v3398_v27 }
 0x66b   :  { %3006 = vmatprep.subr.bf16.mxu1 %v3399_v28 }
 0x66e   :  { %3007 = vmatpush3.bf16.msra.mxu1 %v3399_v28 }
 0x66f   :  { %3008 = vmatprep.subr.bf16.mxu1 %v3400_v29 }
 0x672   :  { %3009 = vmatpush3.bf16.msra.mxu1 %v3400_v29 }
 0x673   :  { %3010 = vmatprep.subr.bf16.mxu1 %v3401_v30 }
 0x676   :  { %3011 = vmatpush3.bf16.msra.mxu1 %v3401_v30 }
 0x677   :  { %3012 = vmatprep.subr.bf16.mxu1 %v3402_v31 }
 0x67a   :  { %3013 = vmatpush3.bf16.msra.mxu1 %v3402_v31 }
 0x67b   :  { %3014 = vmatprep.subr.bf16.mxu1 %v3403_v32 }
 0x67e   :  { %3015 = vmatpush3.bf16.msra.mxu1 %v3403_v32 }
 0x67f   :  { %3016 = vmatprep.subr.bf16.mxu1 %v3404_v43 }
 0x682   :  { %3017 = vmatpush3.bf16.msra.mxu1 %v3404_v43 }
 0x683   :  { %3018 = vmatprep.subr.bf16.mxu1 %v3405_v44 }
 0x686   :  { %3019 = vmatpush3.bf16.msra.mxu1 %v3405_v44 }
 0x687   :  { %3044 = vmatprep.subr.bf16.mxu1 %v3414_v63 }
 0x73c   :  { %v2982_v33 = vpop.f32.mrb[28].mxu1 }
 0x73d   :  { %v2056_v34 = vpop.f32.mrb[29].mxu1  ;;  %v2073_v36 = vmax.f32 %v2982_v33, 0.0 }
 0x73e   :  { %v2983_v35 = vpop.f32.mrb[30].mxu1  ;;  %v2071_v39 = vmax.f32 %v2056_v34, 0.0 }
 0x73f   :  { %v2074_v37 = vmax.f32 %v2983_v35, 0.0  ;;  %v2059_v38 = vpop.f32.mrb[31].mxu1 }
 0x740   :  { %v2072_v40 = vmax.f32 %v2059_v38, 0.0 }
 0x741   :  { %v2076_v41 = vpack.c.bf16 %v2074_v37, %v2073_v36 }
 0x742   :  { %v2075_v42 = vpack.c.bf16 %v2072_v40, %v2071_v39 }
 0x744   :  { %3000 = vmatprep.mubr.bf16.mxu0 %v2075_v42 }
 0x745   :  { %3001 = vmatmul.mubr.bf16.vlgmr.msra.gmra.mrb[24].mxu0 %v2076_v41 }
 0x746   :  { %3025 = vmatpush3.bf16.msra.mxu0 %v3406_v45 }
 0x747   :  { %3026 = vmatprep.subr.bf16.mxu0 %v3407_v46 }
 0x74a   :  { %3027 = vmatpush3.bf16.msra.mxu0 %v3407_v46 }
 0x74b   :  { %3028 = vmatprep.subr.bf16.mxu0 %v3408_v47 }
 0x74e   :  { %3029 = vmatpush3.bf16.msra.mxu0 %v3408_v47 }
 0x74f   :  { %3030 = vmatprep.subr.bf16.mxu0 %v3409_v48 }
 0x752   :  { %3031 = vmatpush3.bf16.msra.mxu0 %v3409_v48 }
 0x753   :  { %3032 = vmatprep.subr.bf16.mxu0 %v3410_v49 }
 0x756   :  { %3033 = vmatpush3.bf16.msra.mxu0 %v3410_v49 }
 0x757   :  { %3034 = vmatprep.subr.bf16.mxu0 %v3411_v50 }
 0x75a   :  { %3035 = vmatpush3.bf16.msra.mxu0 %v3411_v50 }
 0x75b   :  { %3036 = vmatprep.subr.bf16.mxu0 %v3412_v61 }
 0x75e   :  { %3037 = vmatpush3.bf16.msra.mxu0 %v3412_v61 }
 0x75f   :  { %3038 = vmatprep.subr.bf16.mxu0 %v3413_v62 }
 0x762   :  { %3039 = vmatpush3.bf16.msra.mxu0 %v3413_v62 }
 0x818   :  { %v3002_v51 = vpop.f32.mrb[24].mxu0 }
 0x819   :  { %v2175_v52 = vpop.f32.mrb[25].mxu0  ;;  %v2192_v54 = vmax.f32 %v3002_v51, 0.0 }
 0x81a   :  { %v3003_v53 = vpop.f32.mrb[26].mxu0  ;;  %v2190_v57 = vmax.f32 %v2175_v52, 0.0 }
 0x81b   :  { %v2193_v55 = vmax.f32 %v3003_v53, 0.0  ;;  %v2178_v56 = vpop.f32.mrb[27].mxu0 }
 0x81c   :  { %v2191_v58 = vmax.f32 %v2178_v56, 0.0 }
 0x81d   :  { %v2195_v59 = vpack.c.bf16 %v2193_v55, %v2192_v54 }
 0x81e   :  { %v2194_v60 = vpack.c.bf16 %v2191_v58, %v2190_v57 }
 0x820   :  { %3020 = vmatprep.mubr.bf16.mxu1 %v2194_v60 }
 0x821   :  { %3021 = vmatmul.mubr.bf16.vlgmr.msra.gmra.mrb[32].mxu1 %v2195_v59 }
 0x822   :  { %3045 = vmatpush3.bf16.msra.mxu1 %v3414_v63 }
 0x823   :  { %3046 = vmatprep.subr.bf16.mxu1 %v3415_v0 }
 0x826   :  { %3047 = vmatpush3.bf16.msra.mxu1 %v3415_v0 }
 0x827   :  { %3048 = vmatprep.subr.bf16.mxu1 %v3416_v1 }
 0x82a   :  { %3049 = vmatpush3.bf16.msra.mxu1 %v3416_v1 }
 0x82b   :  { %3050 = vmatprep.subr.bf16.mxu1 %v3417_v2 }
 0x82e   :  { %3051 = vmatpush3.bf16.msra.mxu1 %v3417_v2 }
 0x82f   :  { %3052 = vmatprep.subr.bf16.mxu1 %v3418_v3 }
 0x832   :  { %3053 = vmatpush3.bf16.msra.mxu1 %v3418_v3 }
 0x833   :  { %3054 = vmatprep.subr.bf16.mxu1 %v3419_v4 }
 0x836   :  { %3055 = vmatpush3.bf16.msra.mxu1 %v3419_v4 }
 0x837   :  { %3056 = vmatprep.subr.bf16.mxu1 %v3420_v15 }
 0x83a   :  { %3057 = vmatpush3.bf16.msra.mxu1 %v3420_v15 }
 0x83b   :  { %3058 = vmatprep.subr.bf16.mxu1 %v3421_v16 }
 0x83e   :  { %3059 = vmatpush3.bf16.msra.mxu1 %v3421_v16 }
 0x8f4   :  { %v3022_v5 = vpop.f32.mrb[32].mxu1 }
 0x8f5   :  { %v2294_v6 = vpop.f32.mrb[33].mxu1  ;;  %v2311_v8 = vmax.f32 %v3022_v5, 0.0 }
 0x8f6   :  { %v3023_v7 = vpop.f32.mrb[34].mxu1  ;;  %v2309_v11 = vmax.f32 %v2294_v6, 0.0 }
 0x8f7   :  { %v2312_v9 = vmax.f32 %v3023_v7, 0.0  ;;  %v2297_v10 = vpop.f32.mrb[35].mxu1 }
 0x8f8   :  { %v2310_v12 = vmax.f32 %v2297_v10, 0.0 }
 0x8f9   :  { %v2314_v13 = vpack.c.bf16 %v2312_v9, %v2311_v8 }
 0x8fa   :  { %v2313_v14 = vpack.c.bf16 %v2310_v12, %v2309_v11 }
 0x8fc   :  { %3040 = vmatprep.mubr.bf16.mxu0 %v2313_v14 }
 0x8fd   :  { %3041 = vmatmul.mubr.bf16.vlgmr.msra.gmra.mrb[28].mxu0 %v2314_v13 }
 0x9d0   :  { %v3042_v17 = vpop.f32.mrb[28].mxu0 }
 0x9d1   :  { %v2413_v18 = vpop.f32.mrb[29].mxu0  ;;  %v2430_v20 = vmax.f32 %v3042_v17, 0.0 }
 0x9d2   :  { %v3043_v19 = vpop.f32.mrb[30].mxu0  ;;  %v2428_v23 = vmax.f32 %v2413_v18, 0.0 }
 0x9d3   :  { %v2431_v21 = vmax.f32 %v3043_v19, 0.0  ;;  %v2416_v22 = vpop.f32.mrb[31].mxu0 }
 0x9d4   :  { %v2429_v24 = vmax.f32 %v2416_v22, 0.0 }
 0x9d5   :  { %v2433_v26 = vpack.c.bf16 %v2431_v21, %v2430_v20 }
 0x9d6   :  { %v2432_v25 = vpack.c.bf16 %v2429_v24, %v2428_v23 }
 0x9d8   :  { %3060 = vmatprep.mubr.bf16.mxu1 %v2432_v25 }
 0x9d9   :  { %3061 = vmatmul.mubr.bf16.vlgmr.msra.gmra.mrb[36].mxu1 %v2433_v26 }
 0xaac   :  { %v3062_v27 = vpop.f32.mrb[36].mxu1 }
 0xaad   :  { %2551 = vmax.xlane.f32.xlu1 %v3062_v27  ;;  %v2532_v28 = vpop.f32.mrb[37].mxu1 }
 0xaae   :  { %2547 = vmax.xlane.f32.xlu0 %v2532_v28  ;;  %v3063_v29 = vpop.f32.mrb[38].mxu1 }
 0xaaf   :  { %v2535_v30 = vpop.f32.mrb[39].mxu1 }
 0xab1   :  { %2553 = vmax.xlane.f32.xlu1 %v3063_v29 }
 0xab2   :  { %2549 = vmax.xlane.f32.xlu0 %v2535_v30 }
 0xb3a   :  { %v2552_v31 = vpop.xlane.xlu1 %2551 }
 0xb3b   :  { %v2557_v32 = vsub.f32 %v3062_v27, %v2552_v31  ;;  %v2548_v33 = vpop.xlane.xlu0 %2547 }
 0xb3c   :  { %v2555_v34 = vsub.f32 %v2532_v28, %v2548_v33 }
 0xb3d   :  { %v2563_v37 = vmul.f32 1.442695, %v2557_v32 }
 0xb3e   :  { %v2559_v35 = vmul.f32 1.442695, %v2555_v34  ;;  %v2554_v36 = vpop.xlane.xlu1 %2553 }
 0xb3f   :  { %v2550_v38 = vpop.xlane.xlu0 %2549  ;;  %v2558_v39 = vsub.f32 %v3063_v29, %v2554_v36 }
 0xb40   :  { %3422 = vpow2.f32 %v2559_v35  ;;  %v2556_v40 = vsub.f32 %v2535_v30, %v2550_v38 }
 0xb41   :  { %3424 = vpow2.f32 %v2563_v37  ;;  %v2565_v42 = vmul.f32 1.442695, %v2558_v39 }
 0xb42   :  { %v2561_v41 = vmul.f32 1.442695, %v2556_v40 }
 0xb44   :  { %3426 = vpow2.f32 %v2561_v41 }
 0xb45   :  { %3428 = vpow2.f32 %v2565_v42 }
 0xb4a   :  { %v3423_v43 = vpop.eup %3422 }
 0xb4b   :  { %2567 = vadd.xlane.f32.xlu0 %v3423_v43  ;;  %v3425_v44 = vpop.eup %3424 }
 0xb4e   :  { %v3427_v45 = vpop.eup %3426 }
 0xb4f   :  { %2571 = vadd.xlane.f32.xlu0 %v3425_v44  ;;  %2569 = vadd.xlane.f32.xlu1 %v3427_v45  ;;  %v3429_v46 = vpop.eup %3428 }
 0xb53   :  { %2573 = vadd.xlane.f32.xlu1 %v3429_v46 }
 0xbd8   :  { %v2568_v47 = vpop.xlane.xlu0 %2567 }
 0xbd9   :  { %3430 = vlog2.f32 %v2568_v47 }
 0xbdc   :  { %v2570_v48 = vpop.xlane.xlu1 %2569  ;;  %v2572_v49 = vpop.xlane.xlu0 %2571 }
 0xbdd   :  { %3432 = vlog2.f32 %v2570_v48 }
 0xbde   :  { %3434 = vlog2.f32 %v2572_v49 }
 0xbe0   :  { %v2574_v50 = vpop.xlane.xlu1 %2573 }
 0xbe1   :  { %3436 = vlog2.f32 %v2574_v50 }
 0xbe3   :  { %v3431_v51 = vpop.eup %3430 }
 0xbe4   :  { %v2576_v52 = vmul.f32 0.6931472, %v3431_v51 }
 0xbe6   :  { %v2583_v53 = vsub.f32 %v2555_v34, %v2576_v52 }
 0xbe7   :  { %v3433_v54 = vpop.eup %3432 }
 0xbe8   :  { %v3435_v55 = vpop.eup %3434  ;;  %2587 = vst [vmem:[#allocation22] sm:$0xff] %v2583_v53  ;;  %v2578_v56 = vmul.f32 0.6931472, %v3433_v54 }
 0xbe9   :  { %v2580_v57 = vmul.f32 0.6931472, %v3435_v55 }
 0xbea   :  { %v2584_v58 = vsub.f32 %v2556_v40, %v2578_v56 }
 0xbeb   :  { %v3437_v59 = vpop.eup %3436  ;;  %v2585_v60 = vsub.f32 %v2557_v32, %v2580_v57 }
 0xbec   :  { %2588 = vst [vmem:[#allocation22 + $0x8] sm:$0xff] %v2584_v58  ;;  %v2582_v61 = vmul.f32 0.6931472, %v3437_v59 }
 0xbed   :  { %2589 = vst [vmem:[#allocation22 + $0x10] sm:$0xff] %v2585_v60 }
 0xbee   :  { %v2586_v62 = vsub.f32 %v2558_v39, %v2582_v61 }
 0xbf0   :  { %2590 = vst [vmem:[#allocation22 + $0x18] sm:$0xff] %v2586_v62 }
 0xbf1   :  { %3713 = shalt.err (!%p3710_p2)
}
 0xbf2   :  { %s3714_s17 = scalar_lea.hbm %s4070_s12, 512 }
 0xbf3   :  { %p3715_p3 = scmp.ne.s32.totalorder %s4070_s12, %s3714_s17  ;;  %p3718_p4 = scmp.lt.u32.totalorder %s3714_s17, %s4070_s12 }
 0xbf5   :  { %p3720_p5 = pnand %p3718_p4, %p3715_p3 }
 0xbf7   :  { %3723 = shalt.err (!%p3720_p5)
}
 0xbf8   :  { %2602 = dma.vmem_to_hbm [thread:$0]  %s2597_s18, 512, %s4070_s12, [#allocation4], %s3741_s13, %s3741_s13, %s3742_s14  }
 0xbf9   :  { %3738 = dma.done.wait [#allocation4], 512  }
 0xbfa   :  { %3739 = vsyncadd [#allocation4], 4294966784 }
 0xbfb   :  { %2606 = vsyncpa [#allocation3], 1 }
 0xbfc   :  { %2607 = vsyncpa [#allocation6], 1 }
 0xbfd   :  { %2608 = vsyncpa [#allocation9], 1 }
 0xbfe   :  { %2609 = vsyncpa [#allocation12], 1 }
 0xbff   :  { %2610 = vsyncpa [#allocation15], 1 }
 0xc00   :  { %2611 = vsyncpa [#allocation18], 1 }
 0xc01   :  { %2612 = vsyncpa [#allocation21], 1 }
 0xc02   :  { %2613 = vsyncpa [#allocation4], 1 }

// kernel: tpu_custom_call.1
= control target key start
LH: loop header
LB: loop body
LE: loop exit
PB: predicated region body
PF: predicated region fallthrough
CT: control target
= control target key end

     0   :  { %17 = vsyncpa [#allocation3], 0  ;;  %s4058_s0 = inlined_call_operand.hbm [shape: bf16[32,128], index: 0, kind: input, shape index: {}]   ;;  %s4059_s1 = inlined_call_operand.hbm [shape: bf16[128,256], index: 1, kind: input, shape index: {}]   ;;  %s4060_s2 = inlined_call_operand.hbm [shape: bf16[256,256], index: 2, kind: input, shape index: {}]   ;;  %s4061_s3 = inlined_call_operand.hbm [shape: bf16[256,512], index: 3, kind: input, shape index: {}]   ;;  %s4062_s4 = inlined_call_operand.hbm [shape: bf16[512,256], index: 4, kind: input, shape index: {}]   ;;  %s4063_s5 = inlined_call_operand.hbm [shape: bf16[256,128], index: 5, kind: input, shape index: {}]   ;;  %s4064_s6 = inlined_call_operand.hbm [shape: bf16[128,128], index: 6, kind: input, shape index: {}]   ;;  %s4065_s7 = inlined_call_operand.hbm [shape: bf16[128,128], index: 7, kind: input, shape index: {}]   ;;  %s4066_s8 = inlined_call_operand.hbm [shape: bf16[128,128], index: 8, kind: input, shape index: {}]   ;;  %s4067_s9 = inlined_call_operand.hbm [shape: bf16[128,128], index: 9, kind: input, shape index: {}]   ;;  %s4068_s10 = inlined_call_operand.hbm [shape: bf16[128,128], index: 10, kind: input, shape index: {}]   ;;  %s4069_s11 = inlined_call_operand.hbm [shape: bf16[128,128], index: 11, kind: input, shape index: {}]   ;;  %s4070_s12 = inlined_call_operand.hbm [shape: f32[32,128], index: 12, kind: output, shape index: {}]  }
   0x1   :  { %18 = vsyncpa [#allocation6], 0 }
   0x2   :  { %19 = vsyncpa [#allocation9], 0 }
   0x3   :  { %20 = vsyncpa [#allocation12], 0 }
   0x4   :  { %21 = vsyncpa [#allocation15], 0 }
   0x5   :  { %22 = vsyncpa [#allocation18], 0 }
   0x6   :  { %23 = vsyncpa [#allocation21], 0 }
   0x7   :  { %24 = vsyncpa [#allocation4], 0  ;;  %s3740_s21 = smov [#allocation5]   ;;  %s3438_s25 = scalar_lea.hbm %s4059_s1, 2048 }
   0x8   :  { %s42_s22 = sshll.u32 %s3740_s21, 4  ;;  %p3439_p0 = scmp.ne.s32.totalorder %s4059_s1, %s3438_s25  ;;  %s43_s22 = int_to_ptr.vmem [resolvable:$true] %s42_s22 }
   0x9   :  { %p3442_p1 = scmp.lt.u32.totalorder %s3438_s25, %s4059_s1 }
   0xb   :  { %p3444_p2 = pnand %p3442_p1, %p3439_p0 }
   0xd   :  { %3447 = shalt.err (!%p3444_p2)
}
   0xe   :  { %s3448_s30 = scalar_lea.vmem %s43_s22, 2048  ;;  %p3453_p4 = scmp.lt.s32.totalorder %s43_s22, %s43_s22 }
   0xf   :  { %p3449_p3 = scmp.ne.s32.totalorder %s43_s22, %s3448_s30  ;;  %p3454_p5 = scmp.lt.s32.totalorder %s3448_s30, %s3448_s30 }
  0x11   :  { %p3455_p6 = por %p3454_p5, %p3453_p4 }
  0x13   :  { %p3456_p7 = pnand %p3455_p6, %p3449_p3 }
  0x15   :  { %3459 = shalt.err (!%p3456_p7)
}
  0x16   :  { %s3741_s13 = smov 128   ;;  %s3742_s14 = smov 8  }
  0x17   :  { %48 = dma.hbm_to_vmem [thread:$0]  %s4059_s1, 2048, %s43_s22, [#allocation6], %s3741_s13, %s3741_s13, %s3742_s14  }
  0x18   :  { %s3743_s17 = smov [#allocation8]   ;;  %s3460_s21 = scalar_lea.hbm %s4061_s3, 8192 }
  0x19   :  { %s66_s18 = sshll.u32 %s3743_s17, 4  ;;  %p3461_p8 = scmp.ne.s32.totalorder %s4061_s3, %s3460_s21  ;;  %s67_s18 = int_to_ptr.vmem [resolvable:$true] %s66_s18 }
  0x1a   :  { %p3464_p9 = scmp.lt.u32.totalorder %s3460_s21, %s4061_s3 }
  0x1c   :  { %p3466_p10 = pnand %p3464_p9, %p3461_p8 }
  0x1e   :  { %3469 = shalt.err (!%p3466_p10)
}
  0x1f   :  { %s3470_s27 = scalar_lea.vmem %s67_s18, 8192  ;;  %p3475_p12 = scmp.lt.s32.totalorder %s67_s18, %s67_s18 }
  0x20   :  { %p3471_p11 = scmp.ne.s32.totalorder %s67_s18, %s3470_s27  ;;  %p3476_p13 = scmp.lt.s32.totalorder %s3470_s27, %s3470_s27 }
  0x22   :  { %p3477_p0 = por %p3476_p13, %p3475_p12 }
  0x24   :  { %p3478_p1 = pnand %p3477_p0, %p3471_p11 }
  0x26   :  { %3481 = shalt.err (!%p3478_p1)
}
  0x27   :  { %s3744_s1 = smov 256   ;;  %s3745_s22 = smov 16  }
  0x28   :  { %72 = dma.hbm_to_vmem [thread:$0]  %s4061_s3, 8192, %s67_s18, [#allocation9], %s3744_s1, %s3744_s1, %s3745_s22  }
  0x29   :  { %s3746_s30 = smov [#allocation11]   ;;  %s3747_s16 = smov [#allocation14]  }
  0x2a   :  { %s90_s15 = sshll.u32 %s3746_s30, 4  ;;  %s114_s17 = sshll.u32 %s3747_s16, 4  ;;  %s91_s15 = int_to_ptr.vmem [resolvable:$true] %s90_s15  ;;  %s3852_s17 = int_to_ptr.vmem [resolvable:$true] %s114_s17 }
  0x2b   :  { %s3482_s21 = scalar_lea.hbm %s4063_s5, 2048 }
  0x2c   :  { %p3483_p2 = scmp.ne.s32.totalorder %s4063_s5, %s3482_s21  ;;  %p3486_p3 = scmp.lt.u32.totalorder %s3482_s21, %s4063_s5 }
  0x2e   :  { %p3488_p4 = pnand %p3486_p3, %p3483_p2 }
  0x30   :  { %3491 = shalt.err (!%p3488_p4)
}
  0x31   :  { %s3492_s3 = scalar_lea.vmem %s91_s15, 2048  ;;  %p3497_p6 = scmp.lt.s32.totalorder %s91_s15, %s91_s15 }
  0x32   :  { %p3493_p5 = scmp.ne.s32.totalorder %s91_s15, %s3492_s3  ;;  %p3498_p7 = scmp.lt.s32.totalorder %s3492_s3, %s3492_s3 }
  0x34   :  { %p3499_p8 = por %p3498_p7, %p3497_p6 }
  0x36   :  { %p3500_p9 = pnand %p3499_p8, %p3493_p5 }
  0x38   :  { %3503 = shalt.err (!%p3500_p9)
}
  0x39   :  { %s3748_s18 = smov 64   ;;  %s3749_s27 = smov 4  }
  0x3a   :  { %96 = dma.hbm_to_vmem [thread:$0]  %s4063_s5, 2048, %s91_s15, [#allocation12], %s3748_s18, %s3748_s18, %s3749_s27  }
  0x3b   :  { %s3504_s30 = scalar_lea.hbm %s4065_s7, 1024 }
  0x3c   :  { %p3505_p10 = scmp.ne.s32.totalorder %s4065_s7, %s3504_s30  ;;  %p3508_p11 = scmp.lt.u32.totalorder %s3504_s30, %s4065_s7 }
  0x3e   :  { %p3510_p12 = pnand %p3508_p11, %p3505_p10 }
  0x40   :  { %3513 = shalt.err (!%p3510_p12)
}
  0x41   :  { %s3514_s23 = scalar_lea.vmem %s3852_s17, 1024  ;;  %p3519_p0 = scmp.lt.s32.totalorder %s3852_s17, %s3852_s17 }
  0x42   :  { %p3515_p13 = scmp.ne.s32.totalorder %s3852_s17, %s3514_s23  ;;  %p3520_p1 = scmp.lt.s32.totalorder %s3514_s23, %s3514_s23 }
  0x44   :  { %p3521_p2 = por %p3520_p1, %p3519_p0 }
  0x46   :  { %p3522_p3 = pnand %p3521_p2, %p3515_p13 }
  0x48   :  { %3525 = shalt.err (!%p3522_p3)
}
  0x49   :  { %120 = dma.hbm_to_vmem [thread:$0]  %s4065_s7, 1024, %s3852_s17, [#allocation15], %s3748_s18, %s3748_s18, %s3749_s27  }
  0x4a   :  { %s3750_s24 = smov [#allocation17]   ;;  %s3751_s26 = smov [#allocation2]  }
  0x4b   :  { %s138_s25 = sshll.u32 %s3750_s24, 4  ;;  %s30_s3 = sshll.u32 %s3751_s26, 4  ;;  %s139_s25 = int_to_ptr.vmem [resolvable:$true] %s138_s25  ;;  %s3889_s3 = int_to_ptr.vmem [resolvable:$true] %s30_s3 }
  0x4c   :  { %s3526_s28 = scalar_lea.hbm %s4067_s9, 1024 }
  0x4d   :  { %p3527_p4 = scmp.ne.s32.totalorder %s4067_s9, %s3526_s28  ;;  %p3530_p5 = scmp.lt.u32.totalorder %s3526_s28, %s4067_s9 }
  0x4f   :  { %p3532_p6 = pnand %p3530_p5, %p3527_p4 }
  0x51   :  { %3535 = shalt.err (!%p3532_p6)
}
  0x52   :  { %s3536_s7 = scalar_lea.vmem %s139_s25, 1024  ;;  %p3541_p8 = scmp.lt.s32.totalorder %s139_s25, %s139_s25 }
  0x53   :  { %p3537_p7 = scmp.ne.s32.totalorder %s139_s25, %s3536_s7  ;;  %p3542_p9 = scmp.lt.s32.totalorder %s3536_s7, %s3536_s7 }
  0x55   :  { %p3543_p10 = por %p3542_p9, %p3541_p8 }
  0x57   :  { %p3544_p11 = pnand %p3543_p10, %p3537_p7 }
  0x59   :  { %3547 = shalt.err (!%p3544_p11)
}
  0x5a   :  { %144 = dma.hbm_to_vmem [thread:$0]  %s4067_s9, 1024, %s139_s25, [#allocation18], %s3748_s18, %s3748_s18, %s3749_s27  }
  0x5b   :  { %s3548_s5 = scalar_lea.hbm %s4058_s0, 256 }
  0x5c   :  { %p3549_p12 = scmp.ne.s32.totalorder %s4058_s0, %s3548_s5  ;;  %p3552_p13 = scmp.lt.u32.totalorder %s3548_s5, %s4058_s0 }
  0x5e   :  { %p3554_p0 = pnand %p3552_p13, %p3549_p12 }
  0x60   :  { %3557 = shalt.err (!%p3554_p0)
}
  0x61   :  { %s3558_s22 = scalar_lea.vmem %s3889_s3, 256  ;;  %p3563_p2 = scmp.lt.s32.totalorder %s3889_s3, %s3889_s3 }
  0x62   :  { %p3559_p1 = scmp.ne.s32.totalorder %s3889_s3, %s3558_s22  ;;  %p3564_p3 = scmp.lt.s32.totalorder %s3558_s22, %s3558_s22 }
  0x64   :  { %p3565_p4 = por %p3564_p3, %p3563_p2 }
  0x66   :  { %p3566_p5 = pnand %p3565_p4, %p3559_p1 }
  0x68   :  { %3569 = shalt.err (!%p3566_p5)
}
  0x69   :  { %36 = dma.hbm_to_vmem [thread:$0]  %s4058_s0, 256, %s3889_s3, [#allocation3], %s3748_s18, %s3748_s18, %s3749_s27  }
  0x6a   :  { %s3752_s28 = smov [#allocation7]   ;;  %s3753_s30 = smov [#allocation10]  }
  0x6b   :  { %s54_s29 = sshll.u32 %s3752_s28, 4  ;;  %s78_s16 = sshll.u32 %s3753_s30, 4  ;;  %s55_s29 = int_to_ptr.vmem [resolvable:$true] %s54_s29  ;;  %s3926_s16 = int_to_ptr.vmem [resolvable:$true] %s78_s16 }
  0x6c   :  { %s3570_s17 = scalar_lea.hbm %s4060_s2, 4096 }
  0x6d   :  { %p3571_p6 = scmp.ne.s32.totalorder %s4060_s2, %s3570_s17  ;;  %p3574_p7 = scmp.lt.u32.totalorder %s3570_s17, %s4060_s2 }
  0x6f   :  { %p3576_p8 = pnand %p3574_p7, %p3571_p6 }
  0x71   :  { %3579 = shalt.err (!%p3576_p8)
}
  0x72   :  { %s3580_s0 = scalar_lea.vmem %s55_s29, 4096  ;;  %p3585_p10 = scmp.lt.s32.totalorder %s55_s29, %s55_s29 }
  0x73   :  { %p3581_p9 = scmp.ne.s32.totalorder %s55_s29, %s3580_s0  ;;  %p3586_p11 = scmp.lt.s32.totalorder %s3580_s0, %s3580_s0 }
  0x75   :  { %p3587_p12 = por %p3586_p11, %p3585_p10 }
  0x77   :  { %p3588_p13 = pnand %p3587_p12, %p3581_p9 }
  0x79   :  { %3591 = shalt.err (!%p3588_p13)
}
  0x7a   :  { %60 = dma.hbm_to_vmem [thread:$0]  %s4060_s2, 4096, %s55_s29, [#allocation6], %s3741_s13, %s3741_s13, %s3742_s14  }
  0x7b   :  { %s3592_s1 = scalar_lea.hbm %s4062_s4, 8192 }
  0x7c   :  { %p3593_p0 = scmp.ne.s32.totalorder %s4062_s4, %s3592_s1  ;;  %p3596_p1 = scmp.lt.u32.totalorder %s3592_s1, %s4062_s4 }
  0x7e   :  { %p3598_p2 = pnand %p3596_p1, %p3593_p0 }
  0x80   :  { %3601 = shalt.err (!%p3598_p2)
}
  0x81   :  { %s3602_s30 = scalar_lea.vmem %s3926_s16, 8192  ;;  %p3607_p4 = scmp.lt.s32.totalorder %s3926_s16, %s3926_s16 }
  0x82   :  { %p3603_p3 = scmp.ne.s32.totalorder %s3926_s16, %s3602_s30  ;;  %p3608_p5 = scmp.lt.s32.totalorder %s3602_s30, %s3602_s30 }
  0x84   :  { %p3609_p6 = por %p3608_p5, %p3607_p4 }
  0x86   :  { %p3610_p7 = pnand %p3609_p6, %p3603_p3 }
  0x88   :  { %3613 = shalt.err (!%p3610_p7)
}
  0x89   :  { %84 = dma.hbm_to_vmem [thread:$0]  %s4062_s4, 8192, %s3926_s16, [#allocation9], %s3741_s13, %s3741_s13, %s3742_s14  }
  0x8a   :  { %s3754_s19 = smov [#allocation13]   ;;  %s3755_s17 = smov [#allocation16]  }
  0x8b   :  { %s102_s7 = sshll.u32 %s3754_s19, 4  ;;  %s126_s20 = sshll.u32 %s3755_s17, 4  ;;  %s103_s7 = int_to_ptr.vmem [resolvable:$true] %s102_s7  ;;  %s3963_s20 = int_to_ptr.vmem [resolvable:$true] %s126_s20 }
  0x8c   :  { %s3614_s5 = scalar_lea.hbm %s4064_s6, 1024 }
  0x8d   :  { %p3615_p8 = scmp.ne.s32.totalorder %s4064_s6, %s3614_s5  ;;  %p3618_p9 = scmp.lt.u32.totalorder %s3614_s5, %s4064_s6 }
  0x8f   :  { %p3620_p10 = pnand %p3618_p9, %p3615_p8 }
  0x91   :  { %3623 = shalt.err (!%p3620_p10)
}
  0x92   :  { %s3624_s4 = scalar_lea.vmem %s103_s7, 1024  ;;  %p3629_p12 = scmp.lt.s32.totalorder %s103_s7, %s103_s7 }
  0x93   :  { %p3625_p11 = scmp.ne.s32.totalorder %s103_s7, %s3624_s4  ;;  %p3630_p13 = scmp.lt.s32.totalorder %s3624_s4, %s3624_s4 }
  0x95   :  { %p3631_p0 = por %p3630_p13, %p3629_p12 }
  0x97   :  { %p3632_p1 = pnand %p3631_p0, %p3625_p11 }
  0x99   :  { %3635 = shalt.err (!%p3632_p1)
}
  0x9a   :  { %108 = dma.hbm_to_vmem [thread:$0]  %s4064_s6, 1024, %s103_s7, [#allocation12], %s3748_s18, %s3748_s18, %s3749_s27  }
  0x9b   :  { %s3636_s9 = scalar_lea.hbm %s4066_s8, 1024 }
  0x9c   :  { %p3637_p2 = scmp.ne.s32.totalorder %s4066_s8, %s3636_s9  ;;  %p3640_p3 = scmp.lt.u32.totalorder %s3636_s9, %s4066_s8 }
  0x9e   :  { %p3642_p4 = pnand %p3640_p3, %p3637_p2 }
  0xa0   :  { %3645 = shalt.err (!%p3642_p4)
}
  0xa1   :  { %s3646_s29 = scalar_lea.vmem %s3963_s20, 1024  ;;  %p3651_p6 = scmp.lt.s32.totalorder %s3963_s20, %s3963_s20 }
  0xa2   :  { %p3647_p5 = scmp.ne.s32.totalorder %s3963_s20, %s3646_s29  ;;  %p3652_p7 = scmp.lt.s32.totalorder %s3646_s29, %s3646_s29 }
  0xa4   :  { %p3653_p8 = por %p3652_p7, %p3651_p6 }
  0xa6   :  { %p3654_p9 = pnand %p3653_p8, %p3647_p5 }
  0xa8   :  { %3657 = shalt.err (!%p3654_p9)
}
  0xa9   :  { %132 = dma.hbm_to_vmem [thread:$0]  %s4066_s8, 1024, %s3963_s20, [#allocation15], %s3748_s18, %s3748_s18, %s3749_s27  }
  0xaa   :  { %s3756_s7 = smov [#allocation19]   ;;  %s3757_s21 = smov [#allocation20]  }
  0xab   :  { %s150_s17 = sshll.u32 %s3756_s7, 4  ;;  %s162_s23 = sshll.u32 %s3757_s21, 4  ;;  %s151_s17 = int_to_ptr.vmem [resolvable:$true] %s150_s17  ;;  %s4000_s23 = int_to_ptr.vmem [resolvable:$true] %s162_s23 }
  0xac   :  { %s3658_s3 = scalar_lea.hbm %s4068_s10, 1024 }
  0xad   :  { %p3659_p10 = scmp.ne.s32.totalorder %s4068_s10, %s3658_s3  ;;  %p3662_p11 = scmp.lt.u32.totalorder %s3658_s3, %s4068_s10 }
  0xaf   :  { %p3664_p12 = pnand %p3662_p11, %p3659_p10 }
  0xb1   :  { %3667 = shalt.err (!%p3664_p12)
}
  0xb2   :  { %s3668_s8 = scalar_lea.vmem %s151_s17, 1024  ;;  %p3673_p0 = scmp.lt.s32.totalorder %s151_s17, %s151_s17 }
  0xb3   :  { %p3669_p13 = scmp.ne.s32.totalorder %s151_s17, %s3668_s8  ;;  %p3674_p1 = scmp.lt.s32.totalorder %s3668_s8, %s3668_s8 }
  0xb5   :  { %p3675_p2 = por %p3674_p1, %p3673_p0 }
  0xb7   :  { %p3676_p3 = pnand %p3675_p2, %p3669_p13 }
  0xb9   :  { %3679 = shalt.err (!%p3676_p3)
}
  0xba   :  { %156 = dma.hbm_to_vmem [thread:$0]  %s4068_s10, 1024, %s151_s17, [#allocation18], %s3748_s18, %s3748_s18, %s3749_s27  }
  0xbb   :  { %s3680_s9 = scalar_lea.hbm %s4069_s11, 1024 }
  0xbc   :  { %p3681_p4 = scmp.ne.s32.totalorder %s4069_s11, %s3680_s9  ;;  %p3684_p5 = scmp.lt.u32.totalorder %s3680_s9, %s4069_s11 }
  0xbe   :  { %p3686_p6 = pnand %p3684_p5, %p3681_p4 }
  0xc0   :  { %3689 = shalt.err (!%p3686_p6)
}
  0xc1   :  { %s3690_s29 = scalar_lea.vmem %s4000_s23, 1024  ;;  %p3695_p8 = scmp.lt.s32.totalorder %s4000_s23, %s4000_s23 }
  0xc2   :  { %p3691_p7 = scmp.ne.s32.totalorder %s4000_s23, %s3690_s29  ;;  %p3696_p9 = scmp.lt.s32.totalorder %s3690_s29, %s3690_s29 }
  0xc4   :  { %p3697_p10 = por %p3696_p9, %p3695_p8 }
  0xc6   :  { %p3698_p11 = pnand %p3697_p10, %p3691_p7 }
  0xc8   :  { %3701 = shalt.err (!%p3698_p11)
}
  0xc9   :  { %168 = dma.hbm_to_vmem [thread:$0]  %s4069_s11, 1024, %s4000_s23, [#allocation21], %s3748_s18, %s3748_s18, %s3749_s27  }
  0xca   :  { %3724 = dma.done.wait [#allocation3], 256  }
  0xcb   :  { %3725 = vsyncadd [#allocation3], 4294967040 }
  0xcc   :  { %3726 = dma.done.wait [#allocation6], 6144  }
  0xcd   :  { %3727 = vsyncadd [#allocation6], 4294961152 }
  0xce   :  { %3728 = dma.done.wait [#allocation9], 16384  }
  0xcf   :  { %3729 = vsyncadd [#allocation9], 4294950912 }
  0xd0   :  { %3730 = dma.done.wait [#allocation12], 3072  }
  0xd1   :  { %3731 = vsyncadd [#allocation12], 4294964224 }
  0xd2   :  { %3732 = dma.done.wait [#allocation15], 2048  }
  0xd3   :  { %3733 = vsyncadd [#allocation15], 4294965248 }
  0xd4   :  { %3734 = dma.done.wait [#allocation18], 2048  }
  0xd5   :  { %3735 = vsyncadd [#allocation18], 4294965248 }
  0xd6   :  { %3736 = dma.done.wait [#allocation21], 1024  }
  0xd7   :  { %3737 = vsyncadd [#allocation21], 4294966272  ;;  %v3758_v0 = vmov 0   ;;  %v3092_v1 = vld [vmem:[#allocation5 + $0x4] ss:$8 sps:$4 sm:$0xff]   ;;  %v3116_v27 = vld [vmem:[#allocation2] sm:$0xff]  }
  0xd8   :  { %350 = vmatprep.mubr.bf16.mxu0 %v3758_v0  ;;  %v3094_v2 = vld [vmem:[#allocation5] ss:$8 sps:$4 sm:$0xff]   ;;  %318 = vmatprep.subr.bf16.mxu0 %v3092_v1  ;;  %v3095_v3 = vld [vmem:[#allocation5 + $0x14] ss:$8 sps:$4 sm:$0xff]   ;;  %v3097_v4 = vld [vmem:[#allocation5 + $0x10] ss:$8 sps:$4 sm:$0xff]  }
  0xd9   :  { %319 = vmatpush1.bf16.msra.mxu0 %v3094_v2  ;;  %v3098_v5 = vld [vmem:[#allocation5 + $0x24] ss:$8 sps:$4 sm:$0xff]   ;;  %v3100_v6 = vld [vmem:[#allocation5 + $0x20] ss:$8 sps:$4 sm:$0xff]   ;;  %v3101_v7 = vld [vmem:[#allocation5 + $0x34] ss:$8 sps:$4 sm:$0xff]  }
  0xda   :  { %320 = vmatprep.subr.bf16.mxu0 %v3095_v3  ;;  %v3103_v8 = vld [vmem:[#allocation5 + $0x30] ss:$8 sps:$4 sm:$0xff]   ;;  %v3104_v9 = vld [vmem:[#allocation5 + $0x44] ss:$8 sps:$4 sm:$0xff]   ;;  %v3120_v11 = vld [vmem:[#allocation7] ss:$8 sps:$4 sm:$0xff]  }
  0xdb   :  { %v3118_v10 = vld [vmem:[#allocation7 + $0x4] ss:$8 sps:$4 sm:$0xff]   ;;  %v3121_v12 = vld [vmem:[#allocation7 + $0x14] ss:$8 sps:$4 sm:$0xff]   ;;  %v3106_v13 = vld [vmem:[#allocation5 + $0x40] ss:$8 sps:$4 sm:$0xff]  }
  0xdc   :  { %575 = vmatprep.subr.bf16.mxu1 %v3118_v10  ;;  %v3107_v14 = vld [vmem:[#allocation5 + $0x54] ss:$8 sps:$4 sm:$0xff]   ;;  %v3123_v15 = vld [vmem:[#allocation7 + $0x10] ss:$8 sps:$4 sm:$0xff]   ;;  %v3124_v16 = vld [vmem:[#allocation7 + $0x24] ss:$8 sps:$4 sm:$0xff]  }
  0xdd   :  { %321 = vmatpush1.bf16.msra.mxu0 %v3097_v4  ;;  %576 = vmatpush1.bf16.msra.mxu1 %v3120_v11  ;;  %v3109_v17 = vld [vmem:[#allocation5 + $0x50] ss:$8 sps:$4 sm:$0xff]   ;;  %v3110_v18 = vld [vmem:[#allocation5 + $0x64] ss:$8 sps:$4 sm:$0xff]   ;;  %v3126_v19 = vld [vmem:[#allocation7 + $0x20] ss:$8 sps:$4 sm:$0xff]  }
  0xde   :  { %322 = vmatprep.subr.bf16.mxu0 %v3098_v5  ;;  %577 = vmatprep.subr.bf16.mxu1 %v3121_v12  ;;  %v3127_v20 = vld [vmem:[#allocation7 + $0x34] ss:$8 sps:$4 sm:$0xff]   ;;  %v3112_v21 = vld [vmem:[#allocation5 + $0x60] ss:$8 sps:$4 sm:$0xff]   ;;  %v3129_v23 = vld [vmem:[#allocation7 + $0x30] ss:$8 sps:$4 sm:$0xff]  }
  0xdf   :  { %v3113_v22 = vld [vmem:[#allocation5 + $0x74] ss:$8 sps:$4 sm:$0xff]   ;;  %v3130_v24 = vld [vmem:[#allocation7 + $0x44] ss:$8 sps:$4 sm:$0xff]   ;;  %v3115_v25 = vld [vmem:[#allocation5 + $0x70] ss:$8 sps:$4 sm:$0xff]  }
  0xe0   :  { %v3132_v26 = vld [vmem:[#allocation7 + $0x40] ss:$8 sps:$4 sm:$0xff]   ;;  %v3133_v28 = vld [vmem:[#allocation7 + $0x54] ss:$8 sps:$4 sm:$0xff]   ;;  %v3135_v29 = vld [vmem:[#allocation7 + $0x50] ss:$8 sps:$4 sm:$0xff]  }
  0xe1   :  { %323 = vmatpush1.bf16.msra.mxu0 %v3100_v6  ;;  %578 = vmatpush1.bf16.msra.mxu1 %v3123_v15  ;;  %v3136_v30 = vld [vmem:[#allocation7 + $0x64] ss:$8 sps:$4 sm:$0xff]   ;;  %v3138_v31 = vld [vmem:[#allocation7 + $0x60] ss:$8 sps:$4 sm:$0xff]   ;;  %v3139_v32 = vld [vmem:[#allocation7 + $0x74] ss:$8 sps:$4 sm:$0xff]  }
  0xe2   :  { %324 = vmatprep.subr.bf16.mxu0 %v3101_v7  ;;  %579 = vmatprep.subr.bf16.mxu1 %v3124_v16  ;;  %v3117_v33 = vld [vmem:[#allocation2 + $0x8] sm:$0xff]   ;;  %v3142_v35 = vld [vmem:[#allocation7 + $0x84] ss:$8 sps:$4 sm:$0xff]   ;;  %v3144_v36 = vld [vmem:[#allocation7 + $0x80] ss:$8 sps:$4 sm:$0xff]   ;;  %s3759_s11 = smov [#allocation22]  }
  0xe3   :  { %v3141_v34 = vld [vmem:[#allocation7 + $0x70] ss:$8 sps:$4 sm:$0xff]   ;;  %v3145_v37 = vld [vmem:[#allocation7 + $0x94] ss:$8 sps:$4 sm:$0xff]   ;;  %v3148_v39 = vld [vmem:[#allocation7 + $0xa4] ss:$8 sps:$4 sm:$0xff]  }
  0xe4   :  { %v3147_v38 = vld [vmem:[#allocation7 + $0x90] ss:$8 sps:$4 sm:$0xff]   ;;  %v3150_v40 = vld [vmem:[#allocation7 + $0xa0] ss:$8 sps:$4 sm:$0xff]   ;;  %v3151_v41 = vld [vmem:[#allocation7 + $0xb4] ss:$8 sps:$4 sm:$0xff]  }
  0xe5   :  { %325 = vmatpush1.bf16.msra.mxu0 %v3103_v8  ;;  %580 = vmatpush1.bf16.msra.mxu1 %v3126_v19  ;;  %v3153_v42 = vld [vmem:[#allocation7 + $0xb0] ss:$8 sps:$4 sm:$0xff]   ;;  %v3154_v43 = vld [vmem:[#allocation7 + $0xc4] ss:$8 sps:$4 sm:$0xff]   ;;  %v3156_v44 = vld [vmem:[#allocation7 + $0xc0] ss:$8 sps:$4 sm:$0xff]  }
  0xe6   :  { %326 = vmatprep.subr.bf16.mxu0 %v3104_v9  ;;  %581 = vmatprep.subr.bf16.mxu1 %v3127_v20  ;;  %v3157_v45 = vld [vmem:[#allocation7 + $0xd4] ss:$8 sps:$4 sm:$0xff]   ;;  %v3159_v46 = vld [vmem:[#allocation7 + $0xd0] ss:$8 sps:$4 sm:$0xff]   ;;  %v3160_v47 = vld [vmem:[#allocation7 + $0xe4] ss:$8 sps:$4 sm:$0xff]  }
  0xe7   :  { %v3162_v48 = vld [vmem:[#allocation7 + $0xe0] ss:$8 sps:$4 sm:$0xff]   ;;  %v3163_v49 = vld [vmem:[#allocation7 + $0xf4] ss:$8 sps:$4 sm:$0xff]   ;;  %v3165_v50 = vld [vmem:[#allocation7 + $0xf0] ss:$8 sps:$4 sm:$0xff]  }
  0xe8   :  { %v3166_v51 = vld [vmem:[#allocation8] ss:$16 sps:$4 sm:$0xff]   ;;  %v3168_v52 = vld [vmem:[#allocation8 + $0x4] ss:$16 sps:$4 sm:$0xff]   ;;  %v3171_v53 = vld [vmem:[#allocation8 + $0xc] ss:$16 sps:$4 sm:$0xff]  }
  0xe9   :  { %327 = vmatpush1.bf16.msra.mxu0 %v3106_v13  ;;  %582 = vmatpush1.bf16.msra.mxu1 %v3129_v23  ;;  %v3174_v54 = vld [vmem:[#allocation8 + $0x24] ss:$16 sps:$4 sm:$0xff]   ;;  %v3172_v55 = vld [vmem:[#allocation8 + $0x20] ss:$16 sps:$4 sm:$0xff]   ;;  %s2596_s18 = sshll.u32 %s3759_s11, 4  ;;  %s2597_s18 = int_to_ptr.vmem [resolvable:$true] %s2596_s18 }
  0xea   :  { %328 = vmatprep.subr.bf16.mxu0 %v3107_v14  ;;  %583 = vmatprep.subr.bf16.mxu1 %v3130_v24  ;;  %v3180_v56 = vld [vmem:[#allocation8 + $0x44] ss:$16 sps:$4 sm:$0xff]   ;;  %v3178_v57 = vld [vmem:[#allocation8 + $0x40] ss:$16 sps:$4 sm:$0xff]   ;;  %s3702_s27 = scalar_lea.vmem %s2597_s18, 512  ;;  %p3707_p13 = scmp.lt.s32.totalorder %s2597_s18, %s2597_s18 }
  0xeb   :  { %v3186_v58 = vld [vmem:[#allocation8 + $0x64] ss:$16 sps:$4 sm:$0xff]   ;;  %v3184_v59 = vld [vmem:[#allocation8 + $0x60] ss:$16 sps:$4 sm:$0xff]   ;;  %p3703_p12 = scmp.ne.s32.totalorder %s2597_s18, %s3702_s27  ;;  %p3708_p0 = scmp.lt.s32.totalorder %s3702_s27, %s3702_s27 }
  0xec   :  { %v3192_v60 = vld [vmem:[#allocation8 + $0x84] ss:$16 sps:$4 sm:$0xff]   ;;  %v3190_v61 = vld [vmem:[#allocation8 + $0x80] ss:$16 sps:$4 sm:$0xff]  }
  0xed   :  { %329 = vmatpush1.bf16.msra.mxu0 %v3109_v17  ;;  %584 = vmatpush1.bf16.msra.mxu1 %v3132_v26  ;;  %v3198_v62 = vld [vmem:[#allocation8 + $0xa4] ss:$16 sps:$4 sm:$0xff]   ;;  %v3196_v63 = vld [vmem:[#allocation8 + $0xa0] ss:$16 sps:$4 sm:$0xff]   ;;  %v3169_v26 = vld [vmem:[#allocation8 + $0x8] ss:$16 sps:$4 sm:$0xff]   ;;  %p3709_p1 = por %p3708_p0, %p3707_p13 }
  0xee   :  { %330 = vmatprep.subr.bf16.mxu0 %v3110_v18  ;;  %585 = vmatprep.subr.bf16.mxu1 %v3133_v28  ;;  %v3202_v1 = vld [vmem:[#allocation8 + $0xc0] ss:$16 sps:$4 sm:$0xff]   ;;  %v3210_v2 = vld [vmem:[#allocation8 + $0xe4] ss:$16 sps:$4 sm:$0xff]  }
  0xef   :  { %v3208_v3 = vld [vmem:[#allocation8 + $0xe0] ss:$16 sps:$4 sm:$0xff]   ;;  %v3216_v4 = vld [vmem:[#allocation8 + $0x104] ss:$16 sps:$4 sm:$0xff]   ;;  %p3710_p2 = pnand %p3709_p1, %p3703_p12 }
  0xf0   :  { %v3214_v5 = vld [vmem:[#allocation8 + $0x100] ss:$16 sps:$4 sm:$0xff]   ;;  %v3222_v6 = vld [vmem:[#allocation8 + $0x124] ss:$16 sps:$4 sm:$0xff]  }
  0xf1   :  { %331 = vmatpush1.bf16.msra.mxu0 %v3112_v21  ;;  %586 = vmatpush1.bf16.msra.mxu1 %v3135_v29  ;;  %v3220_v7 = vld [vmem:[#allocation8 + $0x120] ss:$16 sps:$4 sm:$0xff]   ;;  %v3228_v8 = vld [vmem:[#allocation8 + $0x144] ss:$16 sps:$4 sm:$0xff]  }
  0xf2   :  { %332 = vmatprep.subr.bf16.mxu0 %v3113_v22  ;;  %587 = vmatprep.subr.bf16.mxu1 %v3136_v30  ;;  %v3226_v9 = vld [vmem:[#allocation8 + $0x140] ss:$16 sps:$4 sm:$0xff]   ;;  %v3234_v10 = vld [vmem:[#allocation8 + $0x164] ss:$16 sps:$4 sm:$0xff]  }
  0xf3   :  { %v3232_v11 = vld [vmem:[#allocation8 + $0x160] ss:$16 sps:$4 sm:$0xff]   ;;  %v3240_v12 = vld [vmem:[#allocation8 + $0x184] ss:$16 sps:$4 sm:$0xff]  }
  0xf4   :  { %v3238_v13 = vld [vmem:[#allocation8 + $0x180] ss:$16 sps:$4 sm:$0xff]   ;;  %v3246_v14 = vld [vmem:[#allocation8 + $0x1a4] ss:$16 sps:$4 sm:$0xff]  }
  0xf5   :  { %333 = vmatpush1.bf16.msra.mxu0 %v3115_v25  ;;  %588 = vmatpush1.bf16.msra.mxu1 %v3138_v31  ;;  %v3244_v15 = vld [vmem:[#allocation8 + $0x1a0] ss:$16 sps:$4 sm:$0xff]  }
  0xf6   :  { %589 = vmatprep.subr.bf16.mxu1 %v3139_v32  ;;  %1024 = vmatprep.subr.bf16.mxu0 %v3168_v52  ;;  %v3217_v52 = vld [vmem:[#allocation8 + $0x108] ss:$16 sps:$4 sm:$0xff]  }
  0xf8   :  { %351 = vmatmul.mubr.bf16.vlgmr.msra.gmra.mrb[0].mxu0 %v3116_v27  ;;  %v3177_v27 = vld [vmem:[#allocation8 + $0x2c] ss:$16 sps:$4 sm:$0xff]  }
  0xf9   :  { %360 = vmatprep.mubr.bf16.mxu0 %v3758_v0  ;;  %590 = vmatpush1.bf16.msra.mxu1 %v3141_v34  ;;  %v3204_v0 = vld [vmem:[#allocation8 + $0xc4] ss:$16 sps:$4 sm:$0xff]  }
  0xfa   :  { %591 = vmatprep.subr.bf16.mxu1 %v3142_v35  ;;  %1025 = vmatpush1.bf16.msra.mxu0 %v3166_v51  ;;  %v3219_v51 = vld [vmem:[#allocation8 + $0x10c] ss:$16 sps:$4 sm:$0xff]  }
  0xfb   :  { %1026 = vmatprep.subr.bf16.mxu0 %v3174_v54  ;;  %v3223_v54 = vld [vmem:[#allocation8 + $0x128] ss:$16 sps:$4 sm:$0xff]  }
  0xfd   :  { %592 = vmatpush1.bf16.msra.mxu1 %v3144_v36  ;;  %v3183_v36 = vld [vmem:[#allocation8 + $0x4c] ss:$16 sps:$4 sm:$0xff]  }
  0xfe   :  { %593 = vmatprep.subr.bf16.mxu1 %v3145_v37  ;;  %1027 = vmatpush1.bf16.msra.mxu0 %v3172_v55  ;;  %v3231_v55 = vld [vmem:[#allocation8 + $0x14c] ss:$16 sps:$4 sm:$0xff]  }
  0xff   :  { %1028 = vmatprep.subr.bf16.mxu0 %v3180_v56  ;;  %v3229_v56 = vld [vmem:[#allocation8 + $0x148] ss:$16 sps:$4 sm:$0xff]  }
 0x100   :  { %361 = vmatmul.mubr.bf16.gmra.mrb[4].mxu0 %v3117_v33  ;;  %v3175_v33 = vld [vmem:[#allocation8 + $0x28] ss:$16 sps:$4 sm:$0xff]  }
 0x101   :  { %594 = vmatpush1.bf16.msra.mxu1 %v3147_v38 }
 0x102   :  { %595 = vmatprep.subr.bf16.mxu1 %v3148_v39  ;;  %1029 = vmatpush1.bf16.msra.mxu0 %v3178_v57  ;;  %v3237_v57 = vld [vmem:[#allocation8 + $0x16c] ss:$16 sps:$4 sm:$0xff]  }
 0x103   :  { %1030 = vmatprep.subr.bf16.mxu0 %v3186_v58  ;;  %v3235_v58 = vld [vmem:[#allocation8 + $0x168] ss:$16 sps:$4 sm:$0xff]  }
 0x105   :  { %596 = vmatpush1.bf16.msra.mxu1 %v3150_v40  ;;  %v3181_v40 = vld [vmem:[#allocation8 + $0x48] ss:$16 sps:$4 sm:$0xff]  }
 0x106   :  { %597 = vmatprep.subr.bf16.mxu1 %v3151_v41  ;;  %1031 = vmatpush1.bf16.msra.mxu0 %v3184_v59  ;;  %v3189_v41 = vld [vmem:[#allocation8 + $0x6c] ss:$16 sps:$4 sm:$0xff]  }
 0x107   :  { %1032 = vmatprep.subr.bf16.mxu0 %v3192_v60  ;;  %v3243_v59 = vld [vmem:[#allocation8 + $0x18c] ss:$16 sps:$4 sm:$0xff]   ;;  %v3241_v60 = vld [vmem:[#allocation8 + $0x188] ss:$16 sps:$4 sm:$0xff]  }
 0x109   :  { %598 = vmatpush1.bf16.msra.mxu1 %v3153_v42  ;;  %v3187_v42 = vld [vmem:[#allocation8 + $0x68] ss:$16 sps:$4 sm:$0xff]  }
 0x10a   :  { %599 = vmatprep.subr.bf16.mxu1 %v3154_v43  ;;  %1033 = vmatpush1.bf16.msra.mxu0 %v3190_v61  ;;  %v3195_v43 = vld [vmem:[#allocation8 + $0x8c] ss:$16 sps:$4 sm:$0xff]  }
 0x10b   :  { %1034 = vmatprep.subr.bf16.mxu0 %v3198_v62  ;;  %v3249_v61 = vld [vmem:[#allocation8 + $0x1ac] ss:$16 sps:$4 sm:$0xff]   ;;  %v3247_v62 = vld [vmem:[#allocation8 + $0x1a8] ss:$16 sps:$4 sm:$0xff]  }
 0x10d   :  { %600 = vmatpush1.bf16.msra.mxu1 %v3156_v44  ;;  %v3193_v44 = vld [vmem:[#allocation8 + $0x88] ss:$16 sps:$4 sm:$0xff]  }
 0x10e   :  { %601 = vmatprep.subr.bf16.mxu1 %v3157_v45  ;;  %1035 = vmatpush1.bf16.msra.mxu0 %v3196_v63  ;;  %v3201_v45 = vld [vmem:[#allocation8 + $0xac] ss:$16 sps:$4 sm:$0xff]   ;;  %v3252_v63 = vld [vmem:[#allocation8 + $0x1c4] ss:$16 sps:$4 sm:$0xff]  }
 0x10f   :  { %1036 = vmatprep.subr.bf16.mxu0 %v3204_v0  ;;  %v3255_v0 = vld [vmem:[#allocation8 + $0x1cc] ss:$16 sps:$4 sm:$0xff]  }
 0x111   :  { %602 = vmatpush1.bf16.msra.mxu1 %v3159_v46  ;;  %v3199_v46 = vld [vmem:[#allocation8 + $0xa8] ss:$16 sps:$4 sm:$0xff]  }
 0x112   :  { %603 = vmatprep.subr.bf16.mxu1 %v3160_v47  ;;  %1037 = vmatpush1.bf16.msra.mxu0 %v3202_v1  ;;  %v3207_v47 = vld [vmem:[#allocation8 + $0xcc] ss:$16 sps:$4 sm:$0xff]   ;;  %v3250_v1 = vld [vmem:[#allocation8 + $0x1c0] ss:$16 sps:$4 sm:$0xff]  }
 0x113   :  { %1038 = vmatprep.subr.bf16.mxu0 %v3210_v2  ;;  %v3253_v2 = vld [vmem:[#allocation8 + $0x1c8] ss:$16 sps:$4 sm:$0xff]  }
 0x115   :  { %604 = vmatpush1.bf16.msra.mxu1 %v3162_v48  ;;  %v3205_v48 = vld [vmem:[#allocation8 + $0xc8] ss:$16 sps:$4 sm:$0xff]  }
 0x116   :  { %605 = vmatprep.subr.bf16.mxu1 %v3163_v49  ;;  %1039 = vmatpush1.bf16.msra.mxu0 %v3208_v3  ;;  %v3213_v49 = vld [vmem:[#allocation8 + $0xec] ss:$16 sps:$4 sm:$0xff]   ;;  %v3258_v3 = vld [vmem:[#allocation8 + $0x1e4] ss:$16 sps:$4 sm:$0xff]  }
 0x117   :  { %1040 = vmatprep.subr.bf16.mxu0 %v3216_v4  ;;  %v3261_v4 = vld [vmem:[#allocation8 + $0x1ec] ss:$16 sps:$4 sm:$0xff]  }
 0x119   :  { %606 = vmatpush1.bf16.msra.mxu1 %v3165_v50  ;;  %v3211_v50 = vld [vmem:[#allocation8 + $0xe8] ss:$16 sps:$4 sm:$0xff]  }
 0x11a   :  { %1077 = vmatprep.subr.bf16.mxu1 %v3171_v53  ;;  %1041 = vmatpush1.bf16.msra.mxu0 %v3214_v5  ;;  %v3225_v53 = vld [vmem:[#allocation8 + $0x12c] ss:$16 sps:$4 sm:$0xff]   ;;  %v3256_v5 = vld [vmem:[#allocation8 + $0x1e0] ss:$16 sps:$4 sm:$0xff]  }
 0x11b   :  { %1042 = vmatprep.subr.bf16.mxu0 %v3222_v6  ;;  %v3259_v6 = vld [vmem:[#allocation8 + $0x1e8] ss:$16 sps:$4 sm:$0xff]  }
 0x11e   :  { %1043 = vmatpush1.bf16.msra.mxu0 %v3220_v7  ;;  %v3264_v7 = vld [vmem:[#allocation10 + $0x4] ss:$8 sps:$4 sm:$0xff]  }
 0x11f   :  { %1044 = vmatprep.subr.bf16.mxu0 %v3228_v8 }
 0x122   :  { %1045 = vmatpush1.bf16.msra.mxu0 %v3226_v9 }
 0x123   :  { %1046 = vmatprep.subr.bf16.mxu0 %v3234_v10 }
 0x126   :  { %1047 = vmatpush1.bf16.msra.mxu0 %v3232_v11 }
 0x127   :  { %1048 = vmatprep.subr.bf16.mxu0 %v3240_v12 }
 0x12a   :  { %1049 = vmatpush1.bf16.msra.mxu0 %v3238_v13 }
 0x12b   :  { %1050 = vmatprep.subr.bf16.mxu0 %v3246_v14 }
 0x12e   :  { %1051 = vmatpush1.bf16.msra.mxu0 %v3244_v15 }
 0x12f   :  { %1052 = vmatprep.subr.bf16.mxu0 %v3252_v63  ;;  %v3361_v63 = vld [vmem:[#allocation11 + $0x8] sm:$0xff]  }
 0x132   :  { %1053 = vmatpush1.bf16.msra.mxu0 %v3250_v1  ;;  %v3363_v1 = vld [vmem:[#allocation11 + $0x10] sm:$0xff]  }
 0x133   :  { %1054 = vmatprep.subr.bf16.mxu0 %v3258_v3  ;;  %v3365_v3 = vld [vmem:[#allocation11 + $0x18] sm:$0xff]  }
 0x136   :  { %1055 = vmatpush1.bf16.msra.mxu0 %v3256_v5  ;;  %v3367_v5 = vld [vmem:[#allocation11 + $0x20] sm:$0xff]  }
 0x137   :  { %1538 = vmatprep.subr.bf16.mxu0 %v3264_v7  ;;  %v3369_v7 = vld [vmem:[#allocation11 + $0x28] sm:$0xff]  }
 0x1cb   :  { %v352_v16 = vpop.f32.mrb[0].mxu0 }
 0x1cc   :  { %v354_v17 = vpop.f32.mrb[1].mxu0  ;;  %v371_v19 = vmax.f32 %v352_v16, 0.0 }
 0x1cd   :  { %v356_v18 = vpop.f32.mrb[2].mxu0  ;;  %v372_v22 = vmax.f32 %v354_v17, 0.0 }
 0x1ce   :  { %v373_v20 = vmax.f32 %v356_v18, 0.0  ;;  %v358_v21 = vpop.f32.mrb[3].mxu0  ;;  %v3262_v18 = vld [vmem:[#allocation10] ss:$8 sps:$4 sm:$0xff]  }
 0x1cf   :  { %v374_v23 = vmax.f32 %v358_v21, 0.0 }
 0x1d0   :  { %v379_v24 = vpack.c.bf16 %v373_v20, %v371_v19  ;;  %v3267_v19 = vld [vmem:[#allocation10 + $0x14] ss:$8 sps:$4 sm:$0xff]  }
 0x1d1   :  { %v380_v25 = vpack.c.bf16 %v374_v23, %v372_v22 }
 0x1d3   :  { %v362_v28 = vpop.f32.mrb[4].mxu0  ;;  %607 = vmatprep.mubr.bf16.mxu1 %v380_v25  ;;  %v3265_v25 = vld [vmem:[#allocation10 + $0x10] ss:$8 sps:$4 sm:$0xff]  }
 0x1d4   :  { %v375_v29 = vmax.f32 %v362_v28, 0.0  ;;  %v364_v30 = vpop.f32.mrb[5].mxu0  ;;  %608 = vmatmul.mubr.bf16.vlgmr.msra.gmra.mrb[0].mxu1 %v379_v24  ;;  %v3270_v28 = vld [vmem:[#allocation10 + $0x24] ss:$8 sps:$4 sm:$0xff]  }
 0x1d5   :  { %v376_v31 = vmax.f32 %v364_v30, 0.0  ;;  %v366_v32 = vpop.f32.mrb[6].mxu0  ;;  %1078 = vmatpush1.bf16.msra.mxu1 %v3169_v26 }
 0x1d6   :  { %v377_v34 = vmax.f32 %v366_v32, 0.0  ;;  %v368_v35 = vpop.f32.mrb[7].mxu0  ;;  %1079 = vmatprep.subr.bf16.mxu1 %v3177_v27  ;;  %v3268_v32 = vld [vmem:[#allocation10 + $0x20] ss:$8 sps:$4 sm:$0xff]  }
 0x1d7   :  { %v378_v37 = vmax.f32 %v368_v35, 0.0  ;;  %v3276_v35 = vld [vmem:[#allocation10 + $0x44] ss:$8 sps:$4 sm:$0xff]  }
 0x1d8   :  { %v381_v38 = vpack.c.bf16 %v377_v34, %v375_v29  ;;  %v3271_v34 = vld [vmem:[#allocation10 + $0x30] ss:$8 sps:$4 sm:$0xff]  }
 0x1d9   :  { %v382_v39 = vpack.c.bf16 %v378_v37, %v376_v31  ;;  %1080 = vmatpush1.bf16.msra.mxu1 %v3175_v33  ;;  %v3273_v33 = vld [vmem:[#allocation10 + $0x34] ss:$8 sps:$4 sm:$0xff]  }
 0x1da   :  { %1081 = vmatprep.subr.bf16.mxu1 %v3183_v36  ;;  %v3274_v36 = vld [vmem:[#allocation10 + $0x40] ss:$8 sps:$4 sm:$0xff]   ;;  %v3279_v37 = vld [vmem:[#allocation10 + $0x54] ss:$8 sps:$4 sm:$0xff]  }
 0x1db   :  { %617 = vmatprep.mubr.bf16.mxu1 %v382_v39  ;;  %v3282_v39 = vld [vmem:[#allocation10 + $0x64] ss:$8 sps:$4 sm:$0xff]  }
 0x1dc   :  { %618 = vmatmul.mubr.bf16.gmra.mrb[4].mxu1 %v381_v38  ;;  %v3277_v38 = vld [vmem:[#allocation10 + $0x50] ss:$8 sps:$4 sm:$0xff]  }
 0x1dd   :  { %1082 = vmatpush1.bf16.msra.mxu1 %v3181_v40  ;;  %v3280_v40 = vld [vmem:[#allocation10 + $0x60] ss:$8 sps:$4 sm:$0xff]  }
 0x1de   :  { %1083 = vmatprep.subr.bf16.mxu1 %v3189_v41  ;;  %v3285_v41 = vld [vmem:[#allocation10 + $0x74] ss:$8 sps:$4 sm:$0xff]  }
 0x1e1   :  { %1084 = vmatpush1.bf16.msra.mxu1 %v3187_v42  ;;  %v3283_v42 = vld [vmem:[#allocation10 + $0x70] ss:$8 sps:$4 sm:$0xff]  }
 0x1e2   :  { %1085 = vmatprep.subr.bf16.mxu1 %v3195_v43  ;;  %v3288_v43 = vld [vmem:[#allocation10 + $0x84] ss:$8 sps:$4 sm:$0xff]  }
 0x1e5   :  { %1086 = vmatpush1.bf16.msra.mxu1 %v3193_v44  ;;  %v3286_v44 = vld [vmem:[#allocation10 + $0x80] ss:$8 sps:$4 sm:$0xff]  }
 0x1e6   :  { %1087 = vmatprep.subr.bf16.mxu1 %v3201_v45  ;;  %v3291_v45 = vld [vmem:[#allocation10 + $0x94] ss:$8 sps:$4 sm:$0xff]  }
 0x1e9   :  { %1088 = vmatpush1.bf16.msra.mxu1 %v3199_v46  ;;  %v3289_v46 = vld [vmem:[#allocation10 + $0x90] ss:$8 sps:$4 sm:$0xff]  }
 0x1ea   :  { %1089 = vmatprep.subr.bf16.mxu1 %v3207_v47  ;;  %v3294_v47 = vld [vmem:[#allocation10 + $0xa4] ss:$8 sps:$4 sm:$0xff]  }
 0x1ed   :  { %1090 = vmatpush1.bf16.msra.mxu1 %v3205_v48  ;;  %v3292_v48 = vld [vmem:[#allocation10 + $0xa0] ss:$8 sps:$4 sm:$0xff]  }
 0x1ee   :  { %1091 = vmatprep.subr.bf16.mxu1 %v3213_v49  ;;  %v3297_v49 = vld [vmem:[#allocation10 + $0xb4] ss:$8 sps:$4 sm:$0xff]  }
 0x1f1   :  { %1092 = vmatpush1.bf16.msra.mxu1 %v3211_v50  ;;  %v3295_v50 = vld [vmem:[#allocation10 + $0xb0] ss:$8 sps:$4 sm:$0xff]  }
 0x1f2   :  { %1093 = vmatprep.subr.bf16.mxu1 %v3219_v51  ;;  %v3300_v51 = vld [vmem:[#allocation10 + $0xc4] ss:$8 sps:$4 sm:$0xff]  }
 0x1f5   :  { %1094 = vmatpush1.bf16.msra.mxu1 %v3217_v52  ;;  %v3298_v52 = vld [vmem:[#allocation10 + $0xc0] ss:$8 sps:$4 sm:$0xff]  }
 0x1f6   :  { %1095 = vmatprep.subr.bf16.mxu1 %v3225_v53  ;;  %v3303_v53 = vld [vmem:[#allocation10 + $0xd4] ss:$8 sps:$4 sm:$0xff]  }
 0x1f9   :  { %1096 = vmatpush1.bf16.msra.mxu1 %v3223_v54  ;;  %v3301_v54 = vld [vmem:[#allocation10 + $0xd0] ss:$8 sps:$4 sm:$0xff]  }
 0x1fa   :  { %1097 = vmatprep.subr.bf16.mxu1 %v3231_v55  ;;  %v3306_v55 = vld [vmem:[#allocation10 + $0xe4] ss:$8 sps:$4 sm:$0xff]  }
 0x1fd   :  { %1098 = vmatpush1.bf16.msra.mxu1 %v3229_v56  ;;  %v3304_v56 = vld [vmem:[#allocation10 + $0xe0] ss:$8 sps:$4 sm:$0xff]  }
 0x1fe   :  { %1099 = vmatprep.subr.bf16.mxu1 %v3237_v57  ;;  %v3309_v57 = vld [vmem:[#allocation10 + $0xf4] ss:$8 sps:$4 sm:$0xff]  }
 0x201   :  { %1100 = vmatpush1.bf16.msra.mxu1 %v3235_v58  ;;  %v3307_v58 = vld [vmem:[#allocation10 + $0xf0] ss:$8 sps:$4 sm:$0xff]  }
 0x202   :  { %1101 = vmatprep.subr.bf16.mxu1 %v3243_v59  ;;  %v3312_v59 = vld [vmem:[#allocation10 + $0x104] ss:$8 sps:$4 sm:$0xff]  }
 0x205   :  { %1102 = vmatpush1.bf16.msra.mxu1 %v3241_v60  ;;  %v3358_v60 = vld [vmem:[#allocation11 + $0x40] sm:$0xff]  }
 0x206   :  { %1103 = vmatprep.subr.bf16.mxu1 %v3249_v61  ;;  %v3359_v61 = vld [vmem:[#allocation11] sm:$0xff]  }
 0x209   :  { %1104 = vmatpush1.bf16.msra.mxu1 %v3247_v62  ;;  %v3360_v62 = vld [vmem:[#allocation11 + $0x48] sm:$0xff]  }
 0x20a   :  { %1105 = vmatprep.subr.bf16.mxu1 %v3255_v0  ;;  %v3362_v0 = vld [vmem:[#allocation11 + $0x50] sm:$0xff]  }
 0x20d   :  { %1106 = vmatpush1.bf16.msra.mxu1 %v3253_v2  ;;  %v3364_v2 = vld [vmem:[#allocation11 + $0x58] sm:$0xff]  }
 0x20e   :  { %1107 = vmatprep.subr.bf16.mxu1 %v3261_v4  ;;  %v3366_v4 = vld [vmem:[#allocation11 + $0x60] sm:$0xff]  }
 0x211   :  { %1108 = vmatpush1.bf16.msra.mxu1 %v3259_v6  ;;  %v3368_v6 = vld [vmem:[#allocation11 + $0x68] sm:$0xff]  }
 0x212   :  { %2856 = vmatprep.subr.bf16.mxu1 %v3358_v60  ;;  %v3328_v60 = vld [vmem:[#allocation10 + $0x160] ss:$8 sps:$4 sm:$0xff]  }
 0x2a7   :  { %v609_v8 = vpop.f32.mrb[0].mxu1 }
 0x2a8   :  { %v611_v9 = vpop.f32.mrb[1].mxu1  ;;  %v628_v11 = vmax.f32 %v609_v8, 0.0 }
 0x2a9   :  { %v613_v10 = vpop.f32.mrb[2].mxu1  ;;  %v629_v14 = vmax.f32 %v611_v9, 0.0 }
 0x2aa   :  { %v630_v12 = vmax.f32 %v613_v10, 0.0  ;;  %v615_v13 = vpop.f32.mrb[3].mxu1 }
 0x2ab   :  { %v631_v15 = vmax.f32 %v615_v13, 0.0 }
 0x2ac   :  { %v636_v16 = vpack.c.bf16 %v630_v12, %v628_v11 }
 0x2ad   :  { %v637_v17 = vpack.c.bf16 %v631_v15, %v629_v14 }
 0x2af   :  { %v619_v20 = vpop.f32.mrb[4].mxu1  ;;  %1056 = vmatprep.mubr.bf16.mxu0 %v637_v17  ;;  %1109 = vmatprep.mubr.bf16.mxu1 %v637_v17 }
 0x2b0   :  { %v632_v21 = vmax.f32 %v619_v20, 0.0  ;;  %v621_v22 = vpop.f32.mrb[5].mxu1  ;;  %1057 = vmatmul.mubr.bf16.vlgmr.msra.gmra.mrb[8].mxu0 %v636_v16  ;;  %1110 = vmatmul.mubr.bf16.vlgmr.msra.gmra.mrb[8].mxu1 %v636_v16 }
 0x2b1   :  { %v633_v23 = vmax.f32 %v621_v22, 0.0  ;;  %v623_v24 = vpop.f32.mrb[6].mxu1  ;;  %1539 = vmatpush1.bf16.msra.mxu0 %v3262_v18  ;;  %2857 = vmatpush3.bf16.msra.mxu1 %v3359_v61  ;;  %v3333_v61 = vld [vmem:[#allocation10 + $0x174] ss:$8 sps:$4 sm:$0xff]  }
 0x2b2   :  { %v634_v26 = vmax.f32 %v623_v24, 0.0  ;;  %v625_v27 = vpop.f32.mrb[7].mxu1  ;;  %1540 = vmatprep.subr.bf16.mxu0 %v3267_v19  ;;  %2858 = vmatprep.subr.bf16.mxu1 %v3360_v62  ;;  %v3331_v62 = vld [vmem:[#allocation10 + $0x170] ss:$8 sps:$4 sm:$0xff]  }
 0x2b3   :  { %v635_v29 = vmax.f32 %v625_v27, 0.0 }
 0x2b4   :  { %v638_v30 = vpack.c.bf16 %v634_v26, %v632_v21 }
 0x2b5   :  { %v639_v31 = vpack.c.bf16 %v635_v29, %v633_v23  ;;  %1541 = vmatpush1.bf16.msra.mxu0 %v3265_v25  ;;  %2859 = vmatpush3.bf16.msra.mxu1 %v3361_v63  ;;  %v3315_v29 = vld [vmem:[#allocation10 + $0x114] ss:$8 sps:$4 sm:$0xff]   ;;  %v3336_v63 = vld [vmem:[#allocation10 + $0x184] ss:$8 sps:$4 sm:$0xff]  }
 0x2b6   :  { %1542 = vmatprep.subr.bf16.mxu0 %v3270_v28  ;;  %2860 = vmatprep.subr.bf16.mxu1 %v3362_v0  ;;  %v3310_v28 = vld [vmem:[#allocation10 + $0x100] ss:$8 sps:$4 sm:$0xff]  }
 0x2b7   :  { %1066 = vmatprep.mubr.bf16.mxu0 %v639_v31  ;;  %1119 = vmatprep.mubr.bf16.mxu1 %v639_v31  ;;  %v3334_v0 = vld [vmem:[#allocation10 + $0x180] ss:$8 sps:$4 sm:$0xff]  }
 0x2b8   :  { %1067 = vmatmul.mubr.bf16.gmra.mrb[12].mxu0 %v638_v30  ;;  %1120 = vmatmul.mubr.bf16.gmra.mrb[12].mxu1 %v638_v30 }
 0x2b9   :  { %1543 = vmatpush1.bf16.msra.mxu0 %v3268_v32  ;;  %2861 = vmatpush3.bf16.msra.mxu1 %v3363_v1  ;;  %v3339_v1 = vld [vmem:[#allocation10 + $0x194] ss:$8 sps:$4 sm:$0xff]  }
 0x2ba   :  { %1544 = vmatprep.subr.bf16.mxu0 %v3273_v33  ;;  %2862 = vmatprep.subr.bf16.mxu1 %v3364_v2  ;;  %v3337_v2 = vld [vmem:[#allocation10 + $0x190] ss:$8 sps:$4 sm:$0xff]  }
 0x2bd   :  { %1545 = vmatpush1.bf16.msra.mxu0 %v3271_v34  ;;  %2863 = vmatpush3.bf16.msra.mxu1 %v3365_v3  ;;  %v3342_v3 = vld [vmem:[#allocation10 + $0x1a4] ss:$8 sps:$4 sm:$0xff]  }
 0x2be   :  { %1546 = vmatprep.subr.bf16.mxu0 %v3276_v35  ;;  %2864 = vmatprep.subr.bf16.mxu1 %v3366_v4  ;;  %v3340_v4 = vld [vmem:[#allocation10 + $0x1a0] ss:$8 sps:$4 sm:$0xff]  }
 0x2c1   :  { %1547 = vmatpush1.bf16.msra.mxu0 %v3274_v36  ;;  %2865 = vmatpush3.bf16.msra.mxu1 %v3367_v5  ;;  %v3345_v5 = vld [vmem:[#allocation10 + $0x1b4] ss:$8 sps:$4 sm:$0xff]  }
 0x2c2   :  { %1548 = vmatprep.subr.bf16.mxu0 %v3279_v37  ;;  %2866 = vmatprep.subr.bf16.mxu1 %v3368_v6  ;;  %v3343_v6 = vld [vmem:[#allocation10 + $0x1b0] ss:$8 sps:$4 sm:$0xff]  }
 0x2c5   :  { %1549 = vmatpush1.bf16.msra.mxu0 %v3277_v38  ;;  %2867 = vmatpush3.bf16.msra.mxu1 %v3369_v7  ;;  %v3313_v38 = vld [vmem:[#allocation10 + $0x110] ss:$8 sps:$4 sm:$0xff]   ;;  %v3348_v7 = vld [vmem:[#allocation10 + $0x1c4] ss:$8 sps:$4 sm:$0xff]  }
 0x2c6   :  { %1550 = vmatprep.subr.bf16.mxu0 %v3282_v39 }
 0x2c9   :  { %1551 = vmatpush1.bf16.msra.mxu0 %v3280_v40 }
 0x2ca   :  { %1552 = vmatprep.subr.bf16.mxu0 %v3285_v41 }
 0x2cd   :  { %1553 = vmatpush1.bf16.msra.mxu0 %v3283_v42 }
 0x2ce   :  { %1554 = vmatprep.subr.bf16.mxu0 %v3288_v43  ;;  %v3318_v43 = vld [vmem:[#allocation10 + $0x124] ss:$8 sps:$4 sm:$0xff]  }
 0x2d1   :  { %1555 = vmatpush1.bf16.msra.mxu0 %v3286_v44 }
 0x2d2   :  { %1556 = vmatprep.subr.bf16.mxu0 %v3291_v45 }
 0x2d5   :  { %1557 = vmatpush1.bf16.msra.mxu0 %v3289_v46 }
 0x2d6   :  { %1558 = vmatprep.subr.bf16.mxu0 %v3294_v47 }
 0x2d9   :  { %1559 = vmatpush1.bf16.msra.mxu0 %v3292_v48 }
 0x2da   :  { %1560 = vmatprep.subr.bf16.mxu0 %v3297_v49 }
 0x2dd   :  { %1561 = vmatpush1.bf16.msra.mxu0 %v3295_v50 }
 0x2de   :  { %1562 = vmatprep.subr.bf16.mxu0 %v3300_v51  ;;  %v3316_v51 = vld [vmem:[#allocation10 + $0x120] ss:$8 sps:$4 sm:$0xff]  }
 0x2e1   :  { %1563 = vmatpush1.bf16.msra.mxu0 %v3298_v52 }
 0x2e2   :  { %1564 = vmatprep.subr.bf16.mxu0 %v3303_v53  ;;  %v3321_v53 = vld [vmem:[#allocation10 + $0x134] ss:$8 sps:$4 sm:$0xff]  }
 0x2e5   :  { %1565 = vmatpush1.bf16.msra.mxu0 %v3301_v54  ;;  %v3319_v54 = vld [vmem:[#allocation10 + $0x130] ss:$8 sps:$4 sm:$0xff]  }
 0x2e6   :  { %1566 = vmatprep.subr.bf16.mxu0 %v3306_v55  ;;  %v3324_v55 = vld [vmem:[#allocation10 + $0x144] ss:$8 sps:$4 sm:$0xff]  }
 0x2e9   :  { %1567 = vmatpush1.bf16.msra.mxu0 %v3304_v56  ;;  %v3322_v56 = vld [vmem:[#allocation10 + $0x140] ss:$8 sps:$4 sm:$0xff]  }
 0x2ea   :  { %1568 = vmatprep.subr.bf16.mxu0 %v3309_v57  ;;  %v3327_v57 = vld [vmem:[#allocation10 + $0x154] ss:$8 sps:$4 sm:$0xff]  }
 0x2ed   :  { %1569 = vmatpush1.bf16.msra.mxu0 %v3307_v58  ;;  %v3325_v58 = vld [vmem:[#allocation10 + $0x150] ss:$8 sps:$4 sm:$0xff]  }
 0x2ee   :  { %1591 = vmatprep.subr.bf16.mxu0 %v3312_v59  ;;  %v3330_v59 = vld [vmem:[#allocation10 + $0x164] ss:$8 sps:$4 sm:$0xff]  }
 0x383   :  { %v1058_v8 = vpop.f32.mrb[8].mxu0  ;;  %v1111_v9 = vpop.f32.mrb[8].mxu1 }
 0x384   :  { %v1060_v10 = vpop.f32.mrb[9].mxu0  ;;  %v1113_v11 = vpop.f32.mrb[9].mxu1  ;;  %v1130_v14 = vmax.f32 %v1058_v8, 0.0  ;;  %v1132_v15 = vmax.f32 %v1111_v9, 0.0  ;;  %v3346_v8 = vld [vmem:[#allocation10 + $0x1c0] ss:$8 sps:$4 sm:$0xff]  }
 0x385   :  { %v1062_v12 = vpop.f32.mrb[10].mxu0  ;;  %v1115_v13 = vpop.f32.mrb[10].mxu1  ;;  %v1131_v20 = vmax.f32 %v1060_v10, 0.0  ;;  %v1133_v21 = vmax.f32 %v1113_v11, 0.0  ;;  %v3351_v9 = vld [vmem:[#allocation10 + $0x1d4] ss:$8 sps:$4 sm:$0xff]  }
 0x386   :  { %v1134_v16 = vmax.f32 %v1062_v12, 0.0  ;;  %v1136_v17 = vmax.f32 %v1115_v13, 0.0  ;;  %v1064_v18 = vpop.f32.mrb[11].mxu0  ;;  %v1117_v19 = vpop.f32.mrb[11].mxu1  ;;  %v3349_v10 = vld [vmem:[#allocation10 + $0x1d0] ss:$8 sps:$4 sm:$0xff]  }
 0x387   :  { %v1135_v22 = vmax.f32 %v1064_v18, 0.0  ;;  %v1137_v23 = vmax.f32 %v1117_v19, 0.0  ;;  %v3354_v11 = vld [vmem:[#allocation10 + $0x1e4] ss:$8 sps:$4 sm:$0xff]   ;;  %v3352_v12 = vld [vmem:[#allocation10 + $0x1e0] ss:$8 sps:$4 sm:$0xff]  }
 0x388   :  { %v1146_v24 = vpack.c.bf16 %v1134_v16, %v1130_v14  ;;  %v4037_v25 = vpack.c.bf16 %v1136_v17, %v1132_v15  ;;  %v3357_v13 = vld [vmem:[#allocation10 + $0x1f4] ss:$8 sps:$4 sm:$0xff]   ;;  %v3355_v14 = vld [vmem:[#allocation10 + $0x1f0] ss:$8 sps:$4 sm:$0xff]   ;;  %v3374_v19 = vld [vmem:[#allocation13] sm:$0xff]  }
 0x389   :  { %v1147_v26 = vpack.c.bf16 %v1135_v22, %v1131_v20  ;;  %v1149_v27 = vpack.c.bf16 %v1137_v23, %v1133_v21  ;;  %v3370_v15 = vld [vmem:[#allocation11 + $0x70] sm:$0xff]   ;;  %v3372_v17 = vld [vmem:[#allocation11 + $0x78] sm:$0xff]  }
 0x38a   :  { %v3371_v16 = vld [vmem:[#allocation11 + $0x30] sm:$0xff]   ;;  %2868 = vmatprep.subr.bf16.mxu1 %v3370_v15  ;;  %v3373_v18 = vld [vmem:[#allocation11 + $0x38] sm:$0xff]  }
 0x38b   :  { %v1068_v30 = vpop.f32.mrb[12].mxu0  ;;  %1570 = vmatprep.mubr.bf16.mxu0 %v1147_v26  ;;  %v1121_v31 = vpop.f32.mrb[12].mxu1  ;;  %2869 = vmatpush3.bf16.msra.mxu1 %v3371_v16 }
 0x38c   :  { %v1138_v32 = vmax.f32 %v1068_v30, 0.0  ;;  %v1070_v33 = vpop.f32.mrb[13].mxu0  ;;  %1571 = vmatmul.mubr.bf16.vlgmr.msra.gmra.mrb[16].mxu0 %v1146_v24  ;;  %v1140_v34 = vmax.f32 %v1121_v31, 0.0  ;;  %v1123_v35 = vpop.f32.mrb[13].mxu1  ;;  %2870 = vmatprep.subr.bf16.mxu1 %v3372_v17  ;;  %v3375_v30 = vld [vmem:[#allocation13 + $0x8] sm:$0xff]  }
 0x38d   :  { %v1139_v36 = vmax.f32 %v1070_v33, 0.0  ;;  %1592 = vmatpush1.bf16.msra.mxu0 %v3310_v28  ;;  %v1072_v37 = vpop.f32.mrb[14].mxu0  ;;  %v1141_v39 = vmax.f32 %v1123_v35, 0.0  ;;  %v1125_v40 = vpop.f32.mrb[14].mxu1 }
 0x38e   :  { %v1142_v41 = vmax.f32 %v1072_v37, 0.0  ;;  %v1074_v42 = vpop.f32.mrb[15].mxu0  ;;  %1593 = vmatprep.subr.bf16.mxu0 %v3315_v29  ;;  %v1144_v44 = vmax.f32 %v1125_v40, 0.0  ;;  %v1127_v45 = vpop.f32.mrb[15].mxu1  ;;  %v3376_v37 = vld [vmem:[#allocation13 + $0x10] sm:$0xff]  }
 0x38f   :  { %v1143_v46 = vmax.f32 %v1074_v42, 0.0  ;;  %v1145_v47 = vmax.f32 %v1127_v45, 0.0  ;;  %2871 = vmatpush3.bf16.msra.mxu1 %v3373_v18  ;;  %v3377_v42 = vld [vmem:[#allocation13 + $0x18] sm:$0xff]   ;;  %v3380_v45 = vld [vmem:[#allocation13 + $0x30] sm:$0xff]  }
 0x390   :  { %v1150_v48 = vpack.c.bf16 %v1142_v41, %v1138_v32  ;;  %v4039_v49 = vpack.c.bf16 %v1144_v44, %v1140_v34  ;;  %2944 = vmatprep.subr.bf16.mxu1 %v3374_v19  ;;  %v3379_v44 = vld [vmem:[#allocation13 + $0x28] sm:$0xff]  }
 0x391   :  { %v1151_v50 = vpack.c.bf16 %v1143_v46, %v1139_v36  ;;  %1594 = vmatpush1.bf16.msra.mxu0 %v3313_v38  ;;  %v1153_v52 = vpack.c.bf16 %v1145_v47, %v1141_v39  ;;  %v3381_v46 = vld [vmem:[#allocation13 + $0x38] sm:$0xff]   ;;  %v3382_v47 = vld [vmem:[#allocation14] sm:$0xff]  }
 0x392   :  { %1595 = vmatprep.subr.bf16.mxu0 %v3318_v43  ;;  %v3378_v43 = vld [vmem:[#allocation13 + $0x20] sm:$0xff]  }
 0x393   :  { %1580 = vmatprep.mubr.bf16.mxu0 %v1151_v50 }
 0x394   :  { %1581 = vmatmul.mubr.bf16.gmra.mrb[20].mxu0 %v1150_v48 }
 0x395   :  { %1596 = vmatpush1.bf16.msra.mxu0 %v3316_v51  ;;  %1623 = vmatprep.mubr.bf16.mxu0 %v1149_v27 }
 0x396   :  { %1597 = vmatprep.subr.bf16.mxu0 %v3321_v53 }
 0x399   :  { %1598 = vmatpush1.bf16.msra.mxu0 %v3319_v54 }
 0x39a   :  { %1599 = vmatprep.subr.bf16.mxu0 %v3324_v55 }
 0x39d   :  { %1600 = vmatpush1.bf16.msra.mxu0 %v3322_v56 }
 0x39e   :  { %1601 = vmatprep.subr.bf16.mxu0 %v3327_v57 }
 0x3a1   :  { %1602 = vmatpush1.bf16.msra.mxu0 %v3325_v58 }
 0x3a2   :  { %1603 = vmatprep.subr.bf16.mxu0 %v3330_v59 }
 0x3a5   :  { %1604 = vmatpush1.bf16.msra.mxu0 %v3328_v60 }
 0x3a6   :  { %1605 = vmatprep.subr.bf16.mxu0 %v3333_v61 }
 0x3a9   :  { %1606 = vmatpush1.bf16.msra.mxu0 %v3331_v62 }
 0x3aa   :  { %1607 = vmatprep.subr.bf16.mxu0 %v3336_v63 }
 0x3ad   :  { %1608 = vmatpush1.bf16.msra.mxu0 %v3334_v0 }
 0x3ae   :  { %1609 = vmatprep.subr.bf16.mxu0 %v3339_v1 }
 0x3b1   :  { %1610 = vmatpush1.bf16.msra.mxu0 %v3337_v2  ;;  %v3383_v2 = vld [vmem:[#allocation14 + $0x8] sm:$0xff]  }
 0x3b2   :  { %1611 = vmatprep.subr.bf16.mxu0 %v3342_v3  ;;  %v3384_v3 = vld [vmem:[#allocation14 + $0x10] sm:$0xff]  }
 0x3b5   :  { %1612 = vmatpush1.bf16.msra.mxu0 %v3340_v4  ;;  %v3385_v4 = vld [vmem:[#allocation14 + $0x18] sm:$0xff]  }
 0x3b6   :  { %1613 = vmatprep.subr.bf16.mxu0 %v3345_v5  ;;  %v3386_v5 = vld [vmem:[#allocation14 + $0x20] sm:$0xff]  }
 0x3b9   :  { %1614 = vmatpush1.bf16.msra.mxu0 %v3343_v6  ;;  %v3387_v6 = vld [vmem:[#allocation14 + $0x28] sm:$0xff]  }
 0x3ba   :  { %1615 = vmatprep.subr.bf16.mxu0 %v3348_v7  ;;  %v3388_v7 = vld [vmem:[#allocation14 + $0x30] sm:$0xff]  }
 0x3bd   :  { %1616 = vmatpush1.bf16.msra.mxu0 %v3346_v8  ;;  %v3389_v8 = vld [vmem:[#allocation14 + $0x38] sm:$0xff]  }
 0x3be   :  { %1617 = vmatprep.subr.bf16.mxu0 %v3351_v9  ;;  %v3390_v9 = vld [vmem:[#allocation16] sm:$0xff]  }
 0x3c1   :  { %1618 = vmatpush1.bf16.msra.mxu0 %v3349_v10  ;;  %v3391_v10 = vld [vmem:[#allocation16 + $0x8] sm:$0xff]  }
 0x3c2   :  { %1619 = vmatprep.subr.bf16.mxu0 %v3354_v11  ;;  %v3392_v11 = vld [vmem:[#allocation16 + $0x10] sm:$0xff]  }
 0x3c5   :  { %1620 = vmatpush1.bf16.msra.mxu0 %v3352_v12  ;;  %v3393_v12 = vld [vmem:[#allocation16 + $0x18] sm:$0xff]  }
 0x3c6   :  { %1621 = vmatprep.subr.bf16.mxu0 %v3357_v13  ;;  %v3394_v13 = vld [vmem:[#allocation16 + $0x20] sm:$0xff]  }
 0x3c9   :  { %1622 = vmatpush1.bf16.msra.mxu0 %v3355_v14  ;;  %v3395_v14 = vld [vmem:[#allocation16 + $0x28] sm:$0xff]  }
 0x3ca   :  { %2984 = vmatprep.subr.bf16.mxu0 %v3390_v9 }
 0x3cc   :  { %1624 = vmatmul.mubr.bf16.vlgmr.msra.gmra.mrb[16].mxu0 %v4037_v25 }
 0x3cd   :  { %1633 = vmatprep.mubr.bf16.mxu0 %v1153_v52  ;;  %2985 = vmatpush3.bf16.msra.mxu0 %v3390_v9 }
 0x3ce   :  { %2986 = vmatprep.subr.bf16.mxu0 %v3391_v10 }
 0x3d1   :  { %2987 = vmatpush3.bf16.msra.mxu0 %v3391_v10 }
 0x3d2   :  { %2988 = vmatprep.subr.bf16.mxu0 %v3392_v11 }
 0x3d4   :  { %1634 = vmatmul.mubr.bf16.gmra.mrb[20].mxu0 %v4039_v49 }
 0x3d5   :  { %2989 = vmatpush3.bf16.msra.mxu0 %v3392_v11 }
 0x3d6   :  { %2990 = vmatprep.subr.bf16.mxu0 %v3393_v12 }
 0x3d9   :  { %2991 = vmatpush3.bf16.msra.mxu0 %v3393_v12 }
 0x3da   :  { %2992 = vmatprep.subr.bf16.mxu0 %v3394_v13 }
 0x3dd   :  { %2993 = vmatpush3.bf16.msra.mxu0 %v3394_v13 }
 0x3de   :  { %2994 = vmatprep.subr.bf16.mxu0 %v3395_v14 }
 0x3e1   :  { %2995 = vmatpush3.bf16.msra.mxu0 %v3395_v14 }
 0x49f   :  { %v1625_v20 = vpop.f32.mrb[16].mxu0 }
 0x4a0   :  { %v1627_v21 = vpop.f32.mrb[17].mxu0  ;;  %v1644_v23 = vmax.f32 %v1625_v20, 0.0 }
 0x4a1   :  { %v1629_v22 = vpop.f32.mrb[18].mxu0  ;;  %v1645_v25 = vmax.f32 %v1627_v21, 0.0 }
 0x4a2   :  { %v1646_v24 = vmax.f32 %v1629_v22, 0.0  ;;  %v1631_v26 = vpop.f32.mrb[19].mxu0 }
 0x4a3   :  { %v1647_v27 = vmax.f32 %v1631_v26, 0.0  ;;  %v3396_v26 = vld [vmem:[#allocation16 + $0x30] sm:$0xff]  }
 0x4a4   :  { %v1652_v28 = vpack.c.bf16 %v1646_v24, %v1644_v23  ;;  %2996 = vmatprep.subr.bf16.mxu0 %v3396_v26 }
 0x4a5   :  { %v1653_v29 = vpack.c.bf16 %v1647_v27, %v1645_v25  ;;  %2997 = vmatpush3.bf16.msra.mxu0 %v3396_v26  ;;  %v3397_v25 = vld [vmem:[#allocation16 + $0x38] sm:$0xff]   ;;  %v3398_v27 = vld [vmem:[#allocation17] sm:$0xff]  }
 0x4a6   :  { %2998 = vmatprep.subr.bf16.mxu0 %v3397_v25 }
 0x4a7   :  { %v1635_v31 = vpop.f32.mrb[20].mxu0  ;;  %1816 = vmatprep.mubr.bf16.mxu1 %v1653_v29  ;;  %v3400_v29 = vld [vmem:[#allocation17 + $0x10] sm:$0xff]  }
 0x4a8   :  { %v1637_v32 = vpop.f32.mrb[21].mxu0  ;;  %1817 = vmatmul.mubr.bf16.vlgmr.msra.gmra.mrb[16].mxu1 %v1652_v28  ;;  %v1648_v34 = vmax.f32 %v1635_v31, 0.0  ;;  %v3399_v28 = vld [vmem:[#allocation17 + $0x8] sm:$0xff]   ;;  %v3402_v31 = vld [vmem:[#allocation17 + $0x20] sm:$0xff]  }
 0x4a9   :  { %v1639_v33 = vpop.f32.mrb[22].mxu0  ;;  %2945 = vmatpush3.bf16.msra.mxu1 %v3374_v19  ;;  %v1649_v38 = vmax.f32 %v1637_v32, 0.0  ;;  %2999 = vmatpush3.bf16.msra.mxu0 %v3397_v25  ;;  %v3403_v32 = vld [vmem:[#allocation17 + $0x28] sm:$0xff]  }
 0x4aa   :  { %v1650_v35 = vmax.f32 %v1639_v33, 0.0  ;;  %v1641_v36 = vpop.f32.mrb[23].mxu0  ;;  %2946 = vmatprep.subr.bf16.mxu1 %v3375_v30 }
 0x4ab   :  { %v1651_v39 = vmax.f32 %v1641_v36, 0.0 }
 0x4ac   :  { %v1654_v40 = vpack.c.bf16 %v1650_v35, %v1648_v34 }
 0x4ad   :  { %v1655_v41 = vpack.c.bf16 %v1651_v39, %v1649_v38  ;;  %2947 = vmatpush3.bf16.msra.mxu1 %v3375_v30  ;;  %v3401_v30 = vld [vmem:[#allocation17 + $0x18] sm:$0xff]  }
 0x4ae   :  { %2948 = vmatprep.subr.bf16.mxu1 %v3376_v37 }
 0x4af   :  { %1824 = vmatprep.mubr.bf16.mxu1 %v1655_v41 }
 0x4b0   :  { %1825 = vmatmul.mubr.bf16.gmra.mrb[20].mxu1 %v1654_v40 }
 0x4b1   :  { %2949 = vmatpush3.bf16.msra.mxu1 %v3376_v37 }
 0x4b2   :  { %2950 = vmatprep.subr.bf16.mxu1 %v3377_v42 }
 0x4b5   :  { %2951 = vmatpush3.bf16.msra.mxu1 %v3377_v42 }
 0x4b6   :  { %2952 = vmatprep.subr.bf16.mxu1 %v3378_v43 }
 0x4b9   :  { %2953 = vmatpush3.bf16.msra.mxu1 %v3378_v43  ;;  %v3404_v43 = vld [vmem:[#allocation17 + $0x30] sm:$0xff]  }
 0x4ba   :  { %2954 = vmatprep.subr.bf16.mxu1 %v3379_v44 }
 0x4bd   :  { %2955 = vmatpush3.bf16.msra.mxu1 %v3379_v44  ;;  %v3405_v44 = vld [vmem:[#allocation17 + $0x38] sm:$0xff]  }
 0x4be   :  { %2956 = vmatprep.subr.bf16.mxu1 %v3380_v45 }
 0x4c1   :  { %2957 = vmatpush3.bf16.msra.mxu1 %v3380_v45  ;;  %v3406_v45 = vld [vmem:[#allocation19] sm:$0xff]  }
 0x4c2   :  { %2958 = vmatprep.subr.bf16.mxu1 %v3381_v46  ;;  %3024 = vmatprep.subr.bf16.mxu0 %v3406_v45 }
 0x4c5   :  { %2959 = vmatpush3.bf16.msra.mxu1 %v3381_v46  ;;  %v3407_v46 = vld [vmem:[#allocation19 + $0x8] sm:$0xff]  }
 0x4c6   :  { %2964 = vmatprep.subr.bf16.mxu1 %v3382_v47 }
 0x57b   :  { %v2872_v48 = vpop.f32.mrb[16].mxu1 }
 0x57c   :  { %v2873_v49 = vpop.f32.mrb[17].mxu1 }
 0x57d   :  { %v2874_v50 = vadd.f32 %v2873_v49, %v2872_v48  ;;  %v2875_v51 = vpop.f32.mrb[18].mxu1  ;;  %v3409_v48 = vld [vmem:[#allocation19 + $0x18] sm:$0xff]   ;;  %v3410_v49 = vld [vmem:[#allocation19 + $0x20] sm:$0xff]  }
 0x57e   :  { %v2876_v52 = vpop.f32.mrb[19].mxu1 }
 0x57f   :  { %v2877_v53 = vadd.f32 %v2876_v52, %v2875_v51  ;;  %v1833_v54 = vmax.f32 %v2874_v50, 0.0  ;;  %v3411_v50 = vld [vmem:[#allocation19 + $0x28] sm:$0xff]  }
 0x581   :  { %v1834_v55 = vmax.f32 %v2877_v53, 0.0 }
 0x583   :  { %v1837_v56 = vpack.c.bf16 %v1834_v55, %v1833_v54  ;;  %v2878_v57 = vpop.f32.mrb[20].mxu1 }
 0x584   :  { %v2879_v58 = vpop.f32.mrb[21].mxu1 }
 0x585   :  { %v2880_v59 = vadd.f32 %v2879_v58, %v2878_v57  ;;  %v2881_v60 = vpop.f32.mrb[22].mxu1  ;;  %2960 = vmatprep.mubr.bf16.mxu1 %v1837_v56 }
 0x586   :  { %v2882_v61 = vpop.f32.mrb[23].mxu1 }
 0x587   :  { %v2883_v62 = vadd.f32 %v2882_v61, %v2881_v60  ;;  %v1835_v63 = vmax.f32 %v2880_v59, 0.0  ;;  %v3412_v61 = vld [vmem:[#allocation19 + $0x30] sm:$0xff]  }
 0x589   :  { %v1836_v0 = vmax.f32 %v2883_v62, 0.0  ;;  %v3413_v62 = vld [vmem:[#allocation19 + $0x38] sm:$0xff]  }
 0x58b   :  { %v1838_v1 = vpack.c.bf16 %v1836_v0, %v1835_v63  ;;  %v3414_v63 = vld [vmem:[#allocation20] sm:$0xff]   ;;  %v3415_v0 = vld [vmem:[#allocation20 + $0x8] sm:$0xff]  }
 0x58d   :  { %2961 = vmatmul.mubr.bf16.vlgmr.msra.gmra.mrb[24].mxu1 %v1838_v1  ;;  %v3416_v1 = vld [vmem:[#allocation20 + $0x10] sm:$0xff]  }
 0x58e   :  { %2965 = vmatpush3.bf16.msra.mxu1 %v3382_v47  ;;  %v3408_v47 = vld [vmem:[#allocation19 + $0x10] sm:$0xff]  }
 0x58f   :  { %2966 = vmatprep.subr.bf16.mxu1 %v3383_v2 }
 0x592   :  { %2967 = vmatpush3.bf16.msra.mxu1 %v3383_v2  ;;  %v3417_v2 = vld [vmem:[#allocation20 + $0x18] sm:$0xff]  }
 0x593   :  { %2968 = vmatprep.subr.bf16.mxu1 %v3384_v3 }
 0x596   :  { %2969 = vmatpush3.bf16.msra.mxu1 %v3384_v3  ;;  %v3418_v3 = vld [vmem:[#allocation20 + $0x20] sm:$0xff]  }
 0x597   :  { %2970 = vmatprep.subr.bf16.mxu1 %v3385_v4 }
 0x59a   :  { %2971 = vmatpush3.bf16.msra.mxu1 %v3385_v4  ;;  %v3419_v4 = vld [vmem:[#allocation20 + $0x28] sm:$0xff]  }
 0x59b   :  { %2972 = vmatprep.subr.bf16.mxu1 %v3386_v5 }
 0x59e   :  { %2973 = vmatpush3.bf16.msra.mxu1 %v3386_v5 }
 0x59f   :  { %2974 = vmatprep.subr.bf16.mxu1 %v3387_v6 }
 0x5a2   :  { %2975 = vmatpush3.bf16.msra.mxu1 %v3387_v6 }
 0x5a3   :  { %2976 = vmatprep.subr.bf16.mxu1 %v3388_v7 }
 0x5a6   :  { %2977 = vmatpush3.bf16.msra.mxu1 %v3388_v7 }
 0x5a7   :  { %2978 = vmatprep.subr.bf16.mxu1 %v3389_v8 }
 0x5aa   :  { %2979 = vmatpush3.bf16.msra.mxu1 %v3389_v8 }
 0x5ab   :  { %3004 = vmatprep.subr.bf16.mxu1 %v3398_v27 }
 0x660   :  { %v2962_v15 = vpop.f32.mrb[24].mxu1 }
 0x661   :  { %v1937_v16 = vpop.f32.mrb[25].mxu1  ;;  %v1954_v18 = vmax.f32 %v2962_v15, 0.0  ;;  %v3420_v15 = vld [vmem:[#allocation20 + $0x30] sm:$0xff]  }
 0x662   :  { %v2963_v17 = vpop.f32.mrb[26].mxu1  ;;  %v1952_v21 = vmax.f32 %v1937_v16, 0.0  ;;  %v3421_v16 = vld [vmem:[#allocation20 + $0x38] sm:$0xff]  }
 0x663   :  { %v1955_v19 = vmax.f32 %v2963_v17, 0.0  ;;  %v1940_v20 = vpop.f32.mrb[27].mxu1 }
 0x664   :  { %v1953_v22 = vmax.f32 %v1940_v20, 0.0 }
 0x665   :  { %v1957_v23 = vpack.c.bf16 %v1955_v19, %v1954_v18 }
 0x666   :  { %v1956_v24 = vpack.c.bf16 %v1953_v22, %v1952_v21 }
 0x668   :  { %2980 = vmatprep.mubr.bf16.mxu1 %v1956_v24 }
 0x669   :  { %2981 = vmatmul.mubr.bf16.vlgmr.msra.gmra.mrb[28].mxu1 %v1957_v23 }
 0x66a   :  { %3005 = vmatpush3.bf16.msra.mxu1 %v3398_v27 }
 0x66b   :  { %3006 = vmatprep.subr.bf16.mxu1 %v3399_v28 }
 0x66e   :  { %3007 = vmatpush3.bf16.msra.mxu1 %v3399_v28 }
 0x66f   :  { %3008 = vmatprep.subr.bf16.mxu1 %v3400_v29 }
 0x672   :  { %3009 = vmatpush3.bf16.msra.mxu1 %v3400_v29 }
 0x673   :  { %3010 = vmatprep.subr.bf16.mxu1 %v3401_v30 }
 0x676   :  { %3011 = vmatpush3.bf16.msra.mxu1 %v3401_v30 }
 0x677   :  { %3012 = vmatprep.subr.bf16.mxu1 %v3402_v31 }
 0x67a   :  { %3013 = vmatpush3.bf16.msra.mxu1 %v3402_v31 }
 0x67b   :  { %3014 = vmatprep.subr.bf16.mxu1 %v3403_v32 }
 0x67e   :  { %3015 = vmatpush3.bf16.msra.mxu1 %v3403_v32 }
 0x67f   :  { %3016 = vmatprep.subr.bf16.mxu1 %v3404_v43 }
 0x682   :  { %3017 = vmatpush3.bf16.msra.mxu1 %v3404_v43 }
 0x683   :  { %3018 = vmatprep.subr.bf16.mxu1 %v3405_v44 }
 0x686   :  { %3019 = vmatpush3.bf16.msra.mxu1 %v3405_v44 }
 0x687   :  { %3044 = vmatprep.subr.bf16.mxu1 %v3414_v63 }
 0x73c   :  { %v2982_v33 = vpop.f32.mrb[28].mxu1 }
 0x73d   :  { %v2056_v34 = vpop.f32.mrb[29].mxu1  ;;  %v2073_v36 = vmax.f32 %v2982_v33, 0.0 }
 0x73e   :  { %v2983_v35 = vpop.f32.mrb[30].mxu1  ;;  %v2071_v39 = vmax.f32 %v2056_v34, 0.0 }
 0x73f   :  { %v2074_v37 = vmax.f32 %v2983_v35, 0.0  ;;  %v2059_v38 = vpop.f32.mrb[31].mxu1 }
 0x740   :  { %v2072_v40 = vmax.f32 %v2059_v38, 0.0 }
 0x741   :  { %v2076_v41 = vpack.c.bf16 %v2074_v37, %v2073_v36 }
 0x742   :  { %v2075_v42 = vpack.c.bf16 %v2072_v40, %v2071_v39 }
 0x744   :  { %3000 = vmatprep.mubr.bf16.mxu0 %v2075_v42 }
 0x745   :  { %3001 = vmatmul.mubr.bf16.vlgmr.msra.gmra.mrb[24].mxu0 %v2076_v41 }
 0x746   :  { %3025 = vmatpush3.bf16.msra.mxu0 %v3406_v45 }
 0x747   :  { %3026 = vmatprep.subr.bf16.mxu0 %v3407_v46 }
 0x74a   :  { %3027 = vmatpush3.bf16.msra.mxu0 %v3407_v46 }
 0x74b   :  { %3028 = vmatprep.subr.bf16.mxu0 %v3408_v47 }
 0x74e   :  { %3029 = vmatpush3.bf16.msra.mxu0 %v3408_v47 }
 0x74f   :  { %3030 = vmatprep.subr.bf16.mxu0 %v3409_v48 }
 0x752   :  { %3031 = vmatpush3.bf16.msra.mxu0 %v3409_v48 }
 0x753   :  { %3032 = vmatprep.subr.bf16.mxu0 %v3410_v49 }
 0x756   :  { %3033 = vmatpush3.bf16.msra.mxu0 %v3410_v49 }
 0x757   :  { %3034 = vmatprep.subr.bf16.mxu0 %v3411_v50 }
 0x75a   :  { %3035 = vmatpush3.bf16.msra.mxu0 %v3411_v50 }
 0x75b   :  { %3036 = vmatprep.subr.bf16.mxu0 %v3412_v61 }
 0x75e   :  { %3037 = vmatpush3.bf16.msra.mxu0 %v3412_v61 }
 0x75f   :  { %3038 = vmatprep.subr.bf16.mxu0 %v3413_v62 }
 0x762   :  { %3039 = vmatpush3.bf16.msra.mxu0 %v3413_v62 }
 0x818   :  { %v3002_v51 = vpop.f32.mrb[24].mxu0 }
 0x819   :  { %v2175_v52 = vpop.f32.mrb[25].mxu0  ;;  %v2192_v54 = vmax.f32 %v3002_v51, 0.0 }
 0x81a   :  { %v3003_v53 = vpop.f32.mrb[26].mxu0  ;;  %v2190_v57 = vmax.f32 %v2175_v52, 0.0 }
 0x81b   :  { %v2193_v55 = vmax.f32 %v3003_v53, 0.0  ;;  %v2178_v56 = vpop.f32.mrb[27].mxu0 }
 0x81c   :  { %v2191_v58 = vmax.f32 %v2178_v56, 0.0 }
 0x81d   :  { %v2195_v59 = vpack.c.bf16 %v2193_v55, %v2192_v54 }
 0x81e   :  { %v2194_v60 = vpack.c.bf16 %v2191_v58, %v2190_v57 }
 0x820   :  { %3020 = vmatprep.mubr.bf16.mxu1 %v2194_v60 }
 0x821   :  { %3021 = vmatmul.mubr.bf16.vlgmr.msra.gmra.mrb[32].mxu1 %v2195_v59 }
 0x822   :  { %3045 = vmatpush3.bf16.msra.mxu1 %v3414_v63 }
 0x823   :  { %3046 = vmatprep.subr.bf16.mxu1 %v3415_v0 }
 0x826   :  { %3047 = vmatpush3.bf16.msra.mxu1 %v3415_v0 }
 0x827   :  { %3048 = vmatprep.subr.bf16.mxu1 %v3416_v1 }
 0x82a   :  { %3049 = vmatpush3.bf16.msra.mxu1 %v3416_v1 }
 0x82b   :  { %3050 = vmatprep.subr.bf16.mxu1 %v3417_v2 }
 0x82e   :  { %3051 = vmatpush3.bf16.msra.mxu1 %v3417_v2 }
 0x82f   :  { %3052 = vmatprep.subr.bf16.mxu1 %v3418_v3 }
 0x832   :  { %3053 = vmatpush3.bf16.msra.mxu1 %v3418_v3 }
 0x833   :  { %3054 = vmatprep.subr.bf16.mxu1 %v3419_v4 }
 0x836   :  { %3055 = vmatpush3.bf16.msra.mxu1 %v3419_v4 }
 0x837   :  { %3056 = vmatprep.subr.bf16.mxu1 %v3420_v15 }
 0x83a   :  { %3057 = vmatpush3.bf16.msra.mxu1 %v3420_v15 }
 0x83b   :  { %3058 = vmatprep.subr.bf16.mxu1 %v3421_v16 }
 0x83e   :  { %3059 = vmatpush3.bf16.msra.mxu1 %v3421_v16 }
 0x8f4   :  { %v3022_v5 = vpop.f32.mrb[32].mxu1 }
 0x8f5   :  { %v2294_v6 = vpop.f32.mrb[33].mxu1  ;;  %v2311_v8 = vmax.f32 %v3022_v5, 0.0 }
 0x8f6   :  { %v3023_v7 = vpop.f32.mrb[34].mxu1  ;;  %v2309_v11 = vmax.f32 %v2294_v6, 0.0 }
 0x8f7   :  { %v2312_v9 = vmax.f32 %v3023_v7, 0.0  ;;  %v2297_v10 = vpop.f32.mrb[35].mxu1 }
 0x8f8   :  { %v2310_v12 = vmax.f32 %v2297_v10, 0.0 }
 0x8f9   :  { %v2314_v13 = vpack.c.bf16 %v2312_v9, %v2311_v8 }
 0x8fa   :  { %v2313_v14 = vpack.c.bf16 %v2310_v12, %v2309_v11 }
 0x8fc   :  { %3040 = vmatprep.mubr.bf16.mxu0 %v2313_v14 }
 0x8fd   :  { %3041 = vmatmul.mubr.bf16.vlgmr.msra.gmra.mrb[28].mxu0 %v2314_v13 }
 0x9d0   :  { %v3042_v17 = vpop.f32.mrb[28].mxu0 }
 0x9d1   :  { %v2413_v18 = vpop.f32.mrb[29].mxu0  ;;  %v2430_v20 = vmax.f32 %v3042_v17, 0.0 }
 0x9d2   :  { %v3043_v19 = vpop.f32.mrb[30].mxu0  ;;  %v2428_v23 = vmax.f32 %v2413_v18, 0.0 }
 0x9d3   :  { %v2431_v21 = vmax.f32 %v3043_v19, 0.0  ;;  %v2416_v22 = vpop.f32.mrb[31].mxu0 }
 0x9d4   :  { %v2429_v24 = vmax.f32 %v2416_v22, 0.0 }
 0x9d5   :  { %v2433_v26 = vpack.c.bf16 %v2431_v21, %v2430_v20 }
 0x9d6   :  { %v2432_v25 = vpack.c.bf16 %v2429_v24, %v2428_v23 }
 0x9d8   :  { %3060 = vmatprep.mubr.bf16.mxu1 %v2432_v25 }
 0x9d9   :  { %3061 = vmatmul.mubr.bf16.vlgmr.msra.gmra.mrb[36].mxu1 %v2433_v26 }
 0xaac   :  { %v3062_v27 = vpop.f32.mrb[36].mxu1 }
 0xaad   :  { %2551 = vmax.xlane.f32.xlu1 %v3062_v27  ;;  %v2532_v28 = vpop.f32.mrb[37].mxu1 }
 0xaae   :  { %2547 = vmax.xlane.f32.xlu0 %v2532_v28  ;;  %v3063_v29 = vpop.f32.mrb[38].mxu1 }
 0xaaf   :  { %v2535_v30 = vpop.f32.mrb[39].mxu1 }
 0xab1   :  { %2553 = vmax.xlane.f32.xlu1 %v3063_v29 }
 0xab2   :  { %2549 = vmax.xlane.f32.xlu0 %v2535_v30 }
 0xb3a   :  { %v2552_v31 = vpop.xlane.xlu1 %2551 }
 0xb3b   :  { %v2557_v32 = vsub.f32 %v3062_v27, %v2552_v31  ;;  %v2548_v33 = vpop.xlane.xlu0 %2547 }
 0xb3c   :  { %v2555_v34 = vsub.f32 %v2532_v28, %v2548_v33 }
 0xb3d   :  { %v2563_v37 = vmul.f32 1.442695, %v2557_v32 }
 0xb3e   :  { %v2559_v35 = vmul.f32 1.442695, %v2555_v34  ;;  %v2554_v36 = vpop.xlane.xlu1 %2553 }
 0xb3f   :  { %v2550_v38 = vpop.xlane.xlu0 %2549  ;;  %v2558_v39 = vsub.f32 %v3063_v29, %v2554_v36 }
 0xb40   :  { %3422 = vpow2.f32 %v2559_v35  ;;  %v2556_v40 = vsub.f32 %v2535_v30, %v2550_v38 }
 0xb41   :  { %3424 = vpow2.f32 %v2563_v37  ;;  %v2565_v42 = vmul.f32 1.442695, %v2558_v39 }
 0xb42   :  { %v2561_v41 = vmul.f32 1.442695, %v2556_v40 }
 0xb44   :  { %3426 = vpow2.f32 %v2561_v41 }
 0xb45   :  { %3428 = vpow2.f32 %v2565_v42 }
 0xb4a   :  { %v3423_v43 = vpop.eup %3422 }
 0xb4b   :  { %2567 = vadd.xlane.f32.xlu0 %v3423_v43  ;;  %v3425_v44 = vpop.eup %3424 }
 0xb4e   :  { %v3427_v45 = vpop.eup %3426 }
 0xb4f   :  { %2571 = vadd.xlane.f32.xlu0 %v3425_v44  ;;  %2569 = vadd.xlane.f32.xlu1 %v3427_v45  ;;  %v3429_v46 = vpop.eup %3428 }
 0xb53   :  { %2573 = vadd.xlane.f32.xlu1 %v3429_v46 }
 0xbd8   :  { %v2568_v47 = vpop.xlane.xlu0 %2567 }
 0xbd9   :  { %3430 = vlog2.f32 %v2568_v47 }
 0xbdc   :  { %v2570_v48 = vpop.xlane.xlu1 %2569  ;;  %v2572_v49 = vpop.xlane.xlu0 %2571 }
 0xbdd   :  { %3432 = vlog2.f32 %v2570_v48 }
 0xbde   :  { %3434 = vlog2.f32 %v2572_v49 }
 0xbe0   :  { %v2574_v50 = vpop.xlane.xlu1 %2573 }
 0xbe1   :  { %3436 = vlog2.f32 %v2574_v50 }
 0xbe3   :  { %v3431_v51 = vpop.eup %3430 }
 0xbe4   :  { %v2576_v52 = vmul.f32 0.6931472, %v3431_v51 }
 0xbe6   :  { %v2583_v53 = vsub.f32 %v2555_v34, %v2576_v52 }
 0xbe7   :  { %v3433_v54 = vpop.eup %3432 }
 0xbe8   :  { %v3435_v55 = vpop.eup %3434  ;;  %2587 = vst [vmem:[#allocation22] sm:$0xff] %v2583_v53  ;;  %v2578_v56 = vmul.f32 0.6931472, %v3433_v54 }
 0xbe9   :  { %v2580_v57 = vmul.f32 0.6931472, %v3435_v55 }
 0xbea   :  { %v2584_v58 = vsub.f32 %v2556_v40, %v2578_v56 }
 0xbeb   :  { %v3437_v59 = vpop.eup %3436  ;;  %v2585_v60 = vsub.f32 %v2557_v32, %v2580_v57 }
 0xbec   :  { %2588 = vst [vmem:[#allocation22 + $0x8] sm:$0xff] %v2584_v58  ;;  %v2582_v61 = vmul.f32 0.6931472, %v3437_v59 }
 0xbed   :  { %2589 = vst [vmem:[#allocation22 + $0x10] sm:$0xff] %v2585_v60 }
 0xbee   :  { %v2586_v62 = vsub.f32 %v2558_v39, %v2582_v61 }
 0xbf0   :  { %2590 = vst [vmem:[#allocation22 + $0x18] sm:$0xff] %v2586_v62 }
 0xbf1   :  { %3713 = shalt.err (!%p3710_p2)
}
 0xbf2   :  { %s3714_s17 = scalar_lea.hbm %s4070_s12, 512 }
 0xbf3   :  { %p3715_p3 = scmp.ne.s32.totalorder %s4070_s12, %s3714_s17  ;;  %p3718_p4 = scmp.lt.u32.totalorder %s3714_s17, %s4070_s12 }
 0xbf5   :  { %p3720_p5 = pnand %p3718_p4, %p3715_p3 }
 0xbf7   :  { %3723 = shalt.err (!%p3720_p5)
}
 0xbf8   :  { %2602 = dma.vmem_to_hbm [thread:$0]  %s2597_s18, 512, %s4070_s12, [#allocation4], %s3741_s13, %s3741_s13, %s3742_s14  }
 0xbf9   :  { %3738 = dma.done.wait [#allocation4], 512  }
 0xbfa   :  { %3739 = vsyncadd [#allocation4], 4294966784 }
 0xbfb   :  { %2606 = vsyncpa [#allocation3], 1 }
 0xbfc   :  { %2607 = vsyncpa [#allocation6], 1 }
 0xbfd   :  { %2608 = vsyncpa [#allocation9], 1 }
 0xbfe   :  { %2609 = vsyncpa [#allocation12], 1 }
 0xbff   :  { %2610 = vsyncpa [#allocation15], 1 }
 0xc00   :  { %2611 = vsyncpa [#allocation18], 1 }
 0xc01   :  { %2612 = vsyncpa [#allocation21], 1 }
 0xc02   :  { %2613 = vsyncpa [#allocation4], 1 }

</bundles_post_ra>
